<compile_context>
chip_gen: v6e
topology: v6e:2x2x1
jax: 0.10.0
libtpu: 0.0.40
codegen_flags: <defaults>
</compile_context>

<pallas_src>
import functools

import jax
import jax.numpy as jnp
from jax.experimental import pallas as pl
from jax.experimental.pallas import tpu as pltpu

IN_FEATURES = 3072    # 3 * 32 * 32 flattened CIFAR-10 image
OUT_FEATURES = 10     # CIFAR-10 classes
OUT_PAD = 128         # lane-dense padded output width
BN_EPS = 1e-5


def _round_up(n, m):
    return ((n + m - 1) // m) * m


def mlp_kernel(x_ref, w1_ref, b1_ref, w2_ref, b2_ref,
               w3_ref, b3_ref, w4_ref, b4_ref, o_ref):
    # x tile arrives in bf16; each dot is bf16 x bf16 on the MXU with an f32
    # accumulator; bias-add / ReLU happen in f32 on the VPU.
    h = jnp.dot(x_ref[...], w1_ref[...], preferred_element_type=jnp.float32)
    h = jnp.maximum(h + b1_ref[...], 0.0)                      # 3072 -> 512, ReLU
    h = jnp.dot(h.astype(jnp.bfloat16), w2_ref[...],
                preferred_element_type=jnp.float32)
    h = jnp.maximum(h + b2_ref[...], 0.0)                      # 512 -> 256, ReLU
    h = jnp.dot(h.astype(jnp.bfloat16), w3_ref[...],
                preferred_element_type=jnp.float32)
    h = jnp.maximum(h + b3_ref[...], 0.0)                      # 256 -> 128, ReLU
    z = jnp.dot(h.astype(jnp.bfloat16), w4_ref[...],
                preferred_element_type=jnp.float32)            # 128 -> 128 (10 real)
    o_ref[...] = z + b4_ref[...]


@functools.partial(jax.jit, static_argnames=("batch_tile",))
def mlp_forward(x, packed_params, *, batch_tile=256):
    """x: [B, 3072] float32.  packed_params: output of pack_params()."""
    (w1, b1), (w2, b2), (w3, b3), (w4, b4) = packed_params
    B, D = x.shape

    # Batch tile: multiple of 16 (bf16 sublane packing), capped at batch_tile
    # (256 matches the v6e/v7x MXU systolic dimension).
    TB = min(batch_tile, _round_up(B, 16))
    B_pad = _round_up(B, TB)

    x_bf16 = x.astype(jnp.bfloat16)
    if B_pad != B:
        x_bf16 = jnp.pad(x_bf16, ((0, B_pad - B), (0, 0)))

    def resident(arr):
        # Full-array block with a constant index_map -> DMA'd once, VMEM-resident.
        return pl.BlockSpec(arr.shape, lambda i: (0, 0))

    logits_pad = pl.pallas_call(
        mlp_kernel,
        out_shape=jax.ShapeDtypeStruct((B_pad, OUT_PAD), jnp.float32),
        grid=(B_pad // TB,),
        in_specs=[
            pl.BlockSpec((TB, D), lambda i: (i, 0)),   # stream x tiles over batch
            resident(w1), resident(b1),
            resident(w2), resident(b2),
            resident(w3), resident(b3),
            resident(w4), resident(b4),
        ],
        out_specs=pl.BlockSpec((TB, OUT_PAD), lambda i: (i, 0)),
        compiler_params=pltpu.CompilerParams(
            dimension_semantics=("parallel",),      # megacore-shard batch tiles
            vmem_limit_bytes=32 << 20,              # ~8 MiB actually needed
        ),
    )(x_bf16, w1, b1, w2, b2, w3, b3, w4, b4)

    z = logits_pad[:B, :OUT_FEATURES]

    # BatchNorm1d(10, affine=False), training mode: full-batch mean, biased var.
    # Done in the wrapper (tiny [B,10] reduction) so the hot kernel can be
    # batch-tiled / megacore-sharded.
    mean = jnp.mean(z, axis=0, keepdims=True)
    var = jnp.mean(jnp.square(z - mean), axis=0, keepdims=True)
    return (z - mean) * jax.lax.rsqrt(var + BN_EPS)


# ----------------------------- parameters ---------------------------------

def init_linear(key, fan_in, fan_out):
    # PyTorch nn.Linear default init: U(-1/sqrt(fan_in), 1/sqrt(fan_in)).
    kw, kb = jax.random.split(key)
    bound = 1.0 / jnp.sqrt(float(fan_in))
    w = jax.random.uniform(kw, (fan_in, fan_out), jnp.float32, -bound, bound)
    b = jax.random.uniform(kb, (1, fan_out), jnp.float32, -bound, bound)
    return w, b


def init_params(key):
    dims = [(IN_FEATURES, 512), (512, 256), (256, 128), (128, OUT_FEATURES)]
    keys = jax.random.split(key, len(dims))
    return [init_linear(k, fi, fo) for k, (fi, fo) in zip(keys, dims)]


def pack_params(params):
    """Kernel layout: bf16 weights (halves HBM weight traffic ~7MB -> 3.5MB),
    f32 biases, last layer lane-padded 10 -> 128 with zeros."""
    (w1, b1), (w2, b2), (w3, b3), (w4, b4) = params
    w4p = jnp.zeros((w4.shape[0], OUT_PAD), jnp.float32).at[:, :OUT_FEATURES].set(w4)
    b4p = jnp.zeros((1, OUT_PAD), jnp.float32).at[:, :OUT_FEATURES].set(b4)
    return [(w1.astype(jnp.bfloat16), b1),
            (w2.astype(jnp.bfloat16), b2),
            (w3.astype(jnp.bfloat16), b3),
            (w4p.astype(jnp.bfloat16), b4p)]


# ----------------------------- reference ----------------------------------

def reference_forward(x, packed_params):
    """Pure-JAX reference using the same bf16 weights / f32 accumulation."""
    h = x.astype(jnp.bfloat16)
    for i, (w, b) in enumerate(packed_params):
        h = jnp.dot(h, w, preferred_element_type=jnp.float32) + b
        if i < 3:
            h = jnp.maximum(h, 0.0).astype(jnp.bfloat16)
    z = h[:, :OUT_FEATURES]
    mean = jnp.mean(z, axis=0, keepdims=True)
    var = jnp.mean(jnp.square(z - mean), axis=0, keepdims=True)
    return (z - mean) * jax.lax.rsqrt(var + BN_EPS)


if __name__ == "__main__":
    key = jax.random.PRNGKey(0)
    kx, kp = jax.random.split(key)
    B = 8  # small demo batch; CIFAR-10 flattened images: 3*32*32 = 3072 features
    x = jax.random.normal(kx, (B, IN_FEATURES), dtype=jnp.float32)
    params = init_params(kp)
    packed = pack_params(params)   # one-time packing (bf16 + lane padding)

    out = jax.block_until_ready(mlp_forward(x, packed))
    ref = jax.block_until_ready(reference_forward(x, packed))

    assert out.shape == (B, OUT_FEATURES)
    assert bool(jnp.all(jnp.isfinite(out)))
    assert jnp.allclose(out, ref, atol=1e-2, rtol=1e-2), \
        float(jnp.max(jnp.abs(out - ref)))
    print("KERNEL_OK")
</pallas_src>

<mosaic_0001>
module attributes {stable_mosaic.version = 11 : i64} {
  func.func @mlp_kernel(%arg0: i32, %arg1: memref<16x3072xbf16, #tpu.memory_space<vmem>>, %arg2: memref<3072x512xbf16, #tpu.memory_space<vmem>>, %arg3: memref<1x512xf32, #tpu.memory_space<vmem>>, %arg4: memref<512x256xbf16, #tpu.memory_space<vmem>>, %arg5: memref<1x256xf32, #tpu.memory_space<vmem>>, %arg6: memref<256x128xbf16, #tpu.memory_space<vmem>>, %arg7: memref<1x128xf32, #tpu.memory_space<vmem>>, %arg8: memref<128x128xbf16, #tpu.memory_space<vmem>>, %arg9: memref<1x128xf32, #tpu.memory_space<vmem>>, %arg10: memref<16x128xf32, #tpu.memory_space<vmem>>) attributes {dimension_semantics = [#tpu.dimension_semantics<parallel>], iteration_bounds = array<i64: 1>, scalar_prefetch = 0 : i64, scratch_operands = 0 : i64, tpu.core_type = #tpu.core_type<tc>, window_params = [{transform_indices = @transform_0, window_bounds = array<i64: 16, 3072>}, {pipeline_mode = #tpu.pipeline_mode<synchronous>, transform_indices = @transform_1, window_bounds = array<i64: 3072, 512>}, {pipeline_mode = #tpu.pipeline_mode<synchronous>, transform_indices = @transform_2, window_bounds = array<i64: 1, 512>}, {pipeline_mode = #tpu.pipeline_mode<synchronous>, transform_indices = @transform_3, window_bounds = array<i64: 512, 256>}, {pipeline_mode = #tpu.pipeline_mode<synchronous>, transform_indices = @transform_4, window_bounds = array<i64: 1, 256>}, {pipeline_mode = #tpu.pipeline_mode<synchronous>, transform_indices = @transform_5, window_bounds = array<i64: 256, 128>}, {pipeline_mode = #tpu.pipeline_mode<synchronous>, transform_indices = @transform_6, window_bounds = array<i64: 1, 128>}, {pipeline_mode = #tpu.pipeline_mode<synchronous>, transform_indices = @transform_7, window_bounds = array<i64: 128, 128>}, {pipeline_mode = #tpu.pipeline_mode<synchronous>, transform_indices = @transform_8, window_bounds = array<i64: 1, 128>}, {transform_indices = @transform_9, window_bounds = array<i64: 16, 128>}]} {
    %c0 = arith.constant 0 : index
    %c0_0 = arith.constant 0 : index
    %0 = vector.load %arg1[%c0, %c0_0] : memref<16x3072xbf16, #tpu.memory_space<vmem>>, vector<16x3072xbf16>
    %c0_1 = arith.constant 0 : index
    %c0_2 = arith.constant 0 : index
    %1 = vector.load %arg2[%c0_1, %c0_2] : memref<3072x512xbf16, #tpu.memory_space<vmem>>, vector<3072x512xbf16>
    %cst = arith.constant dense<0.000000e+00> : vector<16x512xf32>
    %2 = tpu.matmul %0, %1, %cst {dimension_numbers = #tpu.dot_dimension_numbers<[1], [0], [0], [1], [0, 0, 1, 1], [], []>} : vector<16x3072xbf16>, vector<3072x512xbf16>, vector<16x512xf32> -> vector<16x512xf32>
    %c0_3 = arith.constant 0 : index
    %c0_4 = arith.constant 0 : index
    %3 = vector.load %arg3[%c0_3, %c0_4] : memref<1x512xf32, #tpu.memory_space<vmem>>, vector<1x512xf32>
    %4 = vector.broadcast %3 : vector<1x512xf32> to vector<16x512xf32>
    %5 = arith.addf %2, %4 : vector<16x512xf32>
    %cst_5 = arith.constant 0.000000e+00 : f32
    %6 = vector.broadcast %cst_5 : f32 to vector<16x512xf32>
    %7 = arith.maximumf %5, %6 : vector<16x512xf32>
    %8 = arith.truncf %7 : vector<16x512xf32> to vector<16x512xbf16>
    %c0_6 = arith.constant 0 : index
    %c0_7 = arith.constant 0 : index
    %9 = vector.load %arg4[%c0_6, %c0_7] : memref<512x256xbf16, #tpu.memory_space<vmem>>, vector<512x256xbf16>
    %cst_8 = arith.constant dense<0.000000e+00> : vector<16x256xf32>
    %10 = tpu.matmul %8, %9, %cst_8 {dimension_numbers = #tpu.dot_dimension_numbers<[1], [0], [0], [1], [0, 0, 1, 1], [], []>} : vector<16x512xbf16>, vector<512x256xbf16>, vector<16x256xf32> -> vector<16x256xf32>
    %c0_9 = arith.constant 0 : index
    %c0_10 = arith.constant 0 : index
    %11 = vector.load %arg5[%c0_9, %c0_10] : memref<1x256xf32, #tpu.memory_space<vmem>>, vector<1x256xf32>
    %12 = vector.broadcast %11 : vector<1x256xf32> to vector<16x256xf32>
    %13 = arith.addf %10, %12 : vector<16x256xf32>
    %cst_11 = arith.constant 0.000000e+00 : f32
    %14 = vector.broadcast %cst_11 : f32 to vector<16x256xf32>
    %15 = arith.maximumf %13, %14 : vector<16x256xf32>
    %16 = arith.truncf %15 : vector<16x256xf32> to vector<16x256xbf16>
    %c0_12 = arith.constant 0 : index
    %c0_13 = arith.constant 0 : index
    %17 = vector.load %arg6[%c0_12, %c0_13] : memref<256x128xbf16, #tpu.memory_space<vmem>>, vector<256x128xbf16>
    %cst_14 = arith.constant dense<0.000000e+00> : vector<16x128xf32>
    %18 = tpu.matmul %16, %17, %cst_14 {dimension_numbers = #tpu.dot_dimension_numbers<[1], [0], [0], [1], [0, 0, 1, 1], [], []>} : vector<16x256xbf16>, vector<256x128xbf16>, vector<16x128xf32> -> vector<16x128xf32>
    %c0_15 = arith.constant 0 : index
    %c0_16 = arith.constant 0 : index
    %19 = vector.load %arg7[%c0_15, %c0_16] : memref<1x128xf32, #tpu.memory_space<vmem>>, vector<1x128xf32>
    %20 = vector.broadcast %19 : vector<1x128xf32> to vector<16x128xf32>
    %21 = arith.addf %18, %20 : vector<16x128xf32>
    %cst_17 = arith.constant 0.000000e+00 : f32
    %22 = vector.broadcast %cst_17 : f32 to vector<16x128xf32>
    %23 = arith.maximumf %21, %22 : vector<16x128xf32>
    %24 = arith.truncf %23 : vector<16x128xf32> to vector<16x128xbf16>
    %c0_18 = arith.constant 0 : index
    %c0_19 = arith.constant 0 : index
    %25 = vector.load %arg8[%c0_18, %c0_19] : memref<128x128xbf16, #tpu.memory_space<vmem>>, vector<128x128xbf16>
    %cst_20 = arith.constant dense<0.000000e+00> : vector<16x128xf32>
    %26 = tpu.matmul %24, %25, %cst_20 {dimension_numbers = #tpu.dot_dimension_numbers<[1], [0], [0], [1], [0, 0, 1, 1], [], []>} : vector<16x128xbf16>, vector<128x128xbf16>, vector<16x128xf32> -> vector<16x128xf32>
    %c0_21 = arith.constant 0 : index
    %c0_22 = arith.constant 0 : index
    %27 = vector.load %arg9[%c0_21, %c0_22] : memref<1x128xf32, #tpu.memory_space<vmem>>, vector<1x128xf32>
    %28 = vector.broadcast %27 : vector<1x128xf32> to vector<16x128xf32>
    %29 = arith.addf %26, %28 : vector<16x128xf32>
    %c0_23 = arith.constant 0 : index
    %c0_24 = arith.constant 0 : index
    %30 = vector.load %arg10[%c0_23, %c0_24] : memref<16x128xf32, #tpu.memory_space<vmem>>, vector<16x128xf32>
    tpu.vector_store %arg10[%c0_23, %c0_24], %29 {strides = array<i32>} : memref<16x128xf32, #tpu.memory_space<vmem>>, vector<16x128xf32>,
    return
  }
  func.func @transform_0(%arg0: i32) -> (i32, i32) {
    %c0_i32 = arith.constant 0 : i32
    %c0_i32_0 = arith.constant 0 : i32
    return %arg0, %c0_i32 : i32, i32
  }
  func.func @transform_1(%arg0: i32) -> (i32, i32) {
    %c0_i32 = arith.constant 0 : i32
    %c0_i32_0 = arith.constant 0 : i32
    %c0_i32_1 = arith.constant 0 : i32
    return %c0_i32, %c0_i32_0 : i32, i32
  }
  func.func @transform_2(%arg0: i32) -> (i32, i32) {
    %c0_i32 = arith.constant 0 : i32
    %c0_i32_0 = arith.constant 0 : i32
    %c0_i32_1 = arith.constant 0 : i32
    return %c0_i32, %c0_i32_0 : i32, i32
  }
  func.func @transform_3(%arg0: i32) -> (i32, i32) {
    %c0_i32 = arith.constant 0 : i32
    %c0_i32_0 = arith.constant 0 : i32
    %c0_i32_1 = arith.constant 0 : i32
    return %c0_i32, %c0_i32_0 : i32, i32
  }
  func.func @transform_4(%arg0: i32) -> (i32, i32) {
    %c0_i32 = arith.constant 0 : i32
    %c0_i32_0 = arith.constant 0 : i32
    %c0_i32_1 = arith.constant 0 : i32
    return %c0_i32, %c0_i32_0 : i32, i32
  }
  func.func @transform_5(%arg0: i32) -> (i32, i32) {
    %c0_i32 = arith.constant 0 : i32
    %c0_i32_0 = arith.constant 0 : i32
    %c0_i32_1 = arith.constant 0 : i32
    return %c0_i32, %c0_i32_0 : i32, i32
  }
  func.func @transform_6(%arg0: i32) -> (i32, i32) {
    %c0_i32 = arith.constant 0 : i32
    %c0_i32_0 = arith.constant 0 : i32
    %c0_i32_1 = arith.constant 0 : i32
    return %c0_i32, %c0_i32_0 : i32, i32
  }
  func.func @transform_7(%arg0: i32) -> (i32, i32) {
    %c0_i32 = arith.constant 0 : i32
    %c0_i32_0 = arith.constant 0 : i32
    %c0_i32_1 = arith.constant 0 : i32
    return %c0_i32, %c0_i32_0 : i32, i32
  }
  func.func @transform_8(%arg0: i32) -> (i32, i32) {
    %c0_i32 = arith.constant 0 : i32
    %c0_i32_0 = arith.constant 0 : i32
    %c0_i32_1 = arith.constant 0 : i32
    return %c0_i32, %c0_i32_0 : i32, i32
  }
  func.func @transform_9(%arg0: i32) -> (i32, i32) {
    %c0_i32 = arith.constant 0 : i32
    %c0_i32_0 = arith.constant 0 : i32
    return %arg0, %c0_i32 : i32, i32
  }
}

</mosaic_0001>

<bundles_post_ra>
// kernel: mlp_forward.1
= control target key start
LH: loop header
LB: loop body
LE: loop exit
PB: predicated region body
PF: predicated region fallthrough
CT: control target
= control target key end

     0   :  { %14 = vsyncpa [#allocation3], 0  ;;  %s9596_s0 = inlined_call_operand.vmem [shape: bf16[16,3072], index: 0, kind: input, shape index: {}]   ;;  %s9597_s1 = inlined_call_operand.hbm [shape: bf16[3072,512], index: 1, kind: input, shape index: {}]   ;;  %s9598_s2 = inlined_call_operand.hbm [shape: f32[1,512], index: 2, kind: input, shape index: {}]   ;;  %s9599_s3 = inlined_call_operand.hbm [shape: bf16[512,256], index: 3, kind: input, shape index: {}]   ;;  %s9600_s4 = inlined_call_operand.hbm [shape: f32[1,256], index: 4, kind: input, shape index: {}]   ;;  %s9601_s5 = inlined_call_operand.hbm [shape: bf16[256,128], index: 5, kind: input, shape index: {}]   ;;  %s9602_s6 = inlined_call_operand.hbm [shape: f32[1,128], index: 6, kind: input, shape index: {}]   ;;  %s9603_s7 = inlined_call_operand.hbm [shape: bf16[128,128], index: 7, kind: input, shape index: {}]   ;;  %s9604_s8 = inlined_call_operand.hbm [shape: f32[1,128], index: 8, kind: input, shape index: {}]   ;;  %s9605_s9 = inlined_call_operand.vmem [shape: f32[16,128], index: 9, kind: output, shape index: {}]  }
   0x1   :  { %15 = vsyncpa [#allocation5], 0 }
   0x2   :  { %16 = vsyncpa [#allocation8], 0 }
   0x3   :  { %17 = vsyncpa [#allocation11], 0 }
   0x4   :  { %18 = vsyncpa [#allocation14], 0  ;;  %s9134_s30 = smov [#allocation4]   ;;  %s9135_s11 = smov [#allocation7]  }
   0x5   :  { %s39_s10 = sshll.u32 %s9134_s30, 4  ;;  %s61_s12 = sshll.u32 %s9135_s11, 4  ;;  %s40_s10 = int_to_ptr.vmem [resolvable:$true] %s39_s10  ;;  %s62_s12 = int_to_ptr.vmem [resolvable:$true] %s61_s12 }
   0x6   :  { %s8972_s13 = scalar_lea.vmem %s40_s10, 64  ;;  %p8977_p1 = scmp.lt.s32.totalorder %s40_s10, %s40_s10 }
   0x7   :  { %p8973_p0 = scmp.ne.s32.totalorder %s40_s10, %s8972_s13  ;;  %p8978_p2 = scmp.lt.s32.totalorder %s8972_s13, %s8972_s13 }
   0x9   :  { %p8979_p3 = por %p8978_p2, %p8977_p1 }
   0xb   :  { %p8980_p4 = pnand %p8979_p3, %p8973_p0 }
   0xd   :  { %8983 = shalt.err (!%p8980_p4)
}
   0xe   :  { %42 = dma.hbm_to_vmem [thread:$0]  %s9598_s2, 64, %s40_s10, [#allocation5]  }
   0xf   :  { %s8992_s16 = scalar_lea.vmem %s62_s12, 32  ;;  %p8997_p6 = scmp.lt.s32.totalorder %s62_s12, %s62_s12 }
  0x10   :  { %p8993_p5 = scmp.ne.s32.totalorder %s62_s12, %s8992_s16  ;;  %p8998_p7 = scmp.lt.s32.totalorder %s8992_s16, %s8992_s16 }
  0x12   :  { %p8999_p8 = por %p8998_p7, %p8997_p6 }
  0x14   :  { %p9000_p9 = pnand %p8999_p8, %p8993_p5 }
  0x16   :  { %9003 = shalt.err (!%p9000_p9)
}
  0x17   :  { %64 = dma.hbm_to_vmem [thread:$0]  %s9600_s4, 32, %s62_s12, [#allocation8]  }
  0x18   :  { %s9136_s19 = smov [#allocation10]   ;;  %s9137_s21 = smov [#allocation2]  }
  0x19   :  { %s83_s20 = sshll.u32 %s9136_s19, 4  ;;  %s26_s22 = sshll.u32 %s9137_s21, 4  ;;  %s84_s20 = int_to_ptr.vmem [resolvable:$true] %s83_s20  ;;  %s27_s22 = int_to_ptr.vmem [resolvable:$true] %s26_s22 }
  0x1a   :  { %s9012_s23 = scalar_lea.vmem %s84_s20, 16  ;;  %s9016_s2 = scalar_lea.vmem %s84_s20, 32 }
  0x1b   :  { %p9013_p10 = scmp.ne.s32.totalorder %s84_s20, %s9012_s23  ;;  %p9017_p11 = scmp.lt.s32.totalorder %s84_s20, %s84_s20 }
  0x1c   :  { %p9018_p12 = scmp.lt.s32.totalorder %s9016_s2, %s9012_s23 }
  0x1e   :  { %p9019_p13 = por %p9018_p12, %p9017_p11 }
  0x20   :  { %p9020_p0 = pnand %p9019_p13, %p9013_p10 }
  0x22   :  { %9023 = shalt.err (!%p9020_p0)
}
  0x23   :  { %86 = dma.hbm_to_vmem [thread:$0]  %s9602_s6, 16, %s84_s20, [#allocation11]  }
  0x24   :  { %s9032_s26 = scalar_lea.vmem %s27_s22, 98304  ;;  %p9037_p2 = scmp.lt.s32.totalorder %s27_s22, %s27_s22 }
  0x25   :  { %p9033_p1 = scmp.ne.s32.totalorder %s27_s22, %s9032_s26  ;;  %p9038_p3 = scmp.lt.s32.totalorder %s9032_s26, %s9032_s26 }
  0x27   :  { %p9039_p4 = por %p9038_p3, %p9037_p2 }
  0x29   :  { %p9040_p5 = pnand %p9039_p4, %p9033_p1 }
  0x2b   :  { %9043 = shalt.err (!%p9040_p5)
}
  0x2c   :  { %s9138_s4 = smov 256   ;;  %s9139_s27 = smov 16  }
  0x2d   :  { %32 = dma.hbm_to_vmem [thread:$0]  %s9597_s1, 98304, %s27_s22, [#allocation3], %s9138_s4, %s9138_s4, %s9139_s27  }
  0x2e   :  { %s9140_s30 = smov [#allocation6]  }
  0x2f   :  { %s48_s10 = sshll.u32 %s9140_s30, 4  ;;  %s49_s10 = int_to_ptr.vmem [resolvable:$true] %s48_s10 }
  0x30   :  { %s9052_s11 = scalar_lea.vmem %s49_s10, 8192  ;;  %p9057_p7 = scmp.lt.s32.totalorder %s49_s10, %s49_s10 }
  0x31   :  { %p9053_p6 = scmp.ne.s32.totalorder %s49_s10, %s9052_s11  ;;  %p9058_p8 = scmp.lt.s32.totalorder %s9052_s11, %s9052_s11 }
  0x33   :  { %p9059_p9 = por %p9058_p8, %p9057_p7 }
  0x35   :  { %p9060_p10 = pnand %p9059_p9, %p9053_p6 }
  0x37   :  { %9063 = shalt.err (!%p9060_p10)
}
  0x38   :  { %s9141_s6 = smov 128   ;;  %s9142_s12 = smov 8  }
  0x39   :  { %54 = dma.hbm_to_vmem [thread:$0]  %s9599_s3, 8192, %s49_s10, [#allocation5], %s9141_s6, %s9141_s6, %s9142_s12  }
  0x3a   :  { %s9143_s15 = smov [#allocation9]  }
  0x3b   :  { %s70_s16 = sshll.u32 %s9143_s15, 4  ;;  %s71_s16 = int_to_ptr.vmem [resolvable:$true] %s70_s16 }
  0x3c   :  { %s9072_s1 = scalar_lea.vmem %s71_s16, 2048  ;;  %p9077_p12 = scmp.lt.s32.totalorder %s71_s16, %s71_s16 }
  0x3d   :  { %p9073_p11 = scmp.ne.s32.totalorder %s71_s16, %s9072_s1  ;;  %p9078_p13 = scmp.lt.s32.totalorder %s9072_s1, %s9072_s1 }
  0x3f   :  { %p9079_p0 = por %p9078_p13, %p9077_p12 }
  0x41   :  { %p9080_p1 = pnand %p9079_p0, %p9073_p11 }
  0x43   :  { %9083 = shalt.err (!%p9080_p1)
}
  0x44   :  { %s9144_s17 = smov 64   ;;  %s9145_s18 = smov 4  }
  0x45   :  { %76 = dma.hbm_to_vmem [thread:$0]  %s9601_s5, 2048, %s71_s16, [#allocation8], %s9144_s17, %s9144_s17, %s9145_s18  }
  0x46   :  { %s9146_s21 = smov [#allocation12]   ;;  %s9147_s23 = smov [#allocation13]  }
  0x47   :  { %s92_s22 = sshll.u32 %s9146_s21, 4  ;;  %s105_s3 = sshll.u32 %s9147_s23, 4  ;;  %s93_s22 = int_to_ptr.vmem [resolvable:$true] %s92_s22  ;;  %s106_s3 = int_to_ptr.vmem [resolvable:$true] %s105_s3 }
  0x48   :  { %s9092_s2 = scalar_lea.vmem %s93_s22, 1024  ;;  %p9097_p3 = scmp.lt.s32.totalorder %s93_s22, %s93_s22 }
  0x49   :  { %p9093_p2 = scmp.ne.s32.totalorder %s93_s22, %s9092_s2  ;;  %p9098_p4 = scmp.lt.s32.totalorder %s9092_s2, %s9092_s2 }
  0x4b   :  { %p9099_p5 = por %p9098_p4, %p9097_p3 }
  0x4d   :  { %p9100_p6 = pnand %p9099_p5, %p9093_p2 }
  0x4f   :  { %9103 = shalt.err (!%p9100_p6)
}
  0x50   :  { %98 = dma.hbm_to_vmem [thread:$0]  %s9603_s7, 1024, %s93_s22, [#allocation11], %s9144_s17, %s9144_s17, %s9145_s18  }
  0x51   :  { %s9112_s26 = scalar_lea.vmem %s106_s3, 16  ;;  %s9116_s5 = scalar_lea.vmem %s106_s3, 32 }
  0x52   :  { %p9113_p7 = scmp.ne.s32.totalorder %s106_s3, %s9112_s26  ;;  %p9117_p8 = scmp.lt.s32.totalorder %s106_s3, %s106_s3 }
  0x53   :  { %p9118_p9 = scmp.lt.s32.totalorder %s9116_s5, %s9112_s26 }
  0x55   :  { %p9119_p10 = por %p9118_p9, %p9117_p8 }
  0x57   :  { %p9120_p11 = pnand %p9119_p10, %p9113_p7 }
  0x59   :  { %9123 = shalt.err (!%p9120_p11)
}
  0x5a   :  { %108 = dma.hbm_to_vmem [thread:$0]  %s9604_s8, 16, %s106_s3, [#allocation14]  }
  0x5b   :  { %9124 = dma.done.wait [#allocation3], 98304  }
  0x5c   :  { %9125 = vsyncadd [#allocation3], 4294868992 }
  0x5d   :  { %9126 = dma.done.wait [#allocation5], 8256  }
  0x5e   :  { %9127 = vsyncadd [#allocation5], 4294959040 }
  0x5f   :  { %9128 = dma.done.wait [#allocation8], 2080  }
  0x60   :  { %9129 = vsyncadd [#allocation8], 4294965216 }
  0x61   :  { %9130 = dma.done.wait [#allocation11], 1040  }
  0x62   :  { %9131 = vsyncadd [#allocation11], 4294966256 }
  0x63   :  { %9132 = dma.done.wait [#allocation14], 16  }
  0x64   :  { %9133 = vsyncadd [#allocation14], 4294967280  ;;  %v7691_v0 = vld [vmem:[#allocation2 + $0xe4] ss:$16 sps:$4 sm:$0xff]   ;;  %v7695_v2 = vld [vmem:[#allocation2 + $0xe0] ss:$16 sps:$4 sm:$0xff]  }
  0x65   :  { %v7693_v1 = vld [vmem:[#allocation2 + $0x2e4] ss:$16 sps:$4 sm:$0xff]   ;;  %4908 = vmatprep.subr.bf16.mxu0 %v7691_v0  ;;  %v7696_v3 = vld [vmem:[#allocation2 + $0x2e0] ss:$16 sps:$4 sm:$0xff]   ;;  %v135_v50 = vld [vmem:[%s9596_s0 + $0x8] sm:$0xff]  ;;  %vm9149_vm0 = vmmov 0  }
  0x66   :  { %4951 = vmatprep.subr.bf16.mxu1 %v7693_v1  ;;  %v7697_v4 = vld [vmem:[#allocation2 + $0xc4] ss:$16 sps:$4 sm:$0xff]   ;;  %4909 = vmatpush1.bf16.msra.mxu0 %v7695_v2  ;;  %v7701_v6 = vld [vmem:[#allocation2 + $0xc0] ss:$16 sps:$4 sm:$0xff]   ;;  %v147_v51 = vld [vmem:[%s9596_s0 + $0x68] sm:$0xff] }
  0x67   :  { %4952 = vmatpush1.bf16.msra.mxu1 %v7696_v3  ;;  %v7699_v5 = vld [vmem:[#allocation2 + $0x2c4] ss:$16 sps:$4 sm:$0xff]   ;;  %4910 = vmatprep.subr.bf16.mxu0 %v7697_v4  ;;  %v7702_v7 = vld [vmem:[#allocation2 + $0x2c0] ss:$16 sps:$4 sm:$0xff]   ;;  %v9238_v55 = vcombine.high %v135_v50, %v147_v51 }
  0x68   :  { %4953 = vmatprep.subr.bf16.mxu1 %v7699_v5  ;;  %v7703_v8 = vld [vmem:[#allocation2 + $0xa4] ss:$16 sps:$4 sm:$0xff]   ;;  %v7707_v10 = vld [vmem:[#allocation2 + $0xa0] ss:$16 sps:$4 sm:$0xff]  }
  0x69   :  { %v7705_v9 = vld [vmem:[#allocation2 + $0x2a4] ss:$16 sps:$4 sm:$0xff]   ;;  %v7708_v11 = vld [vmem:[#allocation2 + $0x2a0] ss:$16 sps:$4 sm:$0xff]   ;;  %4983 = vmatprep.mubr.bf16.mxu1 %v9238_v55 }
  0x6a   :  { %4911 = vmatpush1.bf16.msra.mxu0 %v7701_v6  ;;  %v7709_v12 = vld [vmem:[#allocation2 + $0x84] ss:$16 sps:$4 sm:$0xff]   ;;  %v7713_v14 = vld [vmem:[#allocation2 + $0x80] ss:$16 sps:$4 sm:$0xff]  }
  0x6b   :  { %4954 = vmatpush1.bf16.msra.mxu1 %v7702_v7  ;;  %4912 = vmatprep.subr.bf16.mxu0 %v7703_v8  ;;  %v7711_v13 = vld [vmem:[#allocation2 + $0x284] ss:$16 sps:$4 sm:$0xff]   ;;  %v7714_v15 = vld [vmem:[#allocation2 + $0x280] ss:$16 sps:$4 sm:$0xff]  }
  0x6c   :  { %4955 = vmatprep.subr.bf16.mxu1 %v7705_v9  ;;  %v7715_v16 = vld [vmem:[#allocation2 + $0x64] ss:$16 sps:$4 sm:$0xff]   ;;  %v7719_v18 = vld [vmem:[#allocation2 + $0x60] ss:$16 sps:$4 sm:$0xff]   ;;  %v9244_v9 = vcombine.low %v135_v50, %v147_v51 }
  0x6d   :  { %v7717_v17 = vld [vmem:[#allocation2 + $0x264] ss:$16 sps:$4 sm:$0xff]   ;;  %v7720_v19 = vld [vmem:[#allocation2 + $0x260] ss:$16 sps:$4 sm:$0xff]  }
  0x6e   :  { %4913 = vmatpush1.bf16.msra.mxu0 %v7707_v10  ;;  %v7721_v20 = vld [vmem:[#allocation2 + $0x44] ss:$16 sps:$4 sm:$0xff]   ;;  %v7725_v22 = vld [vmem:[#allocation2 + $0x40] ss:$16 sps:$4 sm:$0xff]  }
  0x6f   :  { %4956 = vmatpush1.bf16.msra.mxu1 %v7708_v11  ;;  %4914 = vmatprep.subr.bf16.mxu0 %v7709_v12  ;;  %v7723_v21 = vld [vmem:[#allocation2 + $0x244] ss:$16 sps:$4 sm:$0xff]   ;;  %v7726_v23 = vld [vmem:[#allocation2 + $0x240] ss:$16 sps:$4 sm:$0xff]  }
  0x70   :  { %4957 = vmatprep.subr.bf16.mxu1 %v7711_v13  ;;  %v7727_v24 = vld [vmem:[#allocation2 + $0x24] ss:$16 sps:$4 sm:$0xff]   ;;  %v7731_v26 = vld [vmem:[#allocation2 + $0x20] ss:$16 sps:$4 sm:$0xff]  }
  0x71   :  { %v7729_v25 = vld [vmem:[#allocation2 + $0x224] ss:$16 sps:$4 sm:$0xff]   ;;  %v7732_v27 = vld [vmem:[#allocation2 + $0x220] ss:$16 sps:$4 sm:$0xff]  }
  0x72   :  { %4915 = vmatpush1.bf16.msra.mxu0 %v7713_v14  ;;  %v7733_v28 = vld [vmem:[#allocation2 + $0x4] ss:$16 sps:$4 sm:$0xff]   ;;  %v7737_v30 = vld [vmem:[#allocation2] ss:$16 sps:$4 sm:$0xff]  }
  0x73   :  { %4958 = vmatpush1.bf16.msra.mxu1 %v7714_v15  ;;  %4916 = vmatprep.subr.bf16.mxu0 %v7715_v16  ;;  %v7735_v29 = vld [vmem:[#allocation2 + $0x204] ss:$16 sps:$4 sm:$0xff]   ;;  %v7738_v31 = vld [vmem:[#allocation2 + $0x200] ss:$16 sps:$4 sm:$0xff]  }
  0x74   :  { %4959 = vmatprep.subr.bf16.mxu1 %v7717_v17  ;;  %v7739_v32 = vld [vmem:[#allocation2 + $0x1e4] ss:$16 sps:$4 sm:$0xff]   ;;  %v7743_v34 = vld [vmem:[#allocation2 + $0x1e0] ss:$16 sps:$4 sm:$0xff]  }
  0x75   :  { %v7741_v33 = vld [vmem:[#allocation2 + $0x3e4] ss:$16 sps:$4 sm:$0xff]   ;;  %v7744_v35 = vld [vmem:[#allocation2 + $0x3e0] ss:$16 sps:$4 sm:$0xff]  }
  0x76   :  { %4917 = vmatpush1.bf16.msra.mxu0 %v7719_v18  ;;  %v7745_v36 = vld [vmem:[#allocation2 + $0x1c4] ss:$16 sps:$4 sm:$0xff]   ;;  %v7749_v38 = vld [vmem:[#allocation2 + $0x1c0] ss:$16 sps:$4 sm:$0xff]  }
  0x77   :  { %4960 = vmatpush1.bf16.msra.mxu1 %v7720_v19  ;;  %4918 = vmatprep.subr.bf16.mxu0 %v7721_v20  ;;  %v7747_v37 = vld [vmem:[#allocation2 + $0x3c4] ss:$16 sps:$4 sm:$0xff]   ;;  %v7750_v39 = vld [vmem:[#allocation2 + $0x3c0] ss:$16 sps:$4 sm:$0xff]  }
  0x78   :  { %4961 = vmatprep.subr.bf16.mxu1 %v7723_v21  ;;  %v7751_v40 = vld [vmem:[#allocation2 + $0x1a4] ss:$16 sps:$4 sm:$0xff]   ;;  %v7755_v42 = vld [vmem:[#allocation2 + $0x1a0] ss:$16 sps:$4 sm:$0xff]  }
  0x79   :  { %v7753_v41 = vld [vmem:[#allocation2 + $0x3a4] ss:$16 sps:$4 sm:$0xff]   ;;  %v7756_v43 = vld [vmem:[#allocation2 + $0x3a0] ss:$16 sps:$4 sm:$0xff]  }
  0x7a   :  { %4919 = vmatpush1.bf16.msra.mxu0 %v7725_v22  ;;  %v7757_v44 = vld [vmem:[#allocation2 + $0x184] ss:$16 sps:$4 sm:$0xff]   ;;  %v7761_v46 = vld [vmem:[#allocation2 + $0x180] ss:$16 sps:$4 sm:$0xff]  }
  0x7b   :  { %4962 = vmatpush1.bf16.msra.mxu1 %v7726_v23  ;;  %4920 = vmatprep.subr.bf16.mxu0 %v7727_v24  ;;  %v7759_v45 = vld [vmem:[#allocation2 + $0x384] ss:$16 sps:$4 sm:$0xff]   ;;  %v7762_v47 = vld [vmem:[#allocation2 + $0x380] ss:$16 sps:$4 sm:$0xff]  }
  0x7c   :  { %4963 = vmatprep.subr.bf16.mxu1 %v7729_v25  ;;  %v134_v48 = vld [vmem:[%s9596_s0] sm:$0xff] }
  0x7d   :  { %v146_v49 = vld [vmem:[%s9596_s0 + $0x60] sm:$0xff] }
  0x7e   :  { %4921 = vmatpush1.bf16.msra.mxu0 %v7731_v26  ;;  %v7763_v52 = vld [vmem:[#allocation2 + $0x164] ss:$16 sps:$4 sm:$0xff]   ;;  %v9236_v53 = vcombine.high %v134_v48, %v146_v49  ;;  %v7767_v56 = vld [vmem:[#allocation2 + $0x160] ss:$16 sps:$4 sm:$0xff]   ;;  %v9242_v8 = vcombine.low %v134_v48, %v146_v49 }
  0x7f   :  { %4964 = vmatpush1.bf16.msra.mxu1 %v7732_v27  ;;  %4922 = vmatprep.subr.bf16.mxu0 %v7733_v28  ;;  %v7765_v54 = vld [vmem:[#allocation2 + $0x364] ss:$16 sps:$4 sm:$0xff]   ;;  %v7768_v57 = vld [vmem:[#allocation2 + $0x360] ss:$16 sps:$4 sm:$0xff]  }
  0x80   :  { %4965 = vmatprep.subr.bf16.mxu1 %v7735_v29  ;;  %4940 = vmatprep.mubr.bf16.mxu0 %v9236_v53  ;;  %v7769_v58 = vld [vmem:[#allocation2 + $0x144] ss:$16 sps:$4 sm:$0xff]   ;;  %v7773_v60 = vld [vmem:[#allocation2 + $0x140] ss:$16 sps:$4 sm:$0xff]  }
  0x81   :  { %v7771_v59 = vld [vmem:[#allocation2 + $0x344] ss:$16 sps:$4 sm:$0xff]   ;;  %v7774_v61 = vld [vmem:[#allocation2 + $0x340] ss:$16 sps:$4 sm:$0xff]  }
  0x82   :  { %4923 = vmatpush1.bf16.msra.mxu0 %v7737_v30  ;;  %v7775_v62 = vld [vmem:[#allocation2 + $0x124] ss:$16 sps:$4 sm:$0xff]   ;;  %v7779_v0 = vld [vmem:[#allocation2 + $0x120] ss:$16 sps:$4 sm:$0xff]  }
  0x83   :  { %4966 = vmatpush1.bf16.msra.mxu1 %v7738_v31  ;;  %4924 = vmatprep.subr.bf16.mxu0 %v7739_v32  ;;  %v7777_v63 = vld [vmem:[#allocation2 + $0x324] ss:$16 sps:$4 sm:$0xff]   ;;  %v7780_v1 = vld [vmem:[#allocation2 + $0x320] ss:$16 sps:$4 sm:$0xff]  }
  0x84   :  { %4967 = vmatprep.subr.bf16.mxu1 %v7741_v33  ;;  %v7781_v2 = vld [vmem:[#allocation2 + $0x104] ss:$16 sps:$4 sm:$0xff]   ;;  %v7785_v4 = vld [vmem:[#allocation2 + $0x100] ss:$16 sps:$4 sm:$0xff]  }
  0x85   :  { %v7783_v3 = vld [vmem:[#allocation2 + $0x304] ss:$16 sps:$4 sm:$0xff]   ;;  %v7786_v5 = vld [vmem:[#allocation2 + $0x300] ss:$16 sps:$4 sm:$0xff]  }
  0x86   :  { %4925 = vmatpush2.bf16.msra.mxu0 %v7743_v34  ;;  %v7789_v6 = vld [vmem:[#allocation2 + $0x4e4] ss:$16 sps:$4 sm:$0xff]   ;;  %v7787_v10 = vld [vmem:[#allocation2 + $0x4e0] ss:$16 sps:$4 sm:$0xff]  }
  0x87   :  { %4968 = vmatpush2.bf16.msra.mxu1 %v7744_v35  ;;  %4926 = vmatprep.subr.bf16.mxu0 %v7745_v36  ;;  %v7792_v7 = vld [vmem:[#allocation2 + $0x6e4] ss:$16 sps:$4 sm:$0xff]   ;;  %v7790_v11 = vld [vmem:[#allocation2 + $0x6e0] ss:$16 sps:$4 sm:$0xff]  }
  0x88   :  { %4969 = vmatprep.subr.bf16.mxu1 %v7747_v37  ;;  %v7795_v12 = vld [vmem:[#allocation2 + $0x4c4] ss:$16 sps:$4 sm:$0xff]   ;;  %v7793_v14 = vld [vmem:[#allocation2 + $0x4c0] ss:$16 sps:$4 sm:$0xff]  }
  0x89   :  { %v7798_v13 = vld [vmem:[#allocation2 + $0x6c4] ss:$16 sps:$4 sm:$0xff]   ;;  %v7796_v15 = vld [vmem:[#allocation2 + $0x6c0] ss:$16 sps:$4 sm:$0xff]  }
  0x8a   :  { %4927 = vmatpush2.bf16.msra.mxu0 %v7749_v38  ;;  %v7801_v16 = vld [vmem:[#allocation2 + $0x4a4] ss:$16 sps:$4 sm:$0xff]   ;;  %v7799_v18 = vld [vmem:[#allocation2 + $0x4a0] ss:$16 sps:$4 sm:$0xff]   ;;  %v9261_v38 = vld [vmem:[%s9596_s0 + $0x18] sm:$0xff] }
  0x8b   :  { %4970 = vmatpush2.bf16.msra.mxu1 %v7750_v39  ;;  %4928 = vmatprep.subr.bf16.mxu0 %v7751_v40  ;;  %v7804_v17 = vld [vmem:[#allocation2 + $0x6a4] ss:$16 sps:$4 sm:$0xff]   ;;  %v7802_v19 = vld [vmem:[#allocation2 + $0x6a0] ss:$16 sps:$4 sm:$0xff]   ;;  %v9266_v39 = vld [vmem:[%s9596_s0 + $0x78] sm:$0xff] }
  0x8c   :  { %4971 = vmatprep.subr.bf16.mxu1 %v7753_v41  ;;  %v7807_v20 = vld [vmem:[#allocation2 + $0x484] ss:$16 sps:$4 sm:$0xff]   ;;  %v7805_v22 = vld [vmem:[#allocation2 + $0x480] ss:$16 sps:$4 sm:$0xff]  }
  0x8d   :  { %v7810_v21 = vld [vmem:[#allocation2 + $0x684] ss:$16 sps:$4 sm:$0xff]   ;;  %v7808_v23 = vld [vmem:[#allocation2 + $0x680] ss:$16 sps:$4 sm:$0xff]  }
  0x8e   :  { %4929 = vmatpush2.bf16.msra.mxu0 %v7755_v42  ;;  %v7813_v24 = vld [vmem:[#allocation2 + $0x464] ss:$16 sps:$4 sm:$0xff]   ;;  %v7811_v26 = vld [vmem:[#allocation2 + $0x460] ss:$16 sps:$4 sm:$0xff]  }
  0x8f   :  { %4972 = vmatpush2.bf16.msra.mxu1 %v7756_v43  ;;  %4930 = vmatprep.subr.bf16.mxu0 %v7757_v44  ;;  %v7816_v25 = vld [vmem:[#allocation2 + $0x664] ss:$16 sps:$4 sm:$0xff]   ;;  %v7814_v27 = vld [vmem:[#allocation2 + $0x660] ss:$16 sps:$4 sm:$0xff]   ;;  %v9274_v43 = vcombine.high %v9261_v38, %v9266_v39 }
  0x90   :  { %4973 = vmatprep.subr.bf16.mxu1 %v7759_v45  ;;  %v7819_v28 = vld [vmem:[#allocation2 + $0x444] ss:$16 sps:$4 sm:$0xff]   ;;  %v7817_v30 = vld [vmem:[#allocation2 + $0x440] ss:$16 sps:$4 sm:$0xff]  }
  0x91   :  { %v7822_v29 = vld [vmem:[#allocation2 + $0x644] ss:$16 sps:$4 sm:$0xff]   ;;  %v7820_v31 = vld [vmem:[#allocation2 + $0x640] ss:$16 sps:$4 sm:$0xff]  }
  0x92   :  { %4931 = vmatpush2.bf16.msra.mxu0 %v7761_v46  ;;  %v7825_v32 = vld [vmem:[#allocation2 + $0x424] ss:$16 sps:$4 sm:$0xff]   ;;  %v7823_v34 = vld [vmem:[#allocation2 + $0x420] ss:$16 sps:$4 sm:$0xff]  }
  0x93   :  { %4974 = vmatpush2.bf16.msra.mxu1 %v7762_v47  ;;  %4932 = vmatprep.subr.bf16.mxu0 %v7763_v52  ;;  %v7828_v33 = vld [vmem:[#allocation2 + $0x624] ss:$16 sps:$4 sm:$0xff]   ;;  %v7826_v35 = vld [vmem:[#allocation2 + $0x620] ss:$16 sps:$4 sm:$0xff]  }
  0x94   :  { %4975 = vmatprep.subr.bf16.mxu1 %v7765_v54  ;;  %v9251_v36 = vld [vmem:[%s9596_s0 + $0x10] sm:$0xff] }
  0x95   :  { %v9256_v37 = vld [vmem:[%s9596_s0 + $0x70] sm:$0xff] }
  0x96   :  { %4933 = vmatpush2.bf16.msra.mxu0 %v7767_v56  ;;  %v7831_v40 = vld [vmem:[#allocation2 + $0x404] ss:$16 sps:$4 sm:$0xff]   ;;  %v9270_v41 = vcombine.high %v9251_v36, %v9256_v37  ;;  %v7829_v44 = vld [vmem:[#allocation2 + $0x400] ss:$16 sps:$4 sm:$0xff]  }
  0x97   :  { %4976 = vmatpush2.bf16.msra.mxu1 %v7768_v57  ;;  %4934 = vmatprep.subr.bf16.mxu0 %v7769_v58  ;;  %v7834_v42 = vld [vmem:[#allocation2 + $0x604] ss:$16 sps:$4 sm:$0xff]   ;;  %v7832_v45 = vld [vmem:[#allocation2 + $0x600] ss:$16 sps:$4 sm:$0xff]  }
  0x98   :  { %4977 = vmatprep.subr.bf16.mxu1 %v7771_v59  ;;  %v7837_v46 = vld [vmem:[#allocation2 + $0x5e4] ss:$16 sps:$4 sm:$0xff]   ;;  %v7835_v48 = vld [vmem:[#allocation2 + $0x5e0] ss:$16 sps:$4 sm:$0xff]  }
  0x99   :  { %v7840_v47 = vld [vmem:[#allocation2 + $0x7e4] ss:$16 sps:$4 sm:$0xff]   ;;  %v7838_v49 = vld [vmem:[#allocation2 + $0x7e0] ss:$16 sps:$4 sm:$0xff]  }
  0x9a   :  { %4935 = vmatpush2.bf16.msra.mxu0 %v7773_v60  ;;  %v7843_v50 = vld [vmem:[#allocation2 + $0x5c4] ss:$16 sps:$4 sm:$0xff]   ;;  %v7841_v52 = vld [vmem:[#allocation2 + $0x5c0] ss:$16 sps:$4 sm:$0xff]  }
  0x9b   :  { %4978 = vmatpush2.bf16.msra.mxu1 %v7774_v61  ;;  %4936 = vmatprep.subr.bf16.mxu0 %v7775_v62  ;;  %v7846_v51 = vld [vmem:[#allocation2 + $0x7c4] ss:$16 sps:$4 sm:$0xff]   ;;  %v7844_v54 = vld [vmem:[#allocation2 + $0x7c0] ss:$16 sps:$4 sm:$0xff]  }
  0x9c   :  { %4979 = vmatprep.subr.bf16.mxu1 %v7777_v63  ;;  %v7849_v56 = vld [vmem:[#allocation2 + $0x5a4] ss:$16 sps:$4 sm:$0xff]   ;;  %v7847_v58 = vld [vmem:[#allocation2 + $0x5a0] ss:$16 sps:$4 sm:$0xff]  }
  0x9d   :  { %v7852_v57 = vld [vmem:[#allocation2 + $0x7a4] ss:$16 sps:$4 sm:$0xff]   ;;  %v7850_v59 = vld [vmem:[#allocation2 + $0x7a0] ss:$16 sps:$4 sm:$0xff]  }
  0x9e   :  { %4937 = vmatpush2.bf16.msra.mxu0 %v7779_v0  ;;  %v7855_v60 = vld [vmem:[#allocation2 + $0x584] ss:$16 sps:$4 sm:$0xff]   ;;  %v7853_v62 = vld [vmem:[#allocation2 + $0x580] ss:$16 sps:$4 sm:$0xff]  }
  0x9f   :  { %4980 = vmatpush2.bf16.msra.mxu1 %v7780_v1  ;;  %4938 = vmatprep.subr.bf16.mxu0 %v7781_v2  ;;  %v7858_v61 = vld [vmem:[#allocation2 + $0x784] ss:$16 sps:$4 sm:$0xff]   ;;  %v7856_v63 = vld [vmem:[#allocation2 + $0x780] ss:$16 sps:$4 sm:$0xff]  }
  0xa0   :  { %4981 = vmatprep.subr.bf16.mxu1 %v7783_v3  ;;  %v7861_v0 = vld [vmem:[#allocation2 + $0x564] ss:$16 sps:$4 sm:$0xff]   ;;  %v7859_v2 = vld [vmem:[#allocation2 + $0x560] ss:$16 sps:$4 sm:$0xff]  }
  0xa1   :  { %v7864_v1 = vld [vmem:[#allocation2 + $0x764] ss:$16 sps:$4 sm:$0xff]   ;;  %v7862_v3 = vld [vmem:[#allocation2 + $0x760] ss:$16 sps:$4 sm:$0xff]  }
  0xa2   :  { %4939 = vmatpush2.bf16.msra.mxu0 %v7785_v4  ;;  %v7867_v4 = vld [vmem:[#allocation2 + $0x544] ss:$16 sps:$4 sm:$0xff]  }
  0xa3   :  { %4982 = vmatpush2.bf16.msra.mxu1 %v7786_v5  ;;  %4994 = vmatprep.subr.bf16.mxu0 %v7789_v6  ;;  %v7870_v5 = vld [vmem:[#allocation2 + $0x744] ss:$16 sps:$4 sm:$0xff]   ;;  %v7865_v6 = vld [vmem:[#allocation2 + $0x540] ss:$16 sps:$4 sm:$0xff]  }
  0xa4   :  { %5037 = vmatprep.subr.bf16.mxu1 %v7792_v7  ;;  %v7868_v7 = vld [vmem:[#allocation2 + $0x740] ss:$16 sps:$4 sm:$0xff]  }
  0xa5   :  { %4941 = vmatmul.mubr.bf16.vlgmr.msra.gmra.mxu0 %v9242_v8 }
  0xa6   :  { %4984 = vmatmul.mubr.bf16.vlgmr.msra.gmra.mxu1 %v9244_v9  ;;  %4995 = vmatpush1.bf16.msra.mxu0 %v7787_v10  ;;  %v7873_v10 = vld [vmem:[#allocation2 + $0x524] ss:$16 sps:$4 sm:$0xff]  }
  0xa7   :  { %5038 = vmatpush1.bf16.msra.mxu1 %v7790_v11  ;;  %4996 = vmatprep.subr.bf16.mxu0 %v7795_v12  ;;  %v7876_v11 = vld [vmem:[#allocation2 + $0x724] ss:$16 sps:$4 sm:$0xff]   ;;  %v7871_v12 = vld [vmem:[#allocation2 + $0x520] ss:$16 sps:$4 sm:$0xff]  }
  0xa8   :  { %5039 = vmatprep.subr.bf16.mxu1 %v7798_v13  ;;  %5026 = vmatprep.mubr.bf16.mxu0 %v9270_v41  ;;  %v7874_v13 = vld [vmem:[#allocation2 + $0x720] ss:$16 sps:$4 sm:$0xff]  }
  0xa9   :  { %5069 = vmatprep.mubr.bf16.mxu1 %v9274_v43 }
  0xaa   :  { %4997 = vmatpush1.bf16.msra.mxu0 %v7793_v14  ;;  %v7879_v14 = vld [vmem:[#allocation2 + $0x504] ss:$16 sps:$4 sm:$0xff]  }
  0xab   :  { %5040 = vmatpush1.bf16.msra.mxu1 %v7796_v15  ;;  %4998 = vmatprep.subr.bf16.mxu0 %v7801_v16  ;;  %v7882_v15 = vld [vmem:[#allocation2 + $0x704] ss:$16 sps:$4 sm:$0xff]   ;;  %v7877_v16 = vld [vmem:[#allocation2 + $0x500] ss:$16 sps:$4 sm:$0xff]  }
  0xac   :  { %5041 = vmatprep.subr.bf16.mxu1 %v7804_v17  ;;  %v7880_v17 = vld [vmem:[#allocation2 + $0x700] ss:$16 sps:$4 sm:$0xff]  }
  0xae   :  { %4999 = vmatpush1.bf16.msra.mxu0 %v7799_v18  ;;  %v7885_v18 = vld [vmem:[#allocation2 + $0x8e4] ss:$16 sps:$4 sm:$0xff]  }
  0xaf   :  { %5042 = vmatpush1.bf16.msra.mxu1 %v7802_v19  ;;  %5000 = vmatprep.subr.bf16.mxu0 %v7807_v20  ;;  %v7888_v19 = vld [vmem:[#allocation2 + $0xae4] ss:$16 sps:$4 sm:$0xff]   ;;  %v9280_v20 = vcombine.low %v9251_v36, %v9256_v37  ;;  %v7895_v36 = vld [vmem:[#allocation2 + $0x8a0] ss:$16 sps:$4 sm:$0xff]  }
  0xb0   :  { %5043 = vmatprep.subr.bf16.mxu1 %v7810_v21  ;;  %v9284_v21 = vcombine.low %v9261_v38, %v9266_v39  ;;  %v7898_v37 = vld [vmem:[#allocation2 + $0xaa0] ss:$16 sps:$4 sm:$0xff]   ;;  %v7903_v38 = vld [vmem:[#allocation2 + $0x884] ss:$16 sps:$4 sm:$0xff]  }
  0xb1   :  { %v7906_v39 = vld [vmem:[#allocation2 + $0xa84] ss:$16 sps:$4 sm:$0xff]  }
  0xb2   :  { %5001 = vmatpush1.bf16.msra.mxu0 %v7805_v22  ;;  %v7883_v22 = vld [vmem:[#allocation2 + $0x8e0] ss:$16 sps:$4 sm:$0xff]  }
  0xb3   :  { %5044 = vmatpush1.bf16.msra.mxu1 %v7808_v23  ;;  %5002 = vmatprep.subr.bf16.mxu0 %v7813_v24  ;;  %v7886_v23 = vld [vmem:[#allocation2 + $0xae0] ss:$16 sps:$4 sm:$0xff]   ;;  %v7891_v24 = vld [vmem:[#allocation2 + $0x8c4] ss:$16 sps:$4 sm:$0xff]  }
  0xb4   :  { %5045 = vmatprep.subr.bf16.mxu1 %v7816_v25  ;;  %v7894_v25 = vld [vmem:[#allocation2 + $0xac4] ss:$16 sps:$4 sm:$0xff]  }
  0xb6   :  { %5003 = vmatpush1.bf16.msra.mxu0 %v7811_v26  ;;  %v7889_v26 = vld [vmem:[#allocation2 + $0x8c0] ss:$16 sps:$4 sm:$0xff]  }
  0xb7   :  { %5046 = vmatpush1.bf16.msra.mxu1 %v7814_v27  ;;  %5004 = vmatprep.subr.bf16.mxu0 %v7819_v28  ;;  %v7892_v27 = vld [vmem:[#allocation2 + $0xac0] ss:$16 sps:$4 sm:$0xff]  }
  0xb8   :  { %5047 = vmatprep.subr.bf16.mxu1 %v7822_v29  ;;  %v9289_v28 = vld [vmem:[%s9596_s0 + $0x20] sm:$0xff] }
  0xb9   :  { %v9296_v29 = vld [vmem:[%s9596_s0 + $0x80] sm:$0xff] }
  0xba   :  { %5005 = vmatpush1.bf16.msra.mxu0 %v7817_v30  ;;  %v9301_v30 = vld [vmem:[%s9596_s0 + $0x28] sm:$0xff] }
  0xbb   :  { %5048 = vmatpush1.bf16.msra.mxu1 %v7820_v31  ;;  %5006 = vmatprep.subr.bf16.mxu0 %v7825_v32  ;;  %v9306_v31 = vld [vmem:[%s9596_s0 + $0x88] sm:$0xff]  ;;  %v7897_v32 = vld [vmem:[#allocation2 + $0x8a4] ss:$16 sps:$4 sm:$0xff]  }
  0xbc   :  { %5049 = vmatprep.subr.bf16.mxu1 %v7828_v33  ;;  %v9310_v33 = vcombine.high %v9289_v28, %v9296_v29 }
  0xbe   :  { %5007 = vmatpush1.bf16.msra.mxu0 %v7823_v34  ;;  %v7900_v34 = vld [vmem:[#allocation2 + $0xaa4] ss:$16 sps:$4 sm:$0xff]  }
  0xbf   :  { %5050 = vmatpush1.bf16.msra.mxu1 %v7826_v35  ;;  %5008 = vmatprep.subr.bf16.mxu0 %v7831_v40  ;;  %v9314_v35 = vcombine.high %v9301_v30, %v9306_v31  ;;  %v7901_v40 = vld [vmem:[#allocation2 + $0x880] ss:$16 sps:$4 sm:$0xff]  }
  0xc0   :  { %5051 = vmatprep.subr.bf16.mxu1 %v7834_v42  ;;  %v7904_v42 = vld [vmem:[#allocation2 + $0xa80] ss:$16 sps:$4 sm:$0xff]  }
  0xc2   :  { %5009 = vmatpush1.bf16.msra.mxu0 %v7829_v44  ;;  %v7909_v44 = vld [vmem:[#allocation2 + $0x864] ss:$16 sps:$4 sm:$0xff]  }
  0xc3   :  { %5052 = vmatpush1.bf16.msra.mxu1 %v7832_v45  ;;  %5010 = vmatprep.subr.bf16.mxu0 %v7837_v46  ;;  %v7912_v45 = vld [vmem:[#allocation2 + $0xa64] ss:$16 sps:$4 sm:$0xff]   ;;  %v7907_v46 = vld [vmem:[#allocation2 + $0x860] ss:$16 sps:$4 sm:$0xff]  }
  0xc4   :  { %5053 = vmatprep.subr.bf16.mxu1 %v7840_v47  ;;  %v7910_v47 = vld [vmem:[#allocation2 + $0xa60] ss:$16 sps:$4 sm:$0xff]  }
  0xc6   :  { %5011 = vmatpush2.bf16.msra.mxu0 %v7835_v48  ;;  %v7915_v48 = vld [vmem:[#allocation2 + $0x844] ss:$16 sps:$4 sm:$0xff]  }
  0xc7   :  { %5054 = vmatpush2.bf16.msra.mxu1 %v7838_v49  ;;  %5012 = vmatprep.subr.bf16.mxu0 %v7843_v50  ;;  %v7918_v49 = vld [vmem:[#allocation2 + $0xa44] ss:$16 sps:$4 sm:$0xff]   ;;  %v7913_v50 = vld [vmem:[#allocation2 + $0x840] ss:$16 sps:$4 sm:$0xff]  }
  0xc8   :  { %5055 = vmatprep.subr.bf16.mxu1 %v7846_v51  ;;  %v7916_v51 = vld [vmem:[#allocation2 + $0xa40] ss:$16 sps:$4 sm:$0xff]  }
  0xca   :  { %5013 = vmatpush2.bf16.msra.mxu0 %v7841_v52  ;;  %v7921_v52 = vld [vmem:[#allocation2 + $0x824] ss:$16 sps:$4 sm:$0xff]  }
  0xcb   :  { %5056 = vmatpush2.bf16.msra.mxu1 %v7844_v54  ;;  %5014 = vmatprep.subr.bf16.mxu0 %v7849_v56  ;;  %v7924_v54 = vld [vmem:[#allocation2 + $0xa24] ss:$16 sps:$4 sm:$0xff]   ;;  %v7919_v56 = vld [vmem:[#allocation2 + $0x820] ss:$16 sps:$4 sm:$0xff]  }
  0xcc   :  { %5057 = vmatprep.subr.bf16.mxu1 %v7852_v57  ;;  %v7922_v57 = vld [vmem:[#allocation2 + $0xa20] ss:$16 sps:$4 sm:$0xff]  }
  0xce   :  { %5015 = vmatpush2.bf16.msra.mxu0 %v7847_v58  ;;  %v7927_v58 = vld [vmem:[#allocation2 + $0x804] ss:$16 sps:$4 sm:$0xff]  }
  0xcf   :  { %5058 = vmatpush2.bf16.msra.mxu1 %v7850_v59  ;;  %5016 = vmatprep.subr.bf16.mxu0 %v7855_v60  ;;  %v7930_v59 = vld [vmem:[#allocation2 + $0xa04] ss:$16 sps:$4 sm:$0xff]   ;;  %v7925_v60 = vld [vmem:[#allocation2 + $0x800] ss:$16 sps:$4 sm:$0xff]  }
  0xd0   :  { %5059 = vmatprep.subr.bf16.mxu1 %v7858_v61  ;;  %v7928_v61 = vld [vmem:[#allocation2 + $0xa00] ss:$16 sps:$4 sm:$0xff]  }
  0xd2   :  { %5017 = vmatpush2.bf16.msra.mxu0 %v7853_v62  ;;  %v7933_v62 = vld [vmem:[#allocation2 + $0x9e4] ss:$16 sps:$4 sm:$0xff]  }
  0xd3   :  { %5060 = vmatpush2.bf16.msra.mxu1 %v7856_v63  ;;  %5018 = vmatprep.subr.bf16.mxu0 %v7861_v0  ;;  %v7936_v63 = vld [vmem:[#allocation2 + $0xbe4] ss:$16 sps:$4 sm:$0xff]   ;;  %v7931_v0 = vld [vmem:[#allocation2 + $0x9e0] ss:$16 sps:$4 sm:$0xff]  }
  0xd4   :  { %5061 = vmatprep.subr.bf16.mxu1 %v7864_v1  ;;  %v7934_v1 = vld [vmem:[#allocation2 + $0xbe0] ss:$16 sps:$4 sm:$0xff]  }
  0xd6   :  { %5019 = vmatpush2.bf16.msra.mxu0 %v7859_v2  ;;  %v7939_v2 = vld [vmem:[#allocation2 + $0x9c4] ss:$16 sps:$4 sm:$0xff]  }
  0xd7   :  { %5062 = vmatpush2.bf16.msra.mxu1 %v7862_v3  ;;  %5020 = vmatprep.subr.bf16.mxu0 %v7867_v4  ;;  %v7942_v3 = vld [vmem:[#allocation2 + $0xbc4] ss:$16 sps:$4 sm:$0xff]   ;;  %v7937_v4 = vld [vmem:[#allocation2 + $0x9c0] ss:$16 sps:$4 sm:$0xff]  }
  0xd8   :  { %5063 = vmatprep.subr.bf16.mxu1 %v7870_v5  ;;  %v7940_v5 = vld [vmem:[#allocation2 + $0xbc0] ss:$16 sps:$4 sm:$0xff]  }
  0xda   :  { %5021 = vmatpush2.bf16.msra.mxu0 %v7865_v6  ;;  %v7945_v6 = vld [vmem:[#allocation2 + $0x9a4] ss:$16 sps:$4 sm:$0xff]  }
  0xdb   :  { %5064 = vmatpush2.bf16.msra.mxu1 %v7868_v7  ;;  %5022 = vmatprep.subr.bf16.mxu0 %v7873_v10  ;;  %v7948_v7 = vld [vmem:[#allocation2 + $0xba4] ss:$16 sps:$4 sm:$0xff]   ;;  %v7943_v10 = vld [vmem:[#allocation2 + $0x9a0] ss:$16 sps:$4 sm:$0xff]  }
  0xdc   :  { %5065 = vmatprep.subr.bf16.mxu1 %v7876_v11  ;;  %v7946_v11 = vld [vmem:[#allocation2 + $0xba0] ss:$16 sps:$4 sm:$0xff]  }
  0xde   :  { %5023 = vmatpush2.bf16.msra.mxu0 %v7871_v12  ;;  %v7951_v12 = vld [vmem:[#allocation2 + $0x984] ss:$16 sps:$4 sm:$0xff]  }
  0xdf   :  { %5066 = vmatpush2.bf16.msra.mxu1 %v7874_v13  ;;  %5024 = vmatprep.subr.bf16.mxu0 %v7879_v14  ;;  %v7954_v13 = vld [vmem:[#allocation2 + $0xb84] ss:$16 sps:$4 sm:$0xff]   ;;  %v7949_v14 = vld [vmem:[#allocation2 + $0x980] ss:$16 sps:$4 sm:$0xff]  }
  0xe0   :  { %5067 = vmatprep.subr.bf16.mxu1 %v7882_v15  ;;  %v7952_v15 = vld [vmem:[#allocation2 + $0xb80] ss:$16 sps:$4 sm:$0xff]  }
  0xe2   :  { %5025 = vmatpush2.bf16.msra.mxu0 %v7877_v16  ;;  %v7957_v16 = vld [vmem:[#allocation2 + $0x964] ss:$16 sps:$4 sm:$0xff]  }
  0xe3   :  { %5068 = vmatpush2.bf16.msra.mxu1 %v7880_v17  ;;  %5080 = vmatprep.subr.bf16.mxu0 %v7885_v18  ;;  %v7960_v17 = vld [vmem:[#allocation2 + $0xb64] ss:$16 sps:$4 sm:$0xff]   ;;  %v7955_v18 = vld [vmem:[#allocation2 + $0x960] ss:$16 sps:$4 sm:$0xff]  }
  0xe4   :  { %5123 = vmatprep.subr.bf16.mxu1 %v7888_v19  ;;  %v7958_v19 = vld [vmem:[#allocation2 + $0xb60] ss:$16 sps:$4 sm:$0xff]  }
  0xe5   :  { %5027 = vmatmul.mubr.bf16.vlgmr.msra.gmra.mxu0 %v9280_v20 }
  0xe6   :  { %5070 = vmatmul.mubr.bf16.vlgmr.msra.gmra.mxu1 %v9284_v21  ;;  %5081 = vmatpush1.bf16.msra.mxu0 %v7883_v22  ;;  %v7963_v22 = vld [vmem:[#allocation2 + $0x944] ss:$16 sps:$4 sm:$0xff]  }
  0xe7   :  { %5124 = vmatpush1.bf16.msra.mxu1 %v7886_v23  ;;  %5082 = vmatprep.subr.bf16.mxu0 %v7891_v24  ;;  %v7966_v23 = vld [vmem:[#allocation2 + $0xb44] ss:$16 sps:$4 sm:$0xff]   ;;  %v7961_v24 = vld [vmem:[#allocation2 + $0x940] ss:$16 sps:$4 sm:$0xff]  }
  0xe8   :  { %5125 = vmatprep.subr.bf16.mxu1 %v7894_v25  ;;  %5112 = vmatprep.mubr.bf16.mxu0 %v9310_v33  ;;  %v7964_v25 = vld [vmem:[#allocation2 + $0xb40] ss:$16 sps:$4 sm:$0xff]  }
  0xe9   :  { %5155 = vmatprep.mubr.bf16.mxu1 %v9314_v35 }
  0xea   :  { %5083 = vmatpush1.bf16.msra.mxu0 %v7889_v26  ;;  %v7969_v26 = vld [vmem:[#allocation2 + $0x924] ss:$16 sps:$4 sm:$0xff]  }
  0xeb   :  { %5126 = vmatpush1.bf16.msra.mxu1 %v7892_v27  ;;  %5084 = vmatprep.subr.bf16.mxu0 %v7897_v32  ;;  %v7972_v27 = vld [vmem:[#allocation2 + $0xb24] ss:$16 sps:$4 sm:$0xff]   ;;  %v7967_v32 = vld [vmem:[#allocation2 + $0x920] ss:$16 sps:$4 sm:$0xff]  }
  0xec   :  { %5127 = vmatprep.subr.bf16.mxu1 %v7900_v34  ;;  %v7970_v34 = vld [vmem:[#allocation2 + $0xb20] ss:$16 sps:$4 sm:$0xff]  }
  0xee   :  { %5085 = vmatpush1.bf16.msra.mxu0 %v7895_v36  ;;  %v7975_v36 = vld [vmem:[#allocation2 + $0x904] ss:$16 sps:$4 sm:$0xff]  }
  0xef   :  { %5128 = vmatpush1.bf16.msra.mxu1 %v7898_v37  ;;  %5086 = vmatprep.subr.bf16.mxu0 %v7903_v38  ;;  %v7978_v37 = vld [vmem:[#allocation2 + $0xb04] ss:$16 sps:$4 sm:$0xff]   ;;  %v7973_v38 = vld [vmem:[#allocation2 + $0x900] ss:$16 sps:$4 sm:$0xff]  }
  0xf0   :  { %5129 = vmatprep.subr.bf16.mxu1 %v7906_v39  ;;  %v7976_v39 = vld [vmem:[#allocation2 + $0xb00] ss:$16 sps:$4 sm:$0xff]  }
  0xf2   :  { %5087 = vmatpush1.bf16.msra.mxu0 %v7901_v40  ;;  %v7981_v40 = vld [vmem:[#allocation2 + $0xce4] ss:$16 sps:$4 sm:$0xff]  }
  0xf3   :  { %5130 = vmatpush1.bf16.msra.mxu1 %v7904_v42  ;;  %5088 = vmatprep.subr.bf16.mxu0 %v7909_v44  ;;  %v7984_v42 = vld [vmem:[#allocation2 + $0xee4] ss:$16 sps:$4 sm:$0xff]  }
  0xf4   :  { %5131 = vmatprep.subr.bf16.mxu1 %v7912_v45  ;;  %v9321_v44 = vld [vmem:[%s9596_s0 + $0x30] sm:$0xff] }
  0xf5   :  { %v7979_v45 = vld [vmem:[#allocation2 + $0xce0] ss:$16 sps:$4 sm:$0xff]  }
  0xf6   :  { %5089 = vmatpush1.bf16.msra.mxu0 %v7907_v46  ;;  %v9326_v46 = vld [vmem:[%s9596_s0 + $0x90] sm:$0xff] }
  0xf7   :  { %5132 = vmatpush1.bf16.msra.mxu1 %v7910_v47  ;;  %5090 = vmatprep.subr.bf16.mxu0 %v7915_v48  ;;  %v9331_v47 = vld [vmem:[%s9596_s0 + $0x38] sm:$0xff]  ;;  %v9335_v48 = vcombine.low %v9289_v28, %v9296_v29  ;;  %v9348_v28 = vcombine.high %v9321_v44, %v9326_v46 }
  0xf8   :  { %5133 = vmatprep.subr.bf16.mxu1 %v7918_v49  ;;  %v9339_v49 = vcombine.low %v9301_v30, %v9306_v31  ;;  %v7985_v30 = vld [vmem:[#allocation2 + $0xcc0] ss:$16 sps:$4 sm:$0xff]  }
  0xf9   :  { %v7988_v31 = vld [vmem:[#allocation2 + $0xec0] ss:$16 sps:$4 sm:$0xff]  }
  0xfa   :  { %5091 = vmatpush1.bf16.msra.mxu0 %v7913_v50  ;;  %v9344_v50 = vld [vmem:[%s9596_s0 + $0x98] sm:$0xff] }
  0xfb   :  { %5134 = vmatpush1.bf16.msra.mxu1 %v7916_v51  ;;  %5092 = vmatprep.subr.bf16.mxu0 %v7921_v52  ;;  %v7982_v51 = vld [vmem:[#allocation2 + $0xee0] ss:$16 sps:$4 sm:$0xff]   ;;  %v7987_v52 = vld [vmem:[#allocation2 + $0xcc4] ss:$16 sps:$4 sm:$0xff]   ;;  %v9352_v29 = vcombine.high %v9331_v47, %v9344_v50 }
  0xfc   :  { %5135 = vmatprep.subr.bf16.mxu1 %v7924_v54  ;;  %v7990_v54 = vld [vmem:[#allocation2 + $0xec4] ss:$16 sps:$4 sm:$0xff]  }
  0xfe   :  { %5093 = vmatpush1.bf16.msra.mxu0 %v7919_v56  ;;  %v7993_v56 = vld [vmem:[#allocation2 + $0xca4] ss:$16 sps:$4 sm:$0xff]  }
  0xff   :  { %5136 = vmatpush1.bf16.msra.mxu1 %v7922_v57  ;;  %5094 = vmatprep.subr.bf16.mxu0 %v7927_v58  ;;  %v7996_v57 = vld [vmem:[#allocation2 + $0xea4] ss:$16 sps:$4 sm:$0xff]   ;;  %v7991_v58 = vld [vmem:[#allocation2 + $0xca0] ss:$16 sps:$4 sm:$0xff]  }
 0x100   :  { %5137 = vmatprep.subr.bf16.mxu1 %v7930_v59  ;;  %v7994_v59 = vld [vmem:[#allocation2 + $0xea0] ss:$16 sps:$4 sm:$0xff]  }
 0x102   :  { %5095 = vmatpush1.bf16.msra.mxu0 %v7925_v60  ;;  %v7999_v60 = vld [vmem:[#allocation2 + $0xc84] ss:$16 sps:$4 sm:$0xff]  }
 0x103   :  { %5138 = vmatpush1.bf16.msra.mxu1 %v7928_v61  ;;  %5096 = vmatprep.subr.bf16.mxu0 %v7933_v62  ;;  %v8002_v61 = vld [vmem:[#allocation2 + $0xe84] ss:$16 sps:$4 sm:$0xff]   ;;  %v7997_v62 = vld [vmem:[#allocation2 + $0xc80] ss:$16 sps:$4 sm:$0xff]  }
 0x104   :  { %5139 = vmatprep.subr.bf16.mxu1 %v7936_v63  ;;  %v8000_v63 = vld [vmem:[#allocation2 + $0xe80] ss:$16 sps:$4 sm:$0xff]  }
 0x106   :  { %5097 = vmatpush2.bf16.msra.mxu0 %v7931_v0  ;;  %v8005_v0 = vld [vmem:[#allocation2 + $0xc64] ss:$16 sps:$4 sm:$0xff]  }
 0x107   :  { %5140 = vmatpush2.bf16.msra.mxu1 %v7934_v1  ;;  %5098 = vmatprep.subr.bf16.mxu0 %v7939_v2  ;;  %v8008_v1 = vld [vmem:[#allocation2 + $0xe64] ss:$16 sps:$4 sm:$0xff]   ;;  %v8003_v2 = vld [vmem:[#allocation2 + $0xc60] ss:$16 sps:$4 sm:$0xff]  }
 0x108   :  { %5141 = vmatprep.subr.bf16.mxu1 %v7942_v3  ;;  %v8006_v3 = vld [vmem:[#allocation2 + $0xe60] ss:$16 sps:$4 sm:$0xff]  }
 0x10a   :  { %5099 = vmatpush2.bf16.msra.mxu0 %v7937_v4  ;;  %v8011_v4 = vld [vmem:[#allocation2 + $0xc44] ss:$16 sps:$4 sm:$0xff]  }
 0x10b   :  { %5142 = vmatpush2.bf16.msra.mxu1 %v7940_v5  ;;  %5100 = vmatprep.subr.bf16.mxu0 %v7945_v6  ;;  %v8014_v5 = vld [vmem:[#allocation2 + $0xe44] ss:$16 sps:$4 sm:$0xff]   ;;  %v8009_v6 = vld [vmem:[#allocation2 + $0xc40] ss:$16 sps:$4 sm:$0xff]  }
 0x10c   :  { %5143 = vmatprep.subr.bf16.mxu1 %v7948_v7  ;;  %v8012_v7 = vld [vmem:[#allocation2 + $0xe40] ss:$16 sps:$4 sm:$0xff]  }
 0x10e   :  { %5101 = vmatpush2.bf16.msra.mxu0 %v7943_v10  ;;  %v8017_v10 = vld [vmem:[#allocation2 + $0xc24] ss:$16 sps:$4 sm:$0xff]  }
 0x10f   :  { %5144 = vmatpush2.bf16.msra.mxu1 %v7946_v11  ;;  %5102 = vmatprep.subr.bf16.mxu0 %v7951_v12  ;;  %v8020_v11 = vld [vmem:[#allocation2 + $0xe24] ss:$16 sps:$4 sm:$0xff]   ;;  %v8015_v12 = vld [vmem:[#allocation2 + $0xc20] ss:$16 sps:$4 sm:$0xff]  }
 0x110   :  { %5145 = vmatprep.subr.bf16.mxu1 %v7954_v13  ;;  %v8018_v13 = vld [vmem:[#allocation2 + $0xe20] ss:$16 sps:$4 sm:$0xff]  }
 0x112   :  { %5103 = vmatpush2.bf16.msra.mxu0 %v7949_v14  ;;  %v8023_v14 = vld [vmem:[#allocation2 + $0xc04] ss:$16 sps:$4 sm:$0xff]  }
 0x113   :  { %5146 = vmatpush2.bf16.msra.mxu1 %v7952_v15  ;;  %5104 = vmatprep.subr.bf16.mxu0 %v7957_v16  ;;  %v8026_v15 = vld [vmem:[#allocation2 + $0xe04] ss:$16 sps:$4 sm:$0xff]   ;;  %v8021_v16 = vld [vmem:[#allocation2 + $0xc00] ss:$16 sps:$4 sm:$0xff]  }
 0x114   :  { %5147 = vmatprep.subr.bf16.mxu1 %v7960_v17  ;;  %v8024_v17 = vld [vmem:[#allocation2 + $0xe00] ss:$16 sps:$4 sm:$0xff]  }
 0x116   :  { %5105 = vmatpush2.bf16.msra.mxu0 %v7955_v18  ;;  %v8029_v18 = vld [vmem:[#allocation2 + $0xde4] ss:$16 sps:$4 sm:$0xff]  }
 0x117   :  { %5148 = vmatpush2.bf16.msra.mxu1 %v7958_v19  ;;  %5106 = vmatprep.subr.bf16.mxu0 %v7963_v22  ;;  %v8032_v19 = vld [vmem:[#allocation2 + $0xfe4] ss:$16 sps:$4 sm:$0xff]   ;;  %v8027_v22 = vld [vmem:[#allocation2 + $0xde0] ss:$16 sps:$4 sm:$0xff]  }
 0x118   :  { %5149 = vmatprep.subr.bf16.mxu1 %v7966_v23  ;;  %v8030_v23 = vld [vmem:[#allocation2 + $0xfe0] ss:$16 sps:$4 sm:$0xff]  }
 0x11a   :  { %5107 = vmatpush2.bf16.msra.mxu0 %v7961_v24  ;;  %v8035_v24 = vld [vmem:[#allocation2 + $0xdc4] ss:$16 sps:$4 sm:$0xff]  }
 0x11b   :  { %5150 = vmatpush2.bf16.msra.mxu1 %v7964_v25  ;;  %5108 = vmatprep.subr.bf16.mxu0 %v7969_v26  ;;  %v8038_v25 = vld [vmem:[#allocation2 + $0xfc4] ss:$16 sps:$4 sm:$0xff]   ;;  %v8033_v26 = vld [vmem:[#allocation2 + $0xdc0] ss:$16 sps:$4 sm:$0xff]  }
 0x11c   :  { %5151 = vmatprep.subr.bf16.mxu1 %v7972_v27  ;;  %v8036_v27 = vld [vmem:[#allocation2 + $0xfc0] ss:$16 sps:$4 sm:$0xff]  }
 0x11e   :  { %5109 = vmatpush2.bf16.msra.mxu0 %v7967_v32  ;;  %v8041_v32 = vld [vmem:[#allocation2 + $0xda4] ss:$16 sps:$4 sm:$0xff]  }
 0x11f   :  { %5152 = vmatpush2.bf16.msra.mxu1 %v7970_v34  ;;  %5110 = vmatprep.subr.bf16.mxu0 %v7975_v36  ;;  %v8044_v34 = vld [vmem:[#allocation2 + $0xfa4] ss:$16 sps:$4 sm:$0xff]   ;;  %v8039_v36 = vld [vmem:[#allocation2 + $0xda0] ss:$16 sps:$4 sm:$0xff]  }
 0x120   :  { %5153 = vmatprep.subr.bf16.mxu1 %v7978_v37  ;;  %v8042_v37 = vld [vmem:[#allocation2 + $0xfa0] ss:$16 sps:$4 sm:$0xff]  }
 0x122   :  { %5111 = vmatpush2.bf16.msra.mxu0 %v7973_v38  ;;  %v8047_v38 = vld [vmem:[#allocation2 + $0xd84] ss:$16 sps:$4 sm:$0xff]  }
 0x123   :  { %5154 = vmatpush2.bf16.msra.mxu1 %v7976_v39  ;;  %5166 = vmatprep.subr.bf16.mxu0 %v7981_v40  ;;  %v8050_v39 = vld [vmem:[#allocation2 + $0xf84] ss:$16 sps:$4 sm:$0xff]   ;;  %v8045_v40 = vld [vmem:[#allocation2 + $0xd80] ss:$16 sps:$4 sm:$0xff]  }
 0x124   :  { %5209 = vmatprep.subr.bf16.mxu1 %v7984_v42  ;;  %v8048_v42 = vld [vmem:[#allocation2 + $0xf80] ss:$16 sps:$4 sm:$0xff]  }
 0x125   :  { %5113 = vmatmul.mubr.bf16.vlgmr.msra.gmra.mxu0 %v9335_v48 }
 0x126   :  { %5156 = vmatmul.mubr.bf16.vlgmr.msra.gmra.mxu1 %v9339_v49  ;;  %5167 = vmatpush1.bf16.msra.mxu0 %v7979_v45  ;;  %v8053_v45 = vld [vmem:[#allocation2 + $0xd64] ss:$16 sps:$4 sm:$0xff]  }
 0x127   :  { %5210 = vmatpush1.bf16.msra.mxu1 %v7982_v51  ;;  %5168 = vmatprep.subr.bf16.mxu0 %v7987_v52  ;;  %v8056_v51 = vld [vmem:[#allocation2 + $0xf64] ss:$16 sps:$4 sm:$0xff]   ;;  %v8051_v52 = vld [vmem:[#allocation2 + $0xd60] ss:$16 sps:$4 sm:$0xff]  }
 0x128   :  { %5211 = vmatprep.subr.bf16.mxu1 %v7990_v54  ;;  %5198 = vmatprep.mubr.bf16.mxu0 %v9348_v28  ;;  %v8054_v54 = vld [vmem:[#allocation2 + $0xf60] ss:$16 sps:$4 sm:$0xff]  }
 0x129   :  { %5241 = vmatprep.mubr.bf16.mxu1 %v9352_v29 }
 0x12a   :  { %5169 = vmatpush1.bf16.msra.mxu0 %v7985_v30  ;;  %v8059_v30 = vld [vmem:[#allocation2 + $0xd44] ss:$16 sps:$4 sm:$0xff]  }
 0x12b   :  { %5212 = vmatpush1.bf16.msra.mxu1 %v7988_v31  ;;  %5170 = vmatprep.subr.bf16.mxu0 %v7993_v56  ;;  %v8062_v31 = vld [vmem:[#allocation2 + $0xf44] ss:$16 sps:$4 sm:$0xff]   ;;  %v8057_v56 = vld [vmem:[#allocation2 + $0xd40] ss:$16 sps:$4 sm:$0xff]  }
 0x12c   :  { %5213 = vmatprep.subr.bf16.mxu1 %v7996_v57  ;;  %v8060_v57 = vld [vmem:[#allocation2 + $0xf40] ss:$16 sps:$4 sm:$0xff]  }
 0x12e   :  { %5171 = vmatpush1.bf16.msra.mxu0 %v7991_v58  ;;  %v928_v58 = vlaneseq }
 0x12f   :  { %5214 = vmatpush1.bf16.msra.mxu1 %v7994_v59  ;;  %5172 = vmatprep.subr.bf16.mxu0 %v7999_v60  ;;  %v8065_v59 = vld [vmem:[#allocation2 + $0xd24] ss:$16 sps:$4 sm:$0xff]  }
 0x130   :  { %5215 = vmatprep.subr.bf16.mxu1 %v8002_v61  ;;  %v8068_v60 = vld [vmem:[#allocation2 + $0xf24] ss:$16 sps:$4 sm:$0xff]   ;;  %v8063_v61 = vld [vmem:[#allocation2 + $0xd20] ss:$16 sps:$4 sm:$0xff]  }
 0x132   :  { %5173 = vmatpush1.bf16.msra.mxu0 %v7997_v62  ;;  %v8066_v62 = vld [vmem:[#allocation2 + $0xf20] ss:$16 sps:$4 sm:$0xff]  }
 0x133   :  { %5216 = vmatpush1.bf16.msra.mxu1 %v8000_v63  ;;  %5174 = vmatprep.subr.bf16.mxu0 %v8005_v0  ;;  %v9358_v63 = vshrl.u32 %v928_v58, 7  ;;  %v8071_v0 = vld [vmem:[#allocation2 + $0xd04] ss:$16 sps:$4 sm:$0xff]   ;;  %v8102_v58 = vld [vmem:[#allocation2 + $0x1260] ss:$16 sps:$4 sm:$0xff]  }
 0x134   :  { %5217 = vmatprep.subr.bf16.mxu1 %v8008_v1  ;;  %v8074_v1 = vld [vmem:[#allocation2 + $0xf04] ss:$16 sps:$4 sm:$0xff]  }
 0x136   :  { %5175 = vmatpush1.bf16.msra.mxu0 %v8003_v2  ;;  %v8069_v2 = vld [vmem:[#allocation2 + $0xd00] ss:$16 sps:$4 sm:$0xff]  }
 0x137   :  { %5218 = vmatpush1.bf16.msra.mxu1 %v8006_v3  ;;  %5176 = vmatprep.subr.bf16.mxu0 %v8011_v4  ;;  %v8072_v3 = vld [vmem:[#allocation2 + $0xf00] ss:$16 sps:$4 sm:$0xff]  }
 0x138   :  { %5219 = vmatprep.subr.bf16.mxu1 %v8014_v5  ;;  %v926_v4 = vld [vmem:[#allocation4] sm:$0xf]  ;;  %v930_v5 = vsub.s32 0, %v9358_v63 }
 0x13a   :  { %5177 = vmatpush1.bf16.msra.mxu0 %v8009_v6  ;;  %v8077_v6 = vld [vmem:[#allocation2 + $0x10e4] ss:$16 sps:$4 sm:$0xff]  }
 0x13b   :  { %5220 = vmatpush1.bf16.msra.mxu1 %v8012_v7  ;;  %5178 = vmatprep.subr.bf16.mxu0 %v8017_v10  ;;  %v8080_v7 = vld [vmem:[#allocation2 + $0x12e4] ss:$16 sps:$4 sm:$0xff]  }
 0x13c   :  { %5221 = vmatprep.subr.bf16.mxu1 %v8020_v11  ;;  %v9364_v10 = vld [vmem:[%s9596_s0 + $0x40] sm:$0xff] }
 0x13d   :  { %v8075_v11 = vld [vmem:[#allocation2 + $0x10e0] ss:$16 sps:$4 sm:$0xff]  }
 0x13e   :  { %5179 = vmatpush1.bf16.msra.mxu0 %v8015_v12  ;;  %v9369_v12 = vld [vmem:[%s9596_s0 + $0xa0] sm:$0xff] }
 0x13f   :  { %5222 = vmatpush1.bf16.msra.mxu1 %v8018_v13  ;;  %5180 = vmatprep.subr.bf16.mxu0 %v8023_v14  ;;  %v9374_v13 = vld [vmem:[%s9596_s0 + $0x48] sm:$0xff]  ;;  %v9378_v14 = vcombine.low %v9321_v44, %v9326_v46  ;;  %v8086_v44 = vld [vmem:[#allocation2 + $0x12c4] ss:$16 sps:$4 sm:$0xff]   ;;  %v9393_v46 = vcombine.high %v9364_v10, %v9369_v12 }
 0x140   :  { %5223 = vmatprep.subr.bf16.mxu1 %v8026_v15  ;;  %v9382_v15 = vcombine.low %v9331_v47, %v9344_v50 }
 0x142   :  { %5181 = vmatpush1.bf16.msra.mxu0 %v8021_v16  ;;  %v9387_v16 = vld [vmem:[%s9596_s0 + $0xa8] sm:$0xff] }
 0x143   :  { %5224 = vmatpush1.bf16.msra.mxu1 %v8024_v17  ;;  %5182 = vmatprep.subr.bf16.mxu0 %v8029_v18  ;;  %v931_v17 = vrot.slane %v926_v4, %v930_v5  ;;  %v8078_v18 = vld [vmem:[#allocation2 + $0x12e0] ss:$16 sps:$4 sm:$0xff]   ;;  %v9397_v47 = vcombine.high %v9374_v13, %v9387_v16  ;;  %v8119_v4 = vld [vmem:[#allocation2 + $0x1004] ss:$16 sps:$4 sm:$0xff]  }
 0x144   :  { %5225 = vmatprep.subr.bf16.mxu1 %v8032_v19  ;;  %v8083_v19 = vld [vmem:[#allocation2 + $0x10c4] ss:$16 sps:$4 sm:$0xff]  }
 0x146   :  { %5183 = vmatpush2.bf16.msra.mxu0 %v8027_v22 }
 0x147   :  { %5226 = vmatpush2.bf16.msra.mxu1 %v8030_v23  ;;  %5184 = vmatprep.subr.bf16.mxu0 %v8035_v24  ;;  %v8081_v23 = vld [vmem:[#allocation2 + $0x10c0] ss:$16 sps:$4 sm:$0xff]  }
 0x148   :  { %5227 = vmatprep.subr.bf16.mxu1 %v8038_v25  ;;  %v8084_v25 = vld [vmem:[#allocation2 + $0x12c0] ss:$16 sps:$4 sm:$0xff]  }
 0x14a   :  { %5185 = vmatpush2.bf16.msra.mxu0 %v8033_v26 }
 0x14b   :  { %5228 = vmatpush2.bf16.msra.mxu1 %v8036_v27  ;;  %5186 = vmatprep.subr.bf16.mxu0 %v8041_v32  ;;  %v8089_v32 = vld [vmem:[#allocation2 + $0x10a4] ss:$16 sps:$4 sm:$0xff]  }
 0x14c   :  { %5229 = vmatprep.subr.bf16.mxu1 %v8044_v34  ;;  %v8092_v34 = vld [vmem:[#allocation2 + $0x12a4] ss:$16 sps:$4 sm:$0xff]  }
 0x14e   :  { %5187 = vmatpush2.bf16.msra.mxu0 %v8039_v36 }
 0x14f   :  { %5230 = vmatpush2.bf16.msra.mxu1 %v8042_v37  ;;  %5188 = vmatprep.subr.bf16.mxu0 %v8047_v38  ;;  %v8087_v38 = vld [vmem:[#allocation2 + $0x10a0] ss:$16 sps:$4 sm:$0xff]  }
 0x150   :  { %5231 = vmatprep.subr.bf16.mxu1 %v8050_v39 }
 0x152   :  { %5189 = vmatpush2.bf16.msra.mxu0 %v8045_v40  ;;  %v8090_v40 = vld [vmem:[#allocation2 + $0x12a0] ss:$16 sps:$4 sm:$0xff]  }
 0x153   :  { %5232 = vmatpush2.bf16.msra.mxu1 %v8048_v42  ;;  %5190 = vmatprep.subr.bf16.mxu0 %v8053_v45  ;;  %v8095_v45 = vld [vmem:[#allocation2 + $0x1084] ss:$16 sps:$4 sm:$0xff]  }
 0x154   :  { %5233 = vmatprep.subr.bf16.mxu1 %v8056_v51  ;;  %v8098_v51 = vld [vmem:[#allocation2 + $0x1284] ss:$16 sps:$4 sm:$0xff]  }
 0x156   :  { %5191 = vmatpush2.bf16.msra.mxu0 %v8051_v52 }
 0x157   :  { %5234 = vmatpush2.bf16.msra.mxu1 %v8054_v54  ;;  %5192 = vmatprep.subr.bf16.mxu0 %v8059_v30  ;;  %v8093_v54 = vld [vmem:[#allocation2 + $0x1080] ss:$16 sps:$4 sm:$0xff]  }
 0x158   :  { %5235 = vmatprep.subr.bf16.mxu1 %v8062_v31  ;;  %v8096_v30 = vld [vmem:[#allocation2 + $0x1280] ss:$16 sps:$4 sm:$0xff]   ;;  %v8101_v31 = vld [vmem:[#allocation2 + $0x1064] ss:$16 sps:$4 sm:$0xff]  }
 0x15a   :  { %5193 = vmatpush2.bf16.msra.mxu0 %v8057_v56  ;;  %v8104_v56 = vld [vmem:[#allocation2 + $0x1264] ss:$16 sps:$4 sm:$0xff]  }
 0x15b   :  { %5236 = vmatpush2.bf16.msra.mxu1 %v8060_v57  ;;  %5194 = vmatprep.subr.bf16.mxu0 %v8065_v59  ;;  %v8099_v57 = vld [vmem:[#allocation2 + $0x1060] ss:$16 sps:$4 sm:$0xff]   ;;  %v8107_v59 = vld [vmem:[#allocation2 + $0x1044] ss:$16 sps:$4 sm:$0xff]  }
 0x15c   :  { %5237 = vmatprep.subr.bf16.mxu1 %v8068_v60  ;;  %v8110_v60 = vld [vmem:[#allocation2 + $0x1244] ss:$16 sps:$4 sm:$0xff]  }
 0x15e   :  { %5195 = vmatpush2.bf16.msra.mxu0 %v8063_v61  ;;  %v8105_v61 = vld [vmem:[#allocation2 + $0x1040] ss:$16 sps:$4 sm:$0xff]  }
 0x15f   :  { %5238 = vmatpush2.bf16.msra.mxu1 %v8066_v62  ;;  %5196 = vmatprep.subr.bf16.mxu0 %v8071_v0  ;;  %v8108_v62 = vld [vmem:[#allocation2 + $0x1240] ss:$16 sps:$4 sm:$0xff]   ;;  %v8113_v0 = vld [vmem:[#allocation2 + $0x1024] ss:$16 sps:$4 sm:$0xff]  }
 0x160   :  { %5239 = vmatprep.subr.bf16.mxu1 %v8074_v1  ;;  %v8116_v1 = vld [vmem:[#allocation2 + $0x1224] ss:$16 sps:$4 sm:$0xff]  }
 0x162   :  { %5197 = vmatpush2.bf16.msra.mxu0 %v8069_v2  ;;  %v8111_v2 = vld [vmem:[#allocation2 + $0x1020] ss:$16 sps:$4 sm:$0xff]  }
 0x163   :  { %5240 = vmatpush2.bf16.msra.mxu1 %v8072_v3  ;;  %5252 = vmatprep.subr.bf16.mxu0 %v8077_v6  ;;  %v8114_v3 = vld [vmem:[#allocation2 + $0x1220] ss:$16 sps:$4 sm:$0xff]   ;;  %v8122_v6 = vld [vmem:[#allocation2 + $0x1204] ss:$16 sps:$4 sm:$0xff]  }
 0x164   :  { %5295 = vmatprep.subr.bf16.mxu1 %v8080_v7  ;;  %v8117_v7 = vld [vmem:[#allocation2 + $0x1000] ss:$16 sps:$4 sm:$0xff]  }
 0x165   :  { %v4942_v50 = vpop.f32.mrf.mxu0  ;;  %5199 = vmatmul.mubr.bf16.vlgmr.msra.gmra.mxu0 %v9378_v14 }
 0x166   :  { %v4985_v22 = vpop.f32.mrf.mxu1  ;;  %5242 = vmatmul.mubr.bf16.vlgmr.msra.gmra.mxu1 %v9382_v15  ;;  %v4943_v24 = vadd.f32 %v4942_v50, %v931_v17  ;;  %5253 = vmatpush1.bf16.msra.mxu0 %v8075_v11  ;;  %v8120_v11 = vld [vmem:[#allocation2 + $0x1200] ss:$16 sps:$4 sm:$0xff]   ;;  %v8131_v50 = vld [vmem:[#allocation2 + $0x11c4] ss:$16 sps:$4 sm:$0xff]  }
 0x167   :  { %5296 = vmatpush1.bf16.msra.mxu1 %v8078_v18  ;;  %v9401_v26 = vpop.f32.mrf.mxu0  ;;  %5254 = vmatprep.subr.bf16.mxu0 %v8083_v19  ;;  %v8128_v18 = vld [vmem:[#allocation2 + $0x13e4] ss:$16 sps:$4 sm:$0xff]   ;;  %v8123_v19 = vld [vmem:[#allocation2 + $0x11e0] ss:$16 sps:$4 sm:$0xff]  }
 0x168   :  { %v9403_v27 = vpop.f32.mrf.mxu1  ;;  %5297 = vmatprep.subr.bf16.mxu1 %v8086_v44  ;;  %v9405_v36 = vadd.f32 %v4985_v22, %v4943_v24  ;;  %5284 = vmatprep.mubr.bf16.mxu0 %v9393_v46  ;;  %v8126_v44 = vld [vmem:[#allocation2 + $0x13e0] ss:$16 sps:$4 sm:$0xff]   ;;  %v8134_v22 = vld [vmem:[#allocation2 + $0x13c4] ss:$16 sps:$4 sm:$0xff]  }
 0x169   :  { %5327 = vmatprep.mubr.bf16.mxu1 %v9397_v47  ;;  %v4946_v37 = vpop.f32.mrf.mxu0  ;;  %v8132_v24 = vld [vmem:[#allocation2 + $0x13c0] ss:$16 sps:$4 sm:$0xff]  }
 0x16a   :  { %v4947_v39 = vadd.f32 %v4946_v37, %v931_v17  ;;  %5255 = vmatpush1.bf16.msra.mxu0 %v8081_v23  ;;  %v4989_v42 = vpop.f32.mrf.mxu1  ;;  %v8125_v17 = vld [vmem:[#allocation2 + $0x11e4] ss:$16 sps:$4 sm:$0xff]   ;;  %v8129_v23 = vld [vmem:[#allocation2 + $0x11c0] ss:$16 sps:$4 sm:$0xff]  }
 0x16b   :  { %5298 = vmatpush1.bf16.msra.mxu1 %v8084_v25  ;;  %5256 = vmatprep.subr.bf16.mxu0 %v8089_v32  ;;  %v8137_v25 = vld [vmem:[#allocation2 + $0x11a4] ss:$16 sps:$4 sm:$0xff]   ;;  %v8138_v37 = vld [vmem:[#allocation2 + $0x13a0] ss:$16 sps:$4 sm:$0xff]  }
 0x16c   :  { %5299 = vmatprep.subr.bf16.mxu1 %v8092_v34  ;;  %v9409_v52 = vadd.f32 %v4989_v42, %v4947_v39  ;;  %v8140_v32 = vld [vmem:[#allocation2 + $0x13a4] ss:$16 sps:$4 sm:$0xff]   ;;  %v8135_v34 = vld [vmem:[#allocation2 + $0x11a0] ss:$16 sps:$4 sm:$0xff]  }
 0x16d   :  { %v8146_v39 = vld [vmem:[#allocation2 + $0x1384] ss:$16 sps:$4 sm:$0xff]   ;;  %v8144_v42 = vld [vmem:[#allocation2 + $0x1380] ss:$16 sps:$4 sm:$0xff]  }
 0x16e   :  { %5257 = vmatpush1.bf16.msra.mxu0 %v8087_v38  ;;  %v8143_v38 = vld [vmem:[#allocation2 + $0x1184] ss:$16 sps:$4 sm:$0xff]  }
 0x16f   :  { %5300 = vmatpush1.bf16.msra.mxu1 %v8090_v40  ;;  %5258 = vmatprep.subr.bf16.mxu0 %v8095_v45  ;;  %v8141_v40 = vld [vmem:[#allocation2 + $0x1180] ss:$16 sps:$4 sm:$0xff]   ;;  %v8149_v45 = vld [vmem:[#allocation2 + $0x1164] ss:$16 sps:$4 sm:$0xff]  }
 0x170   :  { %5301 = vmatprep.subr.bf16.mxu1 %v8098_v51  ;;  %v8152_v51 = vld [vmem:[#allocation2 + $0x1364] ss:$16 sps:$4 sm:$0xff]  }
 0x172   :  { %5259 = vmatpush1.bf16.msra.mxu0 %v8093_v54  ;;  %v8147_v54 = vld [vmem:[#allocation2 + $0x1160] ss:$16 sps:$4 sm:$0xff]  }
 0x173   :  { %5302 = vmatpush1.bf16.msra.mxu1 %v8096_v30  ;;  %5260 = vmatprep.subr.bf16.mxu0 %v8101_v31  ;;  %v8150_v30 = vld [vmem:[#allocation2 + $0x1360] ss:$16 sps:$4 sm:$0xff]   ;;  %v8155_v31 = vld [vmem:[#allocation2 + $0x1144] ss:$16 sps:$4 sm:$0xff]  }
 0x174   :  { %5303 = vmatprep.subr.bf16.mxu1 %v8104_v56  ;;  %v8158_v56 = vld [vmem:[#allocation2 + $0x1344] ss:$16 sps:$4 sm:$0xff]  }
 0x176   :  { %5261 = vmatpush1.bf16.msra.mxu0 %v8099_v57  ;;  %v8153_v57 = vld [vmem:[#allocation2 + $0x1140] ss:$16 sps:$4 sm:$0xff]  }
 0x177   :  { %5304 = vmatpush1.bf16.msra.mxu1 %v8102_v58  ;;  %5262 = vmatprep.subr.bf16.mxu0 %v8107_v59  ;;  %v8156_v58 = vld [vmem:[#allocation2 + $0x1340] ss:$16 sps:$4 sm:$0xff]   ;;  %v8161_v59 = vld [vmem:[#allocation2 + $0x1124] ss:$16 sps:$4 sm:$0xff]  }
 0x178   :  { %5305 = vmatprep.subr.bf16.mxu1 %v8110_v60  ;;  %v8164_v60 = vld [vmem:[#allocation2 + $0x1324] ss:$16 sps:$4 sm:$0xff]  }
 0x17a   :  { %5263 = vmatpush1.bf16.msra.mxu0 %v8105_v61  ;;  %v8159_v61 = vld [vmem:[#allocation2 + $0x1120] ss:$16 sps:$4 sm:$0xff]  }
 0x17b   :  { %5306 = vmatpush1.bf16.msra.mxu1 %v8108_v62  ;;  %5264 = vmatprep.subr.bf16.mxu0 %v8113_v0  ;;  %v8162_v62 = vld [vmem:[#allocation2 + $0x1320] ss:$16 sps:$4 sm:$0xff]   ;;  %v8167_v0 = vld [vmem:[#allocation2 + $0x1104] ss:$16 sps:$4 sm:$0xff]  }
 0x17c   :  { %5307 = vmatprep.subr.bf16.mxu1 %v8116_v1  ;;  %v8170_v1 = vld [vmem:[#allocation2 + $0x1304] ss:$16 sps:$4 sm:$0xff]  }
 0x17e   :  { %5265 = vmatpush1.bf16.msra.mxu0 %v8111_v2  ;;  %v8165_v2 = vld [vmem:[#allocation2 + $0x1100] ss:$16 sps:$4 sm:$0xff]  }
 0x17f   :  { %5308 = vmatpush1.bf16.msra.mxu1 %v8114_v3  ;;  %5266 = vmatprep.subr.bf16.mxu0 %v8119_v4  ;;  %v8168_v3 = vld [vmem:[#allocation2 + $0x1300] ss:$16 sps:$4 sm:$0xff]   ;;  %v8173_v4 = vld [vmem:[#allocation2 + $0x14e4] ss:$16 sps:$4 sm:$0xff]  }
 0x180   :  { %5309 = vmatprep.subr.bf16.mxu1 %v8122_v6  ;;  %v8176_v6 = vld [vmem:[#allocation2 + $0x16e4] ss:$16 sps:$4 sm:$0xff]  }
 0x182   :  { %5267 = vmatpush1.bf16.msra.mxu0 %v8117_v7  ;;  %v9414_v7 = vld [vmem:[%s9596_s0 + $0x50] sm:$0xff] }
 0x183   :  { %5310 = vmatpush1.bf16.msra.mxu1 %v8120_v11  ;;  %5268 = vmatprep.subr.bf16.mxu0 %v8125_v17  ;;  %v9419_v11 = vld [vmem:[%s9596_s0 + $0xb0] sm:$0xff]  ;;  %v9424_v17 = vld [vmem:[%s9596_s0 + $0x58] sm:$0xff] }
 0x184   :  { %5311 = vmatprep.subr.bf16.mxu1 %v8128_v18  ;;  %v9429_v18 = vld [vmem:[%s9596_s0 + $0xb8] sm:$0xff] }
 0x186   :  { %5269 = vmatpush2.bf16.msra.mxu0 %v8123_v19  ;;  %v8171_v19 = vld [vmem:[#allocation2 + $0x14e0] ss:$16 sps:$4 sm:$0xff]  }
 0x187   :  { %5312 = vmatpush2.bf16.msra.mxu1 %v8126_v44  ;;  %5270 = vmatprep.subr.bf16.mxu0 %v8131_v50  ;;  %v8174_v44 = vld [vmem:[#allocation2 + $0x16e0] ss:$16 sps:$4 sm:$0xff]   ;;  %v9433_v50 = vcombine.low %v9364_v10, %v9369_v12  ;;  %v9445_v10 = vcombine.high %v9414_v7, %v9419_v11  ;;  %v9449_v12 = vcombine.high %v9424_v17, %v9429_v18 }
 0x188   :  { %5313 = vmatprep.subr.bf16.mxu1 %v8134_v22  ;;  %v9437_v22 = vcombine.low %v9374_v13, %v9387_v16 }
 0x18a   :  { %5271 = vmatpush2.bf16.msra.mxu0 %v8129_v23  ;;  %v9439_v23 = vpop.f32.mrf.mxu0 }
 0x18b   :  { %5314 = vmatpush2.bf16.msra.mxu1 %v8132_v24  ;;  %5272 = vmatprep.subr.bf16.mxu0 %v8137_v25  ;;  %v9441_v24 = vpop.f32.mrf.mxu1  ;;  %v8179_v25 = vld [vmem:[#allocation2 + $0x14c4] ss:$16 sps:$4 sm:$0xff]  }
 0x18c   :  { %5315 = vmatprep.subr.bf16.mxu1 %v8140_v32  ;;  %v8182_v32 = vld [vmem:[#allocation2 + $0x16c4] ss:$16 sps:$4 sm:$0xff]  }
 0x18e   :  { %5273 = vmatpush2.bf16.msra.mxu0 %v8135_v34  ;;  %v8177_v34 = vld [vmem:[#allocation2 + $0x14c0] ss:$16 sps:$4 sm:$0xff]  }
 0x18f   :  { %5316 = vmatpush2.bf16.msra.mxu1 %v8138_v37  ;;  %5274 = vmatprep.subr.bf16.mxu0 %v8143_v38  ;;  %v8180_v37 = vld [vmem:[#allocation2 + $0x16c0] ss:$16 sps:$4 sm:$0xff]  }
 0x190   :  { %5317 = vmatprep.subr.bf16.mxu1 %v8146_v39 }
 0x192   :  { %5275 = vmatpush2.bf16.msra.mxu0 %v8141_v40 }
 0x193   :  { %5318 = vmatpush2.bf16.msra.mxu1 %v8144_v42  ;;  %5276 = vmatprep.subr.bf16.mxu0 %v8149_v45  ;;  %v8185_v42 = vld [vmem:[#allocation2 + $0x14a4] ss:$16 sps:$4 sm:$0xff]  }
 0x194   :  { %5319 = vmatprep.subr.bf16.mxu1 %v8152_v51  ;;  %v8188_v45 = vld [vmem:[#allocation2 + $0x16a4] ss:$16 sps:$4 sm:$0xff]  }
 0x196   :  { %5277 = vmatpush2.bf16.msra.mxu0 %v8147_v54  ;;  %v8183_v54 = vld [vmem:[#allocation2 + $0x14a0] ss:$16 sps:$4 sm:$0xff]  }
 0x197   :  { %5320 = vmatpush2.bf16.msra.mxu1 %v8150_v30  ;;  %5278 = vmatprep.subr.bf16.mxu0 %v8155_v31  ;;  %v8186_v30 = vld [vmem:[#allocation2 + $0x16a0] ss:$16 sps:$4 sm:$0xff]  }
 0x198   :  { %5321 = vmatprep.subr.bf16.mxu1 %v8158_v56 }
 0x19a   :  { %5279 = vmatpush2.bf16.msra.mxu0 %v8153_v57  ;;  %v8191_v57 = vld [vmem:[#allocation2 + $0x1484] ss:$16 sps:$4 sm:$0xff]  }
 0x19b   :  { %5322 = vmatpush2.bf16.msra.mxu1 %v8156_v58  ;;  %5280 = vmatprep.subr.bf16.mxu0 %v8161_v59  ;;  %v8194_v58 = vld [vmem:[#allocation2 + $0x1684] ss:$16 sps:$4 sm:$0xff]  }
 0x19c   :  { %5323 = vmatprep.subr.bf16.mxu1 %v8164_v60  ;;  %v8189_v60 = vld [vmem:[#allocation2 + $0x1480] ss:$16 sps:$4 sm:$0xff]  }
 0x19e   :  { %5281 = vmatpush2.bf16.msra.mxu0 %v8159_v61  ;;  %v8192_v61 = vld [vmem:[#allocation2 + $0x1680] ss:$16 sps:$4 sm:$0xff]  }
 0x19f   :  { %5324 = vmatpush2.bf16.msra.mxu1 %v8162_v62  ;;  %5282 = vmatprep.subr.bf16.mxu0 %v8167_v0  ;;  %v8197_v62 = vld [vmem:[#allocation2 + $0x1464] ss:$16 sps:$4 sm:$0xff]  }
 0x1a0   :  { %5325 = vmatprep.subr.bf16.mxu1 %v8170_v1  ;;  %v8200_v0 = vld [vmem:[#allocation2 + $0x1664] ss:$16 sps:$4 sm:$0xff]   ;;  %v8198_v1 = vld [vmem:[#allocation2 + $0x1660] ss:$16 sps:$4 sm:$0xff]  }
 0x1a2   :  { %5283 = vmatpush2.bf16.msra.mxu0 %v8165_v2  ;;  %v8203_v2 = vld [vmem:[#allocation2 + $0x1444] ss:$16 sps:$4 sm:$0xff]  }
 0x1a3   :  { %5326 = vmatpush2.bf16.msra.mxu1 %v8168_v3  ;;  %5338 = vmatprep.subr.bf16.mxu0 %v8173_v4  ;;  %v8206_v3 = vld [vmem:[#allocation2 + $0x1644] ss:$16 sps:$4 sm:$0xff]   ;;  %v8201_v4 = vld [vmem:[#allocation2 + $0x1440] ss:$16 sps:$4 sm:$0xff]  }
 0x1a4   :  { %5381 = vmatprep.subr.bf16.mxu1 %v8176_v6  ;;  %v8204_v6 = vld [vmem:[#allocation2 + $0x1640] ss:$16 sps:$4 sm:$0xff]  }
 0x1a5   :  { %v5028_v13 = vpop.f32.mrf.mxu0  ;;  %5285 = vmatmul.mubr.bf16.vlgmr.msra.gmra.mxu0 %v9433_v50 }
 0x1a6   :  { %v5071_v16 = vpop.f32.mrf.mxu1  ;;  %5328 = vmatmul.mubr.bf16.vlgmr.msra.gmra.mxu1 %v9437_v22  ;;  %v5029_v38 = vadd.f32 %v5028_v13, %v9405_v36  ;;  %5339 = vmatpush1.bf16.msra.mxu0 %v8171_v19  ;;  %v8209_v19 = vld [vmem:[#allocation2 + $0x1424] ss:$16 sps:$4 sm:$0xff]   ;;  %v8213_v13 = vld [vmem:[#allocation2 + $0x1400] ss:$16 sps:$4 sm:$0xff]  }
 0x1a7   :  { %5382 = vmatpush1.bf16.msra.mxu1 %v8174_v44  ;;  %v9454_v39 = vpop.f32.mrf.mxu0  ;;  %5340 = vmatprep.subr.bf16.mxu0 %v8179_v25  ;;  %v8212_v44 = vld [vmem:[#allocation2 + $0x1624] ss:$16 sps:$4 sm:$0xff]   ;;  %v8207_v25 = vld [vmem:[#allocation2 + $0x1420] ss:$16 sps:$4 sm:$0xff]  }
 0x1a8   :  { %v9456_v40 = vpop.f32.mrf.mxu1  ;;  %5383 = vmatprep.subr.bf16.mxu1 %v8182_v32  ;;  %v9458_v51 = vadd.f32 %v5071_v16, %v5029_v38  ;;  %5370 = vmatprep.mubr.bf16.mxu0 %v9445_v10  ;;  %v8210_v32 = vld [vmem:[#allocation2 + $0x1620] ss:$16 sps:$4 sm:$0xff]   ;;  %v8221_v38 = vld [vmem:[#allocation2 + $0x15e4] ss:$16 sps:$4 sm:$0xff]  }
 0x1a9   :  { %5413 = vmatprep.mubr.bf16.mxu1 %v9449_v12  ;;  %v5032_v31 = vpop.f32.mrf.mxu0  ;;  %v8216_v16 = vld [vmem:[#allocation2 + $0x1600] ss:$16 sps:$4 sm:$0xff]  }
 0x1aa   :  { %v5033_v36 = vadd.f32 %v5032_v31, %v9409_v52  ;;  %5341 = vmatpush1.bf16.msra.mxu0 %v8177_v34  ;;  %v5075_v56 = vpop.f32.mrf.mxu1  ;;  %v8195_v52 = vld [vmem:[#allocation2 + $0x1460] ss:$16 sps:$4 sm:$0xff]   ;;  %v8215_v34 = vld [vmem:[#allocation2 + $0x1404] ss:$16 sps:$4 sm:$0xff]  }
 0x1ab   :  { %5384 = vmatpush1.bf16.msra.mxu1 %v8180_v37  ;;  %5342 = vmatprep.subr.bf16.mxu0 %v8185_v42  ;;  %v8218_v37 = vld [vmem:[#allocation2 + $0x1604] ss:$16 sps:$4 sm:$0xff]  }
 0x1ac   :  { %5385 = vmatprep.subr.bf16.mxu1 %v8188_v45  ;;  %v9463_v59 = vadd.f32 %v5075_v56, %v5033_v36  ;;  %v8224_v42 = vld [vmem:[#allocation2 + $0x17e4] ss:$16 sps:$4 sm:$0xff]   ;;  %v8219_v45 = vld [vmem:[#allocation2 + $0x15e0] ss:$16 sps:$4 sm:$0xff]  }
 0x1ad   :  { %v8230_v31 = vld [vmem:[#allocation2 + $0x17c4] ss:$16 sps:$4 sm:$0xff]   ;;  %v8225_v36 = vld [vmem:[#allocation2 + $0x15c0] ss:$16 sps:$4 sm:$0xff]  }
 0x1ae   :  { %5343 = vmatpush1.bf16.msra.mxu0 %v8183_v54  ;;  %v8222_v54 = vld [vmem:[#allocation2 + $0x17e0] ss:$16 sps:$4 sm:$0xff]  }
 0x1af   :  { %5386 = vmatpush1.bf16.msra.mxu1 %v8186_v30  ;;  %5344 = vmatprep.subr.bf16.mxu0 %v8191_v57  ;;  %v8227_v30 = vld [vmem:[#allocation2 + $0x15c4] ss:$16 sps:$4 sm:$0xff]   ;;  %v8228_v56 = vld [vmem:[#allocation2 + $0x17c0] ss:$16 sps:$4 sm:$0xff]  }
 0x1b0   :  { %5387 = vmatprep.subr.bf16.mxu1 %v8194_v58  ;;  %v8233_v57 = vld [vmem:[#allocation2 + $0x15a4] ss:$16 sps:$4 sm:$0xff]  }
 0x1b1   :  { %v8236_v58 = vld [vmem:[#allocation2 + $0x17a4] ss:$16 sps:$4 sm:$0xff]  }
 0x1b2   :  { %5345 = vmatpush1.bf16.msra.mxu0 %v8189_v60  ;;  %v8231_v60 = vld [vmem:[#allocation2 + $0x15a0] ss:$16 sps:$4 sm:$0xff]  }
 0x1b3   :  { %5388 = vmatpush1.bf16.msra.mxu1 %v8192_v61  ;;  %5346 = vmatprep.subr.bf16.mxu0 %v8197_v62  ;;  %v8234_v61 = vld [vmem:[#allocation2 + $0x17a0] ss:$16 sps:$4 sm:$0xff]   ;;  %v8239_v62 = vld [vmem:[#allocation2 + $0x1584] ss:$16 sps:$4 sm:$0xff]  }
 0x1b4   :  { %5389 = vmatprep.subr.bf16.mxu1 %v8200_v0  ;;  %v8242_v0 = vld [vmem:[#allocation2 + $0x1784] ss:$16 sps:$4 sm:$0xff]  }
 0x1b6   :  { %5347 = vmatpush1.bf16.msra.mxu0 %v8195_v52  ;;  %v8237_v52 = vld [vmem:[#allocation2 + $0x1580] ss:$16 sps:$4 sm:$0xff]  }
 0x1b7   :  { %5390 = vmatpush1.bf16.msra.mxu1 %v8198_v1  ;;  %5348 = vmatprep.subr.bf16.mxu0 %v8203_v2  ;;  %v8240_v1 = vld [vmem:[#allocation2 + $0x1780] ss:$16 sps:$4 sm:$0xff]   ;;  %v8245_v2 = vld [vmem:[#allocation2 + $0x1564] ss:$16 sps:$4 sm:$0xff]  }
 0x1b8   :  { %5391 = vmatprep.subr.bf16.mxu1 %v8206_v3  ;;  %v8248_v3 = vld [vmem:[#allocation2 + $0x1764] ss:$16 sps:$4 sm:$0xff]  }
 0x1ba   :  { %5349 = vmatpush1.bf16.msra.mxu0 %v8201_v4  ;;  %v8243_v4 = vld [vmem:[#allocation2 + $0x1560] ss:$16 sps:$4 sm:$0xff]  }
 0x1bb   :  { %5392 = vmatpush1.bf16.msra.mxu1 %v8204_v6  ;;  %5350 = vmatprep.subr.bf16.mxu0 %v8209_v19  ;;  %v8246_v6 = vld [vmem:[#allocation2 + $0x1760] ss:$16 sps:$4 sm:$0xff]   ;;  %v8251_v19 = vld [vmem:[#allocation2 + $0x1544] ss:$16 sps:$4 sm:$0xff]  }
 0x1bc   :  { %5393 = vmatprep.subr.bf16.mxu1 %v8212_v44  ;;  %v8254_v44 = vld [vmem:[#allocation2 + $0x1744] ss:$16 sps:$4 sm:$0xff]  }
 0x1be   :  { %5351 = vmatpush1.bf16.msra.mxu0 %v8207_v25  ;;  %v8249_v25 = vld [vmem:[#allocation2 + $0x1540] ss:$16 sps:$4 sm:$0xff]  }
 0x1bf   :  { %5394 = vmatpush1.bf16.msra.mxu1 %v8210_v32  ;;  %5352 = vmatprep.subr.bf16.mxu0 %v8215_v34  ;;  %v8252_v32 = vld [vmem:[#allocation2 + $0x1740] ss:$16 sps:$4 sm:$0xff]   ;;  %v8257_v34 = vld [vmem:[#allocation2 + $0x1524] ss:$16 sps:$4 sm:$0xff]  }
 0x1c0   :  { %5395 = vmatprep.subr.bf16.mxu1 %v8218_v37  ;;  %v8260_v37 = vld [vmem:[#allocation2 + $0x1724] ss:$16 sps:$4 sm:$0xff]  }
 0x1c2   :  { %5353 = vmatpush1.bf16.msra.mxu0 %v8213_v13  ;;  %v8255_v13 = vld [vmem:[#allocation2 + $0x1520] ss:$16 sps:$4 sm:$0xff]  }
 0x1c3   :  { %5396 = vmatpush1.bf16.msra.mxu1 %v8216_v16  ;;  %5354 = vmatprep.subr.bf16.mxu0 %v8221_v38  ;;  %v8258_v16 = vld [vmem:[#allocation2 + $0x1720] ss:$16 sps:$4 sm:$0xff]   ;;  %v8263_v38 = vld [vmem:[#allocation2 + $0x1504] ss:$16 sps:$4 sm:$0xff]  }
 0x1c4   :  { %5397 = vmatprep.subr.bf16.mxu1 %v8224_v42  ;;  %v8266_v42 = vld [vmem:[#allocation2 + $0x1704] ss:$16 sps:$4 sm:$0xff]  }
 0x1c6   :  { %5355 = vmatpush2.bf16.msra.mxu0 %v8219_v45  ;;  %v8261_v45 = vld [vmem:[#allocation2 + $0x1500] ss:$16 sps:$4 sm:$0xff]  }
 0x1c7   :  { %5398 = vmatpush2.bf16.msra.mxu1 %v8222_v54  ;;  %5356 = vmatprep.subr.bf16.mxu0 %v8227_v30  ;;  %v8264_v54 = vld [vmem:[#allocation2 + $0x1700] ss:$16 sps:$4 sm:$0xff]   ;;  %v8269_v30 = vld [vmem:[#allocation2 + $0xec] ss:$16 sps:$4 sm:$0xff]  }
 0x1c8   :  { %5399 = vmatprep.subr.bf16.mxu1 %v8230_v31  ;;  %v8272_v31 = vld [vmem:[#allocation2 + $0x2ec] ss:$16 sps:$4 sm:$0xff]  }
 0x1ca   :  { %5357 = vmatpush2.bf16.msra.mxu0 %v8225_v36  ;;  %v8267_v36 = vld [vmem:[#allocation2 + $0xe8] ss:$16 sps:$4 sm:$0xff]  }
 0x1cb   :  { %5400 = vmatpush2.bf16.msra.mxu1 %v8228_v56  ;;  %5358 = vmatprep.subr.bf16.mxu0 %v8233_v57  ;;  %v8270_v56 = vld [vmem:[#allocation2 + $0x2e8] ss:$16 sps:$4 sm:$0xff]   ;;  %v9467_v57 = vcombine.low %v9414_v7, %v9419_v11 }
 0x1cc   :  { %5401 = vmatprep.subr.bf16.mxu1 %v8236_v58  ;;  %v9471_v58 = vcombine.low %v9424_v17, %v9429_v18  ;;  %v8281_v18 = vld [vmem:[#allocation2 + $0xac] ss:$16 sps:$4 sm:$0xff]  }
 0x1ce   :  { %5359 = vmatpush2.bf16.msra.mxu0 %v8231_v60  ;;  %v9473_v60 = vpop.f32.mrf.mxu0 }
 0x1cf   :  { %5402 = vmatpush2.bf16.msra.mxu1 %v8234_v61  ;;  %5360 = vmatprep.subr.bf16.mxu0 %v8239_v62  ;;  %v9475_v61 = vpop.f32.mrf.mxu1  ;;  %v8275_v62 = vld [vmem:[#allocation2 + $0xcc] ss:$16 sps:$4 sm:$0xff]  }
 0x1d0   :  { %5403 = vmatprep.subr.bf16.mxu1 %v8242_v0  ;;  %v8278_v0 = vld [vmem:[#allocation2 + $0x2cc] ss:$16 sps:$4 sm:$0xff]  }
 0x1d2   :  { %5361 = vmatpush2.bf16.msra.mxu0 %v8237_v52  ;;  %v8273_v52 = vld [vmem:[#allocation2 + $0xc8] ss:$16 sps:$4 sm:$0xff]  }
 0x1d3   :  { %5404 = vmatpush2.bf16.msra.mxu1 %v8240_v1  ;;  %5362 = vmatprep.subr.bf16.mxu0 %v8245_v2  ;;  %v8276_v1 = vld [vmem:[#allocation2 + $0x2c8] ss:$16 sps:$4 sm:$0xff]  }
 0x1d4   :  { %5405 = vmatprep.subr.bf16.mxu1 %v8248_v3 }
 0x1d6   :  { %5363 = vmatpush2.bf16.msra.mxu0 %v8243_v4  ;;  %v8284_v4 = vld [vmem:[#allocation2 + $0x2ac] ss:$16 sps:$4 sm:$0xff]  }
 0x1d7   :  { %5406 = vmatpush2.bf16.msra.mxu1 %v8246_v6  ;;  %5364 = vmatprep.subr.bf16.mxu0 %v8251_v19  ;;  %v8279_v19 = vld [vmem:[#allocation2 + $0xa8] ss:$16 sps:$4 sm:$0xff]  }
 0x1d8   :  { %5407 = vmatprep.subr.bf16.mxu1 %v8254_v44  ;;  %v8282_v44 = vld [vmem:[#allocation2 + $0x2a8] ss:$16 sps:$4 sm:$0xff]  }
 0x1da   :  { %5365 = vmatpush2.bf16.msra.mxu0 %v8249_v25 }
 0x1db   :  { %5408 = vmatpush2.bf16.msra.mxu1 %v8252_v32  ;;  %5366 = vmatprep.subr.bf16.mxu0 %v8257_v34  ;;  %v8287_v34 = vld [vmem:[#allocation2 + $0x8c] ss:$16 sps:$4 sm:$0xff]  }
 0x1dc   :  { %5409 = vmatprep.subr.bf16.mxu1 %v8260_v37  ;;  %v8290_v37 = vld [vmem:[#allocation2 + $0x28c] ss:$16 sps:$4 sm:$0xff]  }
 0x1de   :  { %5367 = vmatpush2.bf16.msra.mxu0 %v8255_v13 }
 0x1df   :  { %5410 = vmatpush2.bf16.msra.mxu1 %v8258_v16  ;;  %5368 = vmatprep.subr.bf16.mxu0 %v8263_v38  ;;  %v8285_v16 = vld [vmem:[#allocation2 + $0x88] ss:$16 sps:$4 sm:$0xff]  }
 0x1e0   :  { %5411 = vmatprep.subr.bf16.mxu1 %v8266_v42  ;;  %v8288_v38 = vld [vmem:[#allocation2 + $0x288] ss:$16 sps:$4 sm:$0xff]  }
 0x1e1   :  { %v8294_v42 = vld [vmem:[#allocation2 + $0x268] ss:$16 sps:$4 sm:$0xff]  }
 0x1e2   :  { %5369 = vmatpush2.bf16.msra.mxu0 %v8261_v45  ;;  %v8299_v45 = vld [vmem:[#allocation2 + $0x4c] ss:$16 sps:$4 sm:$0xff]  }
 0x1e3   :  { %5412 = vmatpush2.bf16.msra.mxu1 %v8264_v54  ;;  %5424 = vmatprep.subr.bf16.mxu0 %v8269_v30  ;;  %v8302_v54 = vld [vmem:[#allocation2 + $0x24c] ss:$16 sps:$4 sm:$0xff]   ;;  %v8297_v30 = vld [vmem:[#allocation2 + $0x48] ss:$16 sps:$4 sm:$0xff]  }
 0x1e4   :  { %5467 = vmatprep.subr.bf16.mxu1 %v8272_v31  ;;  %v8300_v31 = vld [vmem:[#allocation2 + $0x248] ss:$16 sps:$4 sm:$0xff]  }
 0x1e5   :  { %v5114_v2 = vpop.f32.mrf.mxu0  ;;  %5371 = vmatmul.mubr.bf16.vlgmr.msra.gmra.mxu0 %v9467_v57 }
 0x1e6   :  { %v5157_v3 = vpop.f32.mrf.mxu1  ;;  %5414 = vmatmul.mubr.bf16.vlgmr.msra.gmra.mxu1 %v9471_v58  ;;  %v5115_v7 = vadd.f32 %v5114_v2, %v9458_v51  ;;  %5425 = vmatpush1.bf16.msra.mxu0 %v8267_v36  ;;  %v8305_v36 = vld [vmem:[#allocation2 + $0x2c] ss:$16 sps:$4 sm:$0xff]   ;;  %v8309_v2 = vld [vmem:[#allocation2 + $0x8] ss:$16 sps:$4 sm:$0xff]  }
 0x1e7   :  { %5468 = vmatpush1.bf16.msra.mxu1 %v8270_v56  ;;  %v9480_v11 = vpop.f32.mrf.mxu0  ;;  %5426 = vmatprep.subr.bf16.mxu0 %v8275_v62  ;;  %v8308_v56 = vld [vmem:[#allocation2 + $0x22c] ss:$16 sps:$4 sm:$0xff]   ;;  %v8303_v62 = vld [vmem:[#allocation2 + $0x28] ss:$16 sps:$4 sm:$0xff]  }
 0x1e8   :  { %v9482_v17 = vpop.f32.mrf.mxu1  ;;  %5469 = vmatprep.subr.bf16.mxu1 %v8278_v0  ;;  %v9484_v6 = vadd.f32 %v5157_v3, %v5115_v7  ;;  %5456 = vmatprep.mubr.bf16.mxu0 %v9236_v53  ;;  %v8293_v53 = vld [vmem:[#allocation2 + $0x6c] ss:$16 sps:$4 sm:$0xff]   ;;  %v8306_v0 = vld [vmem:[#allocation2 + $0x228] ss:$16 sps:$4 sm:$0xff]  }
 0x1e9   :  { %5499 = vmatprep.mubr.bf16.mxu1 %v9238_v55  ;;  %v5118_v25 = vpop.f32.mrf.mxu0  ;;  %v8296_v55 = vld [vmem:[#allocation2 + $0x26c] ss:$16 sps:$4 sm:$0xff]   ;;  %v8312_v3 = vld [vmem:[#allocation2 + $0x208] ss:$16 sps:$4 sm:$0xff]  }
 0x1ea   :  { %v5119_v51 = vadd.f32 %v5118_v25, %v9463_v59  ;;  %5427 = vmatpush1.bf16.msra.mxu0 %v8273_v52  ;;  %v5161_v32 = vpop.f32.mrf.mxu1  ;;  %v8291_v59 = vld [vmem:[#allocation2 + $0x68] ss:$16 sps:$4 sm:$0xff]   ;;  %v8311_v52 = vld [vmem:[#allocation2 + $0xc] ss:$16 sps:$4 sm:$0xff]  }
 0x1eb   :  { %5470 = vmatpush1.bf16.msra.mxu1 %v8276_v1  ;;  %5428 = vmatprep.subr.bf16.mxu0 %v8281_v18  ;;  %v8314_v1 = vld [vmem:[#allocation2 + $0x20c] ss:$16 sps:$4 sm:$0xff]  }
 0x1ec   :  { %5471 = vmatprep.subr.bf16.mxu1 %v8284_v4  ;;  %v9489_v13 = vadd.f32 %v5161_v32, %v5119_v51  ;;  %v8317_v7 = vld [vmem:[#allocation2 + $0x1ec] ss:$16 sps:$4 sm:$0xff]   ;;  %v8315_v4 = vld [vmem:[#allocation2 + $0x1e8] ss:$16 sps:$4 sm:$0xff]  }
 0x1ed   :  { %v8320_v18 = vld [vmem:[#allocation2 + $0x3ec] ss:$16 sps:$4 sm:$0xff]   ;;  %v8321_v51 = vld [vmem:[#allocation2 + $0x1c8] ss:$16 sps:$4 sm:$0xff]  }
 0x1ee   :  { %5429 = vmatpush1.bf16.msra.mxu0 %v8279_v19  ;;  %v8318_v19 = vld [vmem:[#allocation2 + $0x3e8] ss:$16 sps:$4 sm:$0xff]   ;;  %v8326_v25 = vld [vmem:[#allocation2 + $0x3cc] ss:$16 sps:$4 sm:$0xff]  }
 0x1ef   :  { %5472 = vmatpush1.bf16.msra.mxu1 %v8282_v44  ;;  %5430 = vmatprep.subr.bf16.mxu0 %v8287_v34  ;;  %v8323_v44 = vld [vmem:[#allocation2 + $0x1cc] ss:$16 sps:$4 sm:$0xff]   ;;  %v8324_v32 = vld [vmem:[#allocation2 + $0x3c8] ss:$16 sps:$4 sm:$0xff]  }
 0x1f0   :  { %5473 = vmatprep.subr.bf16.mxu1 %v8290_v37  ;;  %v8329_v34 = vld [vmem:[#allocation2 + $0x1ac] ss:$16 sps:$4 sm:$0xff]  }
 0x1f1   :  { %v8332_v37 = vld [vmem:[#allocation2 + $0x3ac] ss:$16 sps:$4 sm:$0xff]  }
 0x1f2   :  { %5431 = vmatpush1.bf16.msra.mxu0 %v8285_v16  ;;  %v8327_v16 = vld [vmem:[#allocation2 + $0x1a8] ss:$16 sps:$4 sm:$0xff]  }
 0x1f3   :  { %5474 = vmatpush1.bf16.msra.mxu1 %v8288_v38  ;;  %5432 = vmatprep.subr.bf16.mxu0 %v8293_v53  ;;  %v8330_v38 = vld [vmem:[#allocation2 + $0x3a8] ss:$16 sps:$4 sm:$0xff]   ;;  %v8335_v53 = vld [vmem:[#allocation2 + $0x18c] ss:$16 sps:$4 sm:$0xff]  }
 0x1f4   :  { %5475 = vmatprep.subr.bf16.mxu1 %v8296_v55  ;;  %v8338_v55 = vld [vmem:[#allocation2 + $0x38c] ss:$16 sps:$4 sm:$0xff]  }
 0x1f6   :  { %5433 = vmatpush1.bf16.msra.mxu0 %v8291_v59  ;;  %v8333_v59 = vld [vmem:[#allocation2 + $0x188] ss:$16 sps:$4 sm:$0xff]  }
 0x1f7   :  { %5476 = vmatpush1.bf16.msra.mxu1 %v8294_v42  ;;  %5434 = vmatprep.subr.bf16.mxu0 %v8299_v45  ;;  %v8336_v42 = vld [vmem:[#allocation2 + $0x388] ss:$16 sps:$4 sm:$0xff]   ;;  %v8341_v45 = vld [vmem:[#allocation2 + $0x16c] ss:$16 sps:$4 sm:$0xff]  }
 0x1f8   :  { %5477 = vmatprep.subr.bf16.mxu1 %v8302_v54  ;;  %v8344_v54 = vld [vmem:[#allocation2 + $0x36c] ss:$16 sps:$4 sm:$0xff]  }
 0x1fa   :  { %5435 = vmatpush1.bf16.msra.mxu0 %v8297_v30  ;;  %v8339_v30 = vld [vmem:[#allocation2 + $0x168] ss:$16 sps:$4 sm:$0xff]  }
 0x1fb   :  { %5478 = vmatpush1.bf16.msra.mxu1 %v8300_v31  ;;  %5436 = vmatprep.subr.bf16.mxu0 %v8305_v36  ;;  %v8342_v31 = vld [vmem:[#allocation2 + $0x368] ss:$16 sps:$4 sm:$0xff]   ;;  %v8347_v36 = vld [vmem:[#allocation2 + $0x14c] ss:$16 sps:$4 sm:$0xff]  }
 0x1fc   :  { %5479 = vmatprep.subr.bf16.mxu1 %v8308_v56  ;;  %v8350_v56 = vld [vmem:[#allocation2 + $0x34c] ss:$16 sps:$4 sm:$0xff]  }
 0x1fe   :  { %5437 = vmatpush1.bf16.msra.mxu0 %v8303_v62  ;;  %v8345_v62 = vld [vmem:[#allocation2 + $0x148] ss:$16 sps:$4 sm:$0xff]  }
 0x1ff   :  { %5480 = vmatpush1.bf16.msra.mxu1 %v8306_v0  ;;  %5438 = vmatprep.subr.bf16.mxu0 %v8311_v52  ;;  %v8348_v0 = vld [vmem:[#allocation2 + $0x348] ss:$16 sps:$4 sm:$0xff]   ;;  %v8353_v52 = vld [vmem:[#allocation2 + $0x12c] ss:$16 sps:$4 sm:$0xff]  }
 0x200   :  { %5481 = vmatprep.subr.bf16.mxu1 %v8314_v1  ;;  %v8356_v1 = vld [vmem:[#allocation2 + $0x32c] ss:$16 sps:$4 sm:$0xff]  }
 0x202   :  { %5439 = vmatpush1.bf16.msra.mxu0 %v8309_v2  ;;  %v8351_v2 = vld [vmem:[#allocation2 + $0x128] ss:$16 sps:$4 sm:$0xff]  }
 0x203   :  { %5482 = vmatpush1.bf16.msra.mxu1 %v8312_v3  ;;  %5440 = vmatprep.subr.bf16.mxu0 %v8317_v7  ;;  %v8354_v3 = vld [vmem:[#allocation2 + $0x328] ss:$16 sps:$4 sm:$0xff]   ;;  %v8359_v7 = vld [vmem:[#allocation2 + $0x10c] ss:$16 sps:$4 sm:$0xff]  }
 0x204   :  { %5483 = vmatprep.subr.bf16.mxu1 %v8320_v18  ;;  %v8362_v18 = vld [vmem:[#allocation2 + $0x30c] ss:$16 sps:$4 sm:$0xff]  }
 0x206   :  { %5441 = vmatpush2.bf16.msra.mxu0 %v8315_v4  ;;  %v8357_v4 = vld [vmem:[#allocation2 + $0x108] ss:$16 sps:$4 sm:$0xff]  }
 0x207   :  { %5484 = vmatpush2.bf16.msra.mxu1 %v8318_v19  ;;  %5442 = vmatprep.subr.bf16.mxu0 %v8323_v44  ;;  %v8360_v19 = vld [vmem:[#allocation2 + $0x308] ss:$16 sps:$4 sm:$0xff]   ;;  %v8365_v44 = vld [vmem:[#allocation2 + $0x4ec] ss:$16 sps:$4 sm:$0xff]  }
 0x208   :  { %5485 = vmatprep.subr.bf16.mxu1 %v8326_v25  ;;  %v8368_v25 = vld [vmem:[#allocation2 + $0x6ec] ss:$16 sps:$4 sm:$0xff]  }
 0x20a   :  { %5443 = vmatpush2.bf16.msra.mxu0 %v8321_v51  ;;  %v8363_v51 = vld [vmem:[#allocation2 + $0x4e8] ss:$16 sps:$4 sm:$0xff]  }
 0x20b   :  { %5486 = vmatpush2.bf16.msra.mxu1 %v8324_v32  ;;  %5444 = vmatprep.subr.bf16.mxu0 %v8329_v34  ;;  %v8366_v32 = vld [vmem:[#allocation2 + $0x6e8] ss:$16 sps:$4 sm:$0xff]   ;;  %v9491_v34 = vpop.f32.mrf.mxu0 }
 0x20c   :  { %5487 = vmatprep.subr.bf16.mxu1 %v8332_v37  ;;  %v9493_v37 = vpop.f32.mrf.mxu1 }
 0x20e   :  { %5445 = vmatpush2.bf16.msra.mxu0 %v8327_v16  ;;  %v8371_v16 = vld [vmem:[#allocation2 + $0x4cc] ss:$16 sps:$4 sm:$0xff]  }
 0x20f   :  { %5488 = vmatpush2.bf16.msra.mxu1 %v8330_v38  ;;  %5446 = vmatprep.subr.bf16.mxu0 %v8335_v53  ;;  %v8374_v38 = vld [vmem:[#allocation2 + $0x6cc] ss:$16 sps:$4 sm:$0xff]   ;;  %v8369_v53 = vld [vmem:[#allocation2 + $0x4c8] ss:$16 sps:$4 sm:$0xff]  }
 0x210   :  { %5489 = vmatprep.subr.bf16.mxu1 %v8338_v55  ;;  %v8372_v55 = vld [vmem:[#allocation2 + $0x6c8] ss:$16 sps:$4 sm:$0xff]  }
 0x212   :  { %5447 = vmatpush2.bf16.msra.mxu0 %v8333_v59 }
 0x213   :  { %5490 = vmatpush2.bf16.msra.mxu1 %v8336_v42  ;;  %5448 = vmatprep.subr.bf16.mxu0 %v8341_v45 }
 0x214   :  { %5491 = vmatprep.subr.bf16.mxu1 %v8344_v54 }
 0x216   :  { %5449 = vmatpush2.bf16.msra.mxu0 %v8339_v30 }
 0x217   :  { %5492 = vmatpush2.bf16.msra.mxu1 %v8342_v31  ;;  %5450 = vmatprep.subr.bf16.mxu0 %v8347_v36  ;;  %v8377_v31 = vld [vmem:[#allocation2 + $0x4ac] ss:$16 sps:$4 sm:$0xff]  }
 0x218   :  { %5493 = vmatprep.subr.bf16.mxu1 %v8350_v56  ;;  %v8380_v36 = vld [vmem:[#allocation2 + $0x6ac] ss:$16 sps:$4 sm:$0xff]  }
 0x21a   :  { %5451 = vmatpush2.bf16.msra.mxu0 %v8345_v62  ;;  %v8375_v62 = vld [vmem:[#allocation2 + $0x4a8] ss:$16 sps:$4 sm:$0xff]  }
 0x21b   :  { %5494 = vmatpush2.bf16.msra.mxu1 %v8348_v0  ;;  %5452 = vmatprep.subr.bf16.mxu0 %v8353_v52  ;;  %v8378_v0 = vld [vmem:[#allocation2 + $0x6a8] ss:$16 sps:$4 sm:$0xff]   ;;  %v8383_v52 = vld [vmem:[#allocation2 + $0x48c] ss:$16 sps:$4 sm:$0xff]  }
 0x21c   :  { %5495 = vmatprep.subr.bf16.mxu1 %v8356_v1  ;;  %v8386_v1 = vld [vmem:[#allocation2 + $0x68c] ss:$16 sps:$4 sm:$0xff]  }
 0x21e   :  { %5453 = vmatpush2.bf16.msra.mxu0 %v8351_v2 }
 0x21f   :  { %5496 = vmatpush2.bf16.msra.mxu1 %v8354_v3  ;;  %5454 = vmatprep.subr.bf16.mxu0 %v8359_v7  ;;  %v8381_v3 = vld [vmem:[#allocation2 + $0x488] ss:$16 sps:$4 sm:$0xff]  }
 0x220   :  { %5497 = vmatprep.subr.bf16.mxu1 %v8362_v18  ;;  %v8384_v7 = vld [vmem:[#allocation2 + $0x688] ss:$16 sps:$4 sm:$0xff]  }
 0x221   :  { %v8390_v18 = vld [vmem:[#allocation2 + $0x668] ss:$16 sps:$4 sm:$0xff]  }
 0x222   :  { %5455 = vmatpush2.bf16.msra.mxu0 %v8357_v4  ;;  %v8395_v4 = vld [vmem:[#allocation2 + $0x44c] ss:$16 sps:$4 sm:$0xff]  }
 0x223   :  { %5498 = vmatpush2.bf16.msra.mxu1 %v8360_v19  ;;  %5510 = vmatprep.subr.bf16.mxu0 %v8365_v44  ;;  %v8398_v19 = vld [vmem:[#allocation2 + $0x64c] ss:$16 sps:$4 sm:$0xff]   ;;  %v8393_v44 = vld [vmem:[#allocation2 + $0x448] ss:$16 sps:$4 sm:$0xff]  }
 0x224   :  { %5553 = vmatprep.subr.bf16.mxu1 %v8368_v25  ;;  %v8396_v25 = vld [vmem:[#allocation2 + $0x648] ss:$16 sps:$4 sm:$0xff]  }
 0x225   :  { %v5200_v59 = vpop.f32.mrf.mxu0  ;;  %5457 = vmatmul.mubr.bf16.vlgmr.msra.gmra.mxu0 %v9242_v8 }
 0x226   :  { %v5243_v42 = vpop.f32.mrf.mxu1  ;;  %5500 = vmatmul.mubr.bf16.vlgmr.msra.gmra.mxu1 %v9244_v9  ;;  %v5201_v45 = vadd.f32 %v5200_v59, %v9484_v6  ;;  %5511 = vmatpush1.bf16.msra.mxu0 %v8363_v51  ;;  %v8401_v51 = vld [vmem:[#allocation2 + $0x42c] ss:$16 sps:$4 sm:$0xff]   ;;  %v8405_v59 = vld [vmem:[#allocation2 + $0x408] ss:$16 sps:$4 sm:$0xff]  }
 0x227   :  { %5554 = vmatpush1.bf16.msra.mxu1 %v8366_v32  ;;  %v9498_v54 = vpop.f32.mrf.mxu0  ;;  %5512 = vmatprep.subr.bf16.mxu0 %v8371_v16  ;;  %v8404_v32 = vld [vmem:[#allocation2 + $0x62c] ss:$16 sps:$4 sm:$0xff]   ;;  %v8399_v16 = vld [vmem:[#allocation2 + $0x428] ss:$16 sps:$4 sm:$0xff]  }
 0x228   :  { %v9500_v30 = vpop.f32.mrf.mxu1  ;;  %5555 = vmatprep.subr.bf16.mxu1 %v8374_v38  ;;  %v9502_v56 = vadd.f32 %v5243_v42, %v5201_v45  ;;  %5542 = vmatprep.mubr.bf16.mxu0 %v9270_v41  ;;  %v8389_v41 = vld [vmem:[#allocation2 + $0x46c] ss:$16 sps:$4 sm:$0xff]   ;;  %v8402_v38 = vld [vmem:[#allocation2 + $0x628] ss:$16 sps:$4 sm:$0xff]  }
 0x229   :  { %5585 = vmatprep.mubr.bf16.mxu1 %v9274_v43  ;;  %v5204_v8 = vpop.f32.mrf.mxu0  ;;  %v8392_v43 = vld [vmem:[#allocation2 + $0x66c] ss:$16 sps:$4 sm:$0xff]   ;;  %v8408_v42 = vld [vmem:[#allocation2 + $0x608] ss:$16 sps:$4 sm:$0xff]  }
 0x22a   :  { %v5205_v9 = vadd.f32 %v5204_v8, %v9489_v13  ;;  %5513 = vmatpush1.bf16.msra.mxu0 %v8369_v53  ;;  %v5247_v6 = vpop.f32.mrf.mxu1  ;;  %v8387_v13 = vld [vmem:[#allocation2 + $0x468] ss:$16 sps:$4 sm:$0xff]   ;;  %v8407_v53 = vld [vmem:[#allocation2 + $0x40c] ss:$16 sps:$4 sm:$0xff]  }
 0x22b   :  { %5556 = vmatpush1.bf16.msra.mxu1 %v8372_v55  ;;  %5514 = vmatprep.subr.bf16.mxu0 %v8377_v31  ;;  %v8410_v55 = vld [vmem:[#allocation2 + $0x60c] ss:$16 sps:$4 sm:$0xff]  }
 0x22c   :  { %5557 = vmatprep.subr.bf16.mxu1 %v8380_v36  ;;  %v9507_v2 = vadd.f32 %v5247_v6, %v5205_v9  ;;  %v8413_v45 = vld [vmem:[#allocation2 + $0x5ec] ss:$16 sps:$4 sm:$0xff]   ;;  %v8411_v36 = vld [vmem:[#allocation2 + $0x5e8] ss:$16 sps:$4 sm:$0xff]  }
 0x22d   :  { %v8416_v31 = vld [vmem:[#allocation2 + $0x7ec] ss:$16 sps:$4 sm:$0xff]   ;;  %v8417_v9 = vld [vmem:[#allocation2 + $0x5c8] ss:$16 sps:$4 sm:$0xff]  }
 0x22e   :  { %5515 = vmatpush1.bf16.msra.mxu0 %v8375_v62  ;;  %v8414_v62 = vld [vmem:[#allocation2 + $0x7e8] ss:$16 sps:$4 sm:$0xff]   ;;  %v8422_v8 = vld [vmem:[#allocation2 + $0x7cc] ss:$16 sps:$4 sm:$0xff]  }
 0x22f   :  { %5558 = vmatpush1.bf16.msra.mxu1 %v8378_v0  ;;  %5516 = vmatprep.subr.bf16.mxu0 %v8383_v52  ;;  %v8419_v0 = vld [vmem:[#allocation2 + $0x5cc] ss:$16 sps:$4 sm:$0xff]   ;;  %v8420_v6 = vld [vmem:[#allocation2 + $0x7c8] ss:$16 sps:$4 sm:$0xff]  }
 0x230   :  { %5559 = vmatprep.subr.bf16.mxu1 %v8386_v1  ;;  %v8425_v52 = vld [vmem:[#allocation2 + $0x5ac] ss:$16 sps:$4 sm:$0xff]  }
 0x231   :  { %v8428_v1 = vld [vmem:[#allocation2 + $0x7ac] ss:$16 sps:$4 sm:$0xff]  }
 0x232   :  { %5517 = vmatpush1.bf16.msra.mxu0 %v8381_v3  ;;  %v8423_v3 = vld [vmem:[#allocation2 + $0x5a8] ss:$16 sps:$4 sm:$0xff]  }
 0x233   :  { %5560 = vmatpush1.bf16.msra.mxu1 %v8384_v7  ;;  %5518 = vmatprep.subr.bf16.mxu0 %v8389_v41  ;;  %v8426_v7 = vld [vmem:[#allocation2 + $0x7a8] ss:$16 sps:$4 sm:$0xff]   ;;  %v8431_v41 = vld [vmem:[#allocation2 + $0x58c] ss:$16 sps:$4 sm:$0xff]  }
 0x234   :  { %5561 = vmatprep.subr.bf16.mxu1 %v8392_v43  ;;  %v8434_v43 = vld [vmem:[#allocation2 + $0x78c] ss:$16 sps:$4 sm:$0xff]  }
 0x236   :  { %5519 = vmatpush1.bf16.msra.mxu0 %v8387_v13  ;;  %v8429_v13 = vld [vmem:[#allocation2 + $0x588] ss:$16 sps:$4 sm:$0xff]  }
 0x237   :  { %5562 = vmatpush1.bf16.msra.mxu1 %v8390_v18  ;;  %5520 = vmatprep.subr.bf16.mxu0 %v8395_v4  ;;  %v8432_v18 = vld [vmem:[#allocation2 + $0x788] ss:$16 sps:$4 sm:$0xff]   ;;  %v8437_v4 = vld [vmem:[#allocation2 + $0x56c] ss:$16 sps:$4 sm:$0xff]  }
 0x238   :  { %5563 = vmatprep.subr.bf16.mxu1 %v8398_v19  ;;  %v8440_v19 = vld [vmem:[#allocation2 + $0x76c] ss:$16 sps:$4 sm:$0xff]  }
 0x23a   :  { %5521 = vmatpush1.bf16.msra.mxu0 %v8393_v44  ;;  %v8435_v44 = vld [vmem:[#allocation2 + $0x568] ss:$16 sps:$4 sm:$0xff]  }
 0x23b   :  { %5564 = vmatpush1.bf16.msra.mxu1 %v8396_v25  ;;  %5522 = vmatprep.subr.bf16.mxu0 %v8401_v51  ;;  %v8438_v25 = vld [vmem:[#allocation2 + $0x768] ss:$16 sps:$4 sm:$0xff]   ;;  %v8443_v51 = vld [vmem:[#allocation2 + $0x54c] ss:$16 sps:$4 sm:$0xff]  }
 0x23c   :  { %5565 = vmatprep.subr.bf16.mxu1 %v8404_v32  ;;  %v8446_v32 = vld [vmem:[#allocation2 + $0x74c] ss:$16 sps:$4 sm:$0xff]  }
 0x23e   :  { %5523 = vmatpush1.bf16.msra.mxu0 %v8399_v16  ;;  %v8441_v16 = vld [vmem:[#allocation2 + $0x548] ss:$16 sps:$4 sm:$0xff]  }
 0x23f   :  { %5566 = vmatpush1.bf16.msra.mxu1 %v8402_v38  ;;  %5524 = vmatprep.subr.bf16.mxu0 %v8407_v53  ;;  %v8444_v38 = vld [vmem:[#allocation2 + $0x748] ss:$16 sps:$4 sm:$0xff]   ;;  %v8449_v53 = vld [vmem:[#allocation2 + $0x52c] ss:$16 sps:$4 sm:$0xff]  }
 0x240   :  { %5567 = vmatprep.subr.bf16.mxu1 %v8410_v55  ;;  %v8452_v55 = vld [vmem:[#allocation2 + $0x72c] ss:$16 sps:$4 sm:$0xff]  }
 0x242   :  { %5525 = vmatpush1.bf16.msra.mxu0 %v8405_v59  ;;  %v8447_v59 = vld [vmem:[#allocation2 + $0x528] ss:$16 sps:$4 sm:$0xff]  }
 0x243   :  { %5568 = vmatpush1.bf16.msra.mxu1 %v8408_v42  ;;  %5526 = vmatprep.subr.bf16.mxu0 %v8413_v45  ;;  %v8450_v42 = vld [vmem:[#allocation2 + $0x728] ss:$16 sps:$4 sm:$0xff]   ;;  %v8455_v45 = vld [vmem:[#allocation2 + $0x50c] ss:$16 sps:$4 sm:$0xff]  }
 0x244   :  { %5569 = vmatprep.subr.bf16.mxu1 %v8416_v31  ;;  %v8458_v31 = vld [vmem:[#allocation2 + $0x70c] ss:$16 sps:$4 sm:$0xff]  }
 0x246   :  { %5527 = vmatpush2.bf16.msra.mxu0 %v8411_v36  ;;  %v8453_v36 = vld [vmem:[#allocation2 + $0x508] ss:$16 sps:$4 sm:$0xff]  }
 0x247   :  { %5570 = vmatpush2.bf16.msra.mxu1 %v8414_v62  ;;  %5528 = vmatprep.subr.bf16.mxu0 %v8419_v0  ;;  %v8456_v62 = vld [vmem:[#allocation2 + $0x708] ss:$16 sps:$4 sm:$0xff]   ;;  %v8461_v0 = vld [vmem:[#allocation2 + $0x8ec] ss:$16 sps:$4 sm:$0xff]  }
 0x248   :  { %5571 = vmatprep.subr.bf16.mxu1 %v8422_v8  ;;  %v8464_v8 = vld [vmem:[#allocation2 + $0xaec] ss:$16 sps:$4 sm:$0xff]  }
 0x24a   :  { %5529 = vmatpush2.bf16.msra.mxu0 %v8417_v9  ;;  %v8459_v9 = vld [vmem:[#allocation2 + $0x8e8] ss:$16 sps:$4 sm:$0xff]  }
 0x24b   :  { %5572 = vmatpush2.bf16.msra.mxu1 %v8420_v6  ;;  %5530 = vmatprep.subr.bf16.mxu0 %v8425_v52  ;;  %v8462_v6 = vld [vmem:[#allocation2 + $0xae8] ss:$16 sps:$4 sm:$0xff]   ;;  %v9509_v52 = vpop.f32.mrf.mxu0 }
 0x24c   :  { %5573 = vmatprep.subr.bf16.mxu1 %v8428_v1  ;;  %v9511_v1 = vpop.f32.mrf.mxu1 }
 0x24e   :  { %5531 = vmatpush2.bf16.msra.mxu0 %v8423_v3  ;;  %v8467_v3 = vld [vmem:[#allocation2 + $0x8cc] ss:$16 sps:$4 sm:$0xff]  }
 0x24f   :  { %5574 = vmatpush2.bf16.msra.mxu1 %v8426_v7  ;;  %5532 = vmatprep.subr.bf16.mxu0 %v8431_v41  ;;  %v8470_v7 = vld [vmem:[#allocation2 + $0xacc] ss:$16 sps:$4 sm:$0xff]   ;;  %v8465_v41 = vld [vmem:[#allocation2 + $0x8c8] ss:$16 sps:$4 sm:$0xff]  }
 0x250   :  { %5575 = vmatprep.subr.bf16.mxu1 %v8434_v43  ;;  %v8468_v43 = vld [vmem:[#allocation2 + $0xac8] ss:$16 sps:$4 sm:$0xff]  }
 0x252   :  { %5533 = vmatpush2.bf16.msra.mxu0 %v8429_v13 }
 0x253   :  { %5576 = vmatpush2.bf16.msra.mxu1 %v8432_v18  ;;  %5534 = vmatprep.subr.bf16.mxu0 %v8437_v4 }
 0x254   :  { %5577 = vmatprep.subr.bf16.mxu1 %v8440_v19 }
 0x256   :  { %5535 = vmatpush2.bf16.msra.mxu0 %v8435_v44 }
 0x257   :  { %5578 = vmatpush2.bf16.msra.mxu1 %v8438_v25  ;;  %5536 = vmatprep.subr.bf16.mxu0 %v8443_v51  ;;  %v8473_v25 = vld [vmem:[#allocation2 + $0x8ac] ss:$16 sps:$4 sm:$0xff]  }
 0x258   :  { %5579 = vmatprep.subr.bf16.mxu1 %v8446_v32  ;;  %v8476_v51 = vld [vmem:[#allocation2 + $0xaac] ss:$16 sps:$4 sm:$0xff]  }
 0x25a   :  { %5537 = vmatpush2.bf16.msra.mxu0 %v8441_v16  ;;  %v8474_v16 = vld [vmem:[#allocation2 + $0xaa8] ss:$16 sps:$4 sm:$0xff]  }
 0x25b   :  { %5580 = vmatpush2.bf16.msra.mxu1 %v8444_v38  ;;  %5538 = vmatprep.subr.bf16.mxu0 %v8449_v53  ;;  %v8479_v53 = vld [vmem:[#allocation2 + $0x88c] ss:$16 sps:$4 sm:$0xff]  }
 0x25c   :  { %5581 = vmatprep.subr.bf16.mxu1 %v8452_v55  ;;  %v8482_v55 = vld [vmem:[#allocation2 + $0xa8c] ss:$16 sps:$4 sm:$0xff]  }
 0x25e   :  { %5539 = vmatpush2.bf16.msra.mxu0 %v8447_v59 }
 0x25f   :  { %5582 = vmatpush2.bf16.msra.mxu1 %v8450_v42  ;;  %5540 = vmatprep.subr.bf16.mxu0 %v8455_v45  ;;  %v8477_v42 = vld [vmem:[#allocation2 + $0x888] ss:$16 sps:$4 sm:$0xff]   ;;  %v8488_v45 = vld [vmem:[#allocation2 + $0xa6c] ss:$16 sps:$4 sm:$0xff]  }
 0x260   :  { %5583 = vmatprep.subr.bf16.mxu1 %v8458_v31  ;;  %v8486_v31 = vld [vmem:[#allocation2 + $0xa68] ss:$16 sps:$4 sm:$0xff]  }
 0x262   :  { %5541 = vmatpush2.bf16.msra.mxu0 %v8453_v36  ;;  %v8491_v36 = vld [vmem:[#allocation2 + $0x84c] ss:$16 sps:$4 sm:$0xff]  }
 0x263   :  { %5584 = vmatpush2.bf16.msra.mxu1 %v8456_v62  ;;  %5596 = vmatprep.subr.bf16.mxu0 %v8461_v0  ;;  %v8494_v62 = vld [vmem:[#allocation2 + $0xa4c] ss:$16 sps:$4 sm:$0xff]   ;;  %v8489_v0 = vld [vmem:[#allocation2 + $0x848] ss:$16 sps:$4 sm:$0xff]  }
 0x264   :  { %5639 = vmatprep.subr.bf16.mxu1 %v8464_v8  ;;  %v8492_v8 = vld [vmem:[#allocation2 + $0xa48] ss:$16 sps:$4 sm:$0xff]  }
 0x265   :  { %v5286_v13 = vpop.f32.mrf.mxu0  ;;  %5543 = vmatmul.mubr.bf16.vlgmr.msra.gmra.mxu0 %v9280_v20 }
 0x266   :  { %v5329_v18 = vpop.f32.mrf.mxu1  ;;  %5586 = vmatmul.mubr.bf16.vlgmr.msra.gmra.mxu1 %v9284_v21  ;;  %v5287_v4 = vadd.f32 %v5286_v13, %v9502_v56  ;;  %5597 = vmatpush1.bf16.msra.mxu0 %v8459_v9  ;;  %v8471_v56 = vld [vmem:[#allocation2 + $0x8a8] ss:$16 sps:$4 sm:$0xff]   ;;  %v8497_v9 = vld [vmem:[#allocation2 + $0x82c] ss:$16 sps:$4 sm:$0xff]  }
 0x267   :  { %5640 = vmatpush1.bf16.msra.mxu1 %v8462_v6  ;;  %v9516_v19 = vpop.f32.mrf.mxu0  ;;  %5598 = vmatprep.subr.bf16.mxu0 %v8467_v3  ;;  %v8500_v6 = vld [vmem:[#allocation2 + $0xa2c] ss:$16 sps:$4 sm:$0xff]   ;;  %v8495_v3 = vld [vmem:[#allocation2 + $0x828] ss:$16 sps:$4 sm:$0xff]  }
 0x268   :  { %v9518_v44 = vpop.f32.mrf.mxu1  ;;  %5641 = vmatprep.subr.bf16.mxu1 %v8470_v7  ;;  %v9520_v32 = vadd.f32 %v5329_v18, %v5287_v4  ;;  %5628 = vmatprep.mubr.bf16.mxu0 %v9310_v33  ;;  %v8480_v33 = vld [vmem:[#allocation2 + $0xa88] ss:$16 sps:$4 sm:$0xff]   ;;  %v8509_v4 = vld [vmem:[#allocation2 + $0x9ec] ss:$16 sps:$4 sm:$0xff]  }
 0x269   :  { %5671 = vmatprep.mubr.bf16.mxu1 %v9314_v35  ;;  %v5290_v20 = vpop.f32.mrf.mxu0  ;;  %v8485_v35 = vld [vmem:[#allocation2 + $0x86c] ss:$16 sps:$4 sm:$0xff]   ;;  %v8498_v7 = vld [vmem:[#allocation2 + $0xa28] ss:$16 sps:$4 sm:$0xff]  }
 0x26a   :  { %v5291_v21 = vadd.f32 %v5290_v20, %v9507_v2  ;;  %5599 = vmatpush1.bf16.msra.mxu0 %v8465_v41  ;;  %v5333_v38 = vpop.f32.mrf.mxu1  ;;  %v8483_v2 = vld [vmem:[#allocation2 + $0x868] ss:$16 sps:$4 sm:$0xff]   ;;  %v8503_v41 = vld [vmem:[#allocation2 + $0x80c] ss:$16 sps:$4 sm:$0xff]  }
 0x26b   :  { %5642 = vmatpush1.bf16.msra.mxu1 %v8468_v43  ;;  %5600 = vmatprep.subr.bf16.mxu0 %v8473_v25  ;;  %v8506_v43 = vld [vmem:[#allocation2 + $0xa0c] ss:$16 sps:$4 sm:$0xff]   ;;  %v8501_v13 = vld [vmem:[#allocation2 + $0x808] ss:$16 sps:$4 sm:$0xff]  }
 0x26c   :  { %5643 = vmatprep.subr.bf16.mxu1 %v8476_v51  ;;  %v9525_v59 = vadd.f32 %v5333_v38, %v5291_v21  ;;  %v8504_v18 = vld [vmem:[#allocation2 + $0xa08] ss:$16 sps:$4 sm:$0xff]   ;;  %v8512_v25 = vld [vmem:[#allocation2 + $0xbec] ss:$16 sps:$4 sm:$0xff]  }
 0x26d   :  { %v8507_v51 = vld [vmem:[#allocation2 + $0x9e8] ss:$16 sps:$4 sm:$0xff]   ;;  %v8515_v21 = vld [vmem:[#allocation2 + $0x9cc] ss:$16 sps:$4 sm:$0xff]  }
 0x26e   :  { %5601 = vmatpush1.bf16.msra.mxu0 %v8471_v56  ;;  %v8510_v20 = vld [vmem:[#allocation2 + $0xbe8] ss:$16 sps:$4 sm:$0xff]   ;;  %v8518_v56 = vld [vmem:[#allocation2 + $0xbcc] ss:$16 sps:$4 sm:$0xff]  }
 0x26f   :  { %5644 = vmatpush1.bf16.msra.mxu1 %v8474_v16  ;;  %5602 = vmatprep.subr.bf16.mxu0 %v8479_v53  ;;  %v8513_v16 = vld [vmem:[#allocation2 + $0x9c8] ss:$16 sps:$4 sm:$0xff]   ;;  %v8521_v53 = vld [vmem:[#allocation2 + $0x9ac] ss:$16 sps:$4 sm:$0xff]  }
 0x270   :  { %5645 = vmatprep.subr.bf16.mxu1 %v8482_v55  ;;  %v8516_v38 = vld [vmem:[#allocation2 + $0xbc8] ss:$16 sps:$4 sm:$0xff]   ;;  %v8524_v55 = vld [vmem:[#allocation2 + $0xbac] ss:$16 sps:$4 sm:$0xff]  }
 0x272   :  { %5603 = vmatpush1.bf16.msra.mxu0 %v8477_v42  ;;  %v8519_v42 = vld [vmem:[#allocation2 + $0x9a8] ss:$16 sps:$4 sm:$0xff]  }
 0x273   :  { %5646 = vmatpush1.bf16.msra.mxu1 %v8480_v33  ;;  %5604 = vmatprep.subr.bf16.mxu0 %v8485_v35  ;;  %v8522_v33 = vld [vmem:[#allocation2 + $0xba8] ss:$16 sps:$4 sm:$0xff]   ;;  %v8527_v35 = vld [vmem:[#allocation2 + $0x98c] ss:$16 sps:$4 sm:$0xff]  }
 0x274   :  { %5647 = vmatprep.subr.bf16.mxu1 %v8488_v45  ;;  %v8530_v45 = vld [vmem:[#allocation2 + $0xb8c] ss:$16 sps:$4 sm:$0xff]  }
 0x276   :  { %5605 = vmatpush1.bf16.msra.mxu0 %v8483_v2  ;;  %v8525_v2 = vld [vmem:[#allocation2 + $0x988] ss:$16 sps:$4 sm:$0xff]  }
 0x277   :  { %5648 = vmatpush1.bf16.msra.mxu1 %v8486_v31  ;;  %5606 = vmatprep.subr.bf16.mxu0 %v8491_v36  ;;  %v8528_v31 = vld [vmem:[#allocation2 + $0xb88] ss:$16 sps:$4 sm:$0xff]   ;;  %v8533_v36 = vld [vmem:[#allocation2 + $0x96c] ss:$16 sps:$4 sm:$0xff]  }
 0x278   :  { %5649 = vmatprep.subr.bf16.mxu1 %v8494_v62  ;;  %v8536_v62 = vld [vmem:[#allocation2 + $0xb6c] ss:$16 sps:$4 sm:$0xff]  }
 0x27a   :  { %5607 = vmatpush1.bf16.msra.mxu0 %v8489_v0  ;;  %v8531_v0 = vld [vmem:[#allocation2 + $0x968] ss:$16 sps:$4 sm:$0xff]  }
 0x27b   :  { %5650 = vmatpush1.bf16.msra.mxu1 %v8492_v8  ;;  %5608 = vmatprep.subr.bf16.mxu0 %v8497_v9  ;;  %v8534_v8 = vld [vmem:[#allocation2 + $0xb68] ss:$16 sps:$4 sm:$0xff]   ;;  %v8539_v9 = vld [vmem:[#allocation2 + $0x94c] ss:$16 sps:$4 sm:$0xff]  }
 0x27c   :  { %5651 = vmatprep.subr.bf16.mxu1 %v8500_v6  ;;  %v8542_v6 = vld [vmem:[#allocation2 + $0xb4c] ss:$16 sps:$4 sm:$0xff]  }
 0x27e   :  { %5609 = vmatpush1.bf16.msra.mxu0 %v8495_v3  ;;  %v8537_v3 = vld [vmem:[#allocation2 + $0x948] ss:$16 sps:$4 sm:$0xff]  }
 0x27f   :  { %5652 = vmatpush1.bf16.msra.mxu1 %v8498_v7  ;;  %5610 = vmatprep.subr.bf16.mxu0 %v8503_v41  ;;  %v8540_v7 = vld [vmem:[#allocation2 + $0xb48] ss:$16 sps:$4 sm:$0xff]   ;;  %v8545_v41 = vld [vmem:[#allocation2 + $0x92c] ss:$16 sps:$4 sm:$0xff]  }
 0x280   :  { %5653 = vmatprep.subr.bf16.mxu1 %v8506_v43  ;;  %v8548_v43 = vld [vmem:[#allocation2 + $0xb2c] ss:$16 sps:$4 sm:$0xff]  }
 0x282   :  { %5611 = vmatpush1.bf16.msra.mxu0 %v8501_v13  ;;  %v8543_v13 = vld [vmem:[#allocation2 + $0x928] ss:$16 sps:$4 sm:$0xff]  }
 0x283   :  { %5654 = vmatpush1.bf16.msra.mxu1 %v8504_v18  ;;  %5612 = vmatprep.subr.bf16.mxu0 %v8509_v4  ;;  %v8546_v18 = vld [vmem:[#allocation2 + $0xb28] ss:$16 sps:$4 sm:$0xff]   ;;  %v8551_v4 = vld [vmem:[#allocation2 + $0x90c] ss:$16 sps:$4 sm:$0xff]  }
 0x284   :  { %5655 = vmatprep.subr.bf16.mxu1 %v8512_v25  ;;  %v8554_v25 = vld [vmem:[#allocation2 + $0xb0c] ss:$16 sps:$4 sm:$0xff]  }
 0x286   :  { %5613 = vmatpush2.bf16.msra.mxu0 %v8507_v51  ;;  %v8549_v51 = vld [vmem:[#allocation2 + $0x908] ss:$16 sps:$4 sm:$0xff]  }
 0x287   :  { %5656 = vmatpush2.bf16.msra.mxu1 %v8510_v20  ;;  %5614 = vmatprep.subr.bf16.mxu0 %v8515_v21  ;;  %v8552_v20 = vld [vmem:[#allocation2 + $0xb08] ss:$16 sps:$4 sm:$0xff]   ;;  %v8557_v21 = vld [vmem:[#allocation2 + $0xcec] ss:$16 sps:$4 sm:$0xff]  }
 0x288   :  { %5657 = vmatprep.subr.bf16.mxu1 %v8518_v56  ;;  %v8560_v56 = vld [vmem:[#allocation2 + $0xeec] ss:$16 sps:$4 sm:$0xff]  }
 0x28a   :  { %5615 = vmatpush2.bf16.msra.mxu0 %v8513_v16  ;;  %v8555_v16 = vld [vmem:[#allocation2 + $0xce8] ss:$16 sps:$4 sm:$0xff]  }
 0x28b   :  { %5658 = vmatpush2.bf16.msra.mxu1 %v8516_v38  ;;  %5616 = vmatprep.subr.bf16.mxu0 %v8521_v53  ;;  %v8558_v38 = vld [vmem:[#allocation2 + $0xee8] ss:$16 sps:$4 sm:$0xff]   ;;  %v9527_v53 = vpop.f32.mrf.mxu0 }
 0x28c   :  { %5659 = vmatprep.subr.bf16.mxu1 %v8524_v55  ;;  %v9529_v55 = vpop.f32.mrf.mxu1 }
 0x28e   :  { %5617 = vmatpush2.bf16.msra.mxu0 %v8519_v42  ;;  %v8563_v42 = vld [vmem:[#allocation2 + $0xccc] ss:$16 sps:$4 sm:$0xff]  }
 0x28f   :  { %5660 = vmatpush2.bf16.msra.mxu1 %v8522_v33  ;;  %5618 = vmatprep.subr.bf16.mxu0 %v8527_v35  ;;  %v8566_v33 = vld [vmem:[#allocation2 + $0xecc] ss:$16 sps:$4 sm:$0xff]  }
 0x290   :  { %5661 = vmatprep.subr.bf16.mxu1 %v8530_v45 }
 0x292   :  { %5619 = vmatpush2.bf16.msra.mxu0 %v8525_v2 }
 0x293   :  { %5662 = vmatpush2.bf16.msra.mxu1 %v8528_v31  ;;  %5620 = vmatprep.subr.bf16.mxu0 %v8533_v36  ;;  %v8561_v31 = vld [vmem:[#allocation2 + $0xcc8] ss:$16 sps:$4 sm:$0xff]  }
 0x294   :  { %5663 = vmatprep.subr.bf16.mxu1 %v8536_v62  ;;  %v8564_v36 = vld [vmem:[#allocation2 + $0xec8] ss:$16 sps:$4 sm:$0xff]  }
 0x296   :  { %5621 = vmatpush2.bf16.msra.mxu0 %v8531_v0 }
 0x297   :  { %5664 = vmatpush2.bf16.msra.mxu1 %v8534_v8  ;;  %5622 = vmatprep.subr.bf16.mxu0 %v8539_v9  ;;  %v8569_v8 = vld [vmem:[#allocation2 + $0xcac] ss:$16 sps:$4 sm:$0xff]  }
 0x298   :  { %5665 = vmatprep.subr.bf16.mxu1 %v8542_v6  ;;  %v8572_v9 = vld [vmem:[#allocation2 + $0xeac] ss:$16 sps:$4 sm:$0xff]  }
 0x29a   :  { %5623 = vmatpush2.bf16.msra.mxu0 %v8537_v3  ;;  %v8570_v3 = vld [vmem:[#allocation2 + $0xea8] ss:$16 sps:$4 sm:$0xff]  }
 0x29b   :  { %5666 = vmatpush2.bf16.msra.mxu1 %v8540_v7  ;;  %5624 = vmatprep.subr.bf16.mxu0 %v8545_v41  ;;  %v8575_v41 = vld [vmem:[#allocation2 + $0xc8c] ss:$16 sps:$4 sm:$0xff]  }
 0x29c   :  { %5667 = vmatprep.subr.bf16.mxu1 %v8548_v43  ;;  %v8578_v43 = vld [vmem:[#allocation2 + $0xe8c] ss:$16 sps:$4 sm:$0xff]  }
 0x29e   :  { %5625 = vmatpush2.bf16.msra.mxu0 %v8543_v13 }
 0x29f   :  { %5668 = vmatpush2.bf16.msra.mxu1 %v8546_v18  ;;  %5626 = vmatprep.subr.bf16.mxu0 %v8551_v4 }
 0x2a0   :  { %5669 = vmatprep.subr.bf16.mxu1 %v8554_v25  ;;  %v8576_v25 = vld [vmem:[#allocation2 + $0xe88] ss:$16 sps:$4 sm:$0xff]  }
 0x2a2   :  { %5627 = vmatpush2.bf16.msra.mxu0 %v8549_v51 }
 0x2a3   :  { %5670 = vmatpush2.bf16.msra.mxu1 %v8552_v20  ;;  %5682 = vmatprep.subr.bf16.mxu0 %v8557_v21  ;;  %v8579_v20 = vld [vmem:[#allocation2 + $0xc68] ss:$16 sps:$4 sm:$0xff]  }
 0x2a4   :  { %5725 = vmatprep.subr.bf16.mxu1 %v8560_v56  ;;  %v8582_v21 = vld [vmem:[#allocation2 + $0xe68] ss:$16 sps:$4 sm:$0xff]   ;;  %v8587_v56 = vld [vmem:[#allocation2 + $0xc4c] ss:$16 sps:$4 sm:$0xff]  }
 0x2a5   :  { %v5372_v35 = vpop.f32.mrf.mxu0  ;;  %5629 = vmatmul.mubr.bf16.vlgmr.msra.gmra.mxu0 %v9335_v48 }
 0x2a6   :  { %v5415_v45 = vpop.f32.mrf.mxu1  ;;  %5672 = vmatmul.mubr.bf16.vlgmr.msra.gmra.mxu1 %v9339_v49  ;;  %v5373_v2 = vadd.f32 %v5372_v35, %v9520_v32  ;;  %5683 = vmatpush1.bf16.msra.mxu0 %v8555_v16  ;;  %v8567_v32 = vld [vmem:[#allocation2 + $0xca8] ss:$16 sps:$4 sm:$0xff]   ;;  %v8590_v16 = vld [vmem:[#allocation2 + $0xe4c] ss:$16 sps:$4 sm:$0xff]  }
 0x2a7   :  { %5726 = vmatpush1.bf16.msra.mxu1 %v8558_v38  ;;  %v9534_v62 = vpop.f32.mrf.mxu0  ;;  %5684 = vmatprep.subr.bf16.mxu0 %v8563_v42  ;;  %v8585_v38 = vld [vmem:[#allocation2 + $0xc48] ss:$16 sps:$4 sm:$0xff]   ;;  %v8596_v35 = vld [vmem:[#allocation2 + $0xe2c] ss:$16 sps:$4 sm:$0xff]  }
 0x2a8   :  { %v9536_v0 = vpop.f32.mrf.mxu1  ;;  %5727 = vmatprep.subr.bf16.mxu1 %v8566_v33  ;;  %v5416_v6 = vadd.f32 %v5415_v45, %v5373_v2  ;;  %5714 = vmatprep.mubr.bf16.mxu0 %v9348_v28  ;;  %v8573_v28 = vld [vmem:[#allocation2 + $0xc88] ss:$16 sps:$4 sm:$0xff]   ;;  %v8593_v33 = vld [vmem:[#allocation2 + $0xc2c] ss:$16 sps:$4 sm:$0xff]  }
 0x2a9   :  { %5757 = vmatprep.mubr.bf16.mxu1 %v9352_v29  ;;  %v5376_v48 = vpop.f32.mrf.mxu0  ;;  %v8581_v29 = vld [vmem:[#allocation2 + $0xc6c] ss:$16 sps:$4 sm:$0xff]   ;;  %v8588_v42 = vld [vmem:[#allocation2 + $0xe48] ss:$16 sps:$4 sm:$0xff]  }
 0x2aa   :  { %v5377_v49 = vadd.f32 %v5376_v48, %v9525_v59  ;;  %5685 = vmatpush1.bf16.msra.mxu0 %v8561_v31  ;;  %v5419_v7 = vpop.f32.mrf.mxu1  ;;  %v5940_v18 = vmax.f32 %v5416_v6, 0.0  ;;  %v8584_v59 = vld [vmem:[#allocation2 + $0xe6c] ss:$16 sps:$4 sm:$0xff]   ;;  %v8591_v45 = vld [vmem:[#allocation2 + $0xc28] ss:$16 sps:$4 sm:$0xff]  }
 0x2ab   :  { %5728 = vmatpush1.bf16.msra.mxu1 %v8564_v36  ;;  %5686 = vmatprep.subr.bf16.mxu0 %v8569_v8  ;;  %v8594_v2 = vld [vmem:[#allocation2 + $0xe28] ss:$16 sps:$4 sm:$0xff]   ;;  %v8599_v31 = vld [vmem:[#allocation2 + $0xc0c] ss:$16 sps:$4 sm:$0xff]  }
 0x2ac   :  { %5729 = vmatprep.subr.bf16.mxu1 %v8572_v9  ;;  %v5420_v13 = vadd.f32 %v5419_v7, %v5377_v49  ;;  %v8602_v36 = vld [vmem:[#allocation2 + $0xe0c] ss:$16 sps:$4 sm:$0xff]   ;;  %v8597_v8 = vld [vmem:[#allocation2 + $0xc08] ss:$16 sps:$4 sm:$0xff]  }
 0x2ad   :  { %v8600_v9 = vld [vmem:[#allocation2 + $0xe08] ss:$16 sps:$4 sm:$0xff]   ;;  %v8605_v6 = vld [vmem:[#allocation2 + $0xdec] ss:$16 sps:$4 sm:$0xff]  }
 0x2ae   :  { %v5944_v4 = vmax.f32 %v5420_v13, 0.0  ;;  %5687 = vmatpush1.bf16.msra.mxu0 %v8567_v32  ;;  %v8608_v48 = vld [vmem:[#allocation2 + $0xfec] ss:$16 sps:$4 sm:$0xff]   ;;  %v8603_v49 = vld [vmem:[#allocation2 + $0xde8] ss:$16 sps:$4 sm:$0xff]  }
 0x2af   :  { %5730 = vmatpush1.bf16.msra.mxu1 %v8570_v3  ;;  %5688 = vmatprep.subr.bf16.mxu0 %v8575_v41  ;;  %v8606_v32 = vld [vmem:[#allocation2 + $0xfe8] ss:$16 sps:$4 sm:$0xff]   ;;  %v8611_v3 = vld [vmem:[#allocation2 + $0xdcc] ss:$16 sps:$4 sm:$0xff]  }
 0x2b0   :  { %5731 = vmatprep.subr.bf16.mxu1 %v8578_v43  ;;  %v9541_v51 = vpack.c.bf16 %v5944_v4, %v5940_v18  ;;  %v8614_v7 = vld [vmem:[#allocation2 + $0xfcc] ss:$16 sps:$4 sm:$0xff]   ;;  %v8609_v41 = vld [vmem:[#allocation2 + $0xdc8] ss:$16 sps:$4 sm:$0xff]  }
 0x2b1   :  { %v8612_v43 = vld [vmem:[#allocation2 + $0xfc8] ss:$16 sps:$4 sm:$0xff]   ;;  %v8617_v13 = vld [vmem:[#allocation2 + $0xdac] ss:$16 sps:$4 sm:$0xff]  }
 0x2b2   :  { %5689 = vmatpush1.bf16.msra.mxu0 %v8573_v28  ;;  %v8620_v18 = vld [vmem:[#allocation2 + $0xfac] ss:$16 sps:$4 sm:$0xff]   ;;  %v8615_v4 = vld [vmem:[#allocation2 + $0xda8] ss:$16 sps:$4 sm:$0xff]  }
 0x2b3   :  { %5732 = vmatpush1.bf16.msra.mxu1 %v8576_v25  ;;  %5690 = vmatprep.subr.bf16.mxu0 %v8581_v29  ;;  %v8618_v28 = vld [vmem:[#allocation2 + $0xfa8] ss:$16 sps:$4 sm:$0xff]   ;;  %v8623_v25 = vld [vmem:[#allocation2 + $0xd8c] ss:$16 sps:$4 sm:$0xff]  }
 0x2b4   :  { %5733 = vmatprep.subr.bf16.mxu1 %v8584_v59  ;;  %v8626_v29 = vld [vmem:[#allocation2 + $0xf8c] ss:$16 sps:$4 sm:$0xff]   ;;  %v8621_v59 = vld [vmem:[#allocation2 + $0xd88] ss:$16 sps:$4 sm:$0xff]  }
 0x2b6   :  { %5691 = vmatpush1.bf16.msra.mxu0 %v8579_v20  ;;  %v8624_v20 = vld [vmem:[#allocation2 + $0xf88] ss:$16 sps:$4 sm:$0xff]  }
 0x2b7   :  { %5734 = vmatpush1.bf16.msra.mxu1 %v8582_v21  ;;  %5692 = vmatprep.subr.bf16.mxu0 %v8587_v56  ;;  %v8629_v21 = vld [vmem:[#allocation2 + $0xd6c] ss:$16 sps:$4 sm:$0xff]  }
 0x2b8   :  { %5735 = vmatprep.subr.bf16.mxu1 %v8590_v16  ;;  %v8632_v56 = vld [vmem:[#allocation2 + $0xf6c] ss:$16 sps:$4 sm:$0xff]   ;;  %v8627_v16 = vld [vmem:[#allocation2 + $0xd68] ss:$16 sps:$4 sm:$0xff]  }
 0x2ba   :  { %5693 = vmatpush1.bf16.msra.mxu0 %v8585_v38  ;;  %v8630_v38 = vld [vmem:[#allocation2 + $0xf68] ss:$16 sps:$4 sm:$0xff]  }
 0x2bb   :  { %5736 = vmatpush1.bf16.msra.mxu1 %v8588_v42  ;;  %5694 = vmatprep.subr.bf16.mxu0 %v8593_v33  ;;  %v8635_v42 = vld [vmem:[#allocation2 + $0xd4c] ss:$16 sps:$4 sm:$0xff]  }
 0x2bc   :  { %5737 = vmatprep.subr.bf16.mxu1 %v8596_v35  ;;  %v8638_v33 = vld [vmem:[#allocation2 + $0xf4c] ss:$16 sps:$4 sm:$0xff]   ;;  %v8633_v35 = vld [vmem:[#allocation2 + $0xd48] ss:$16 sps:$4 sm:$0xff]  }
 0x2be   :  { %5695 = vmatpush1.bf16.msra.mxu0 %v8591_v45  ;;  %v8636_v45 = vld [vmem:[#allocation2 + $0xf48] ss:$16 sps:$4 sm:$0xff]  }
 0x2bf   :  { %5738 = vmatpush1.bf16.msra.mxu1 %v8594_v2  ;;  %5696 = vmatprep.subr.bf16.mxu0 %v8599_v31  ;;  %v8641_v2 = vld [vmem:[#allocation2 + $0xd2c] ss:$16 sps:$4 sm:$0xff]  }
 0x2c0   :  { %5739 = vmatprep.subr.bf16.mxu1 %v8602_v36  ;;  %v8644_v31 = vld [vmem:[#allocation2 + $0xf2c] ss:$16 sps:$4 sm:$0xff]   ;;  %v8639_v36 = vld [vmem:[#allocation2 + $0xd28] ss:$16 sps:$4 sm:$0xff]  }
 0x2c2   :  { %5697 = vmatpush1.bf16.msra.mxu0 %v8597_v8  ;;  %v8642_v8 = vld [vmem:[#allocation2 + $0xf28] ss:$16 sps:$4 sm:$0xff]  }
 0x2c3   :  { %5740 = vmatpush1.bf16.msra.mxu1 %v8600_v9  ;;  %5698 = vmatprep.subr.bf16.mxu0 %v8605_v6  ;;  %v8647_v9 = vld [vmem:[#allocation2 + $0xd0c] ss:$16 sps:$4 sm:$0xff]  }
 0x2c4   :  { %5741 = vmatprep.subr.bf16.mxu1 %v8608_v48  ;;  %v8650_v6 = vld [vmem:[#allocation2 + $0xf0c] ss:$16 sps:$4 sm:$0xff]   ;;  %v8645_v48 = vld [vmem:[#allocation2 + $0xd08] ss:$16 sps:$4 sm:$0xff]  }
 0x2c6   :  { %5699 = vmatpush2.bf16.msra.mxu0 %v8603_v49  ;;  %v8648_v49 = vld [vmem:[#allocation2 + $0xf08] ss:$16 sps:$4 sm:$0xff]  }
 0x2c7   :  { %5742 = vmatpush2.bf16.msra.mxu1 %v8606_v32  ;;  %5700 = vmatprep.subr.bf16.mxu0 %v8611_v3  ;;  %v8653_v32 = vld [vmem:[#allocation2 + $0x10ec] ss:$16 sps:$4 sm:$0xff]  }
 0x2c8   :  { %5743 = vmatprep.subr.bf16.mxu1 %v8614_v7  ;;  %v8656_v3 = vld [vmem:[#allocation2 + $0x12ec] ss:$16 sps:$4 sm:$0xff]   ;;  %v8651_v7 = vld [vmem:[#allocation2 + $0x10e8] ss:$16 sps:$4 sm:$0xff]  }
 0x2ca   :  { %5701 = vmatpush2.bf16.msra.mxu0 %v8609_v41  ;;  %v8654_v41 = vld [vmem:[#allocation2 + $0x12e8] ss:$16 sps:$4 sm:$0xff]  }
 0x2cb   :  { %5744 = vmatpush2.bf16.msra.mxu1 %v8612_v43  ;;  %5702 = vmatprep.subr.bf16.mxu0 %v8617_v13  ;;  %v8659_v43 = vld [vmem:[#allocation2 + $0x10cc] ss:$16 sps:$4 sm:$0xff]  }
 0x2cc   :  { %5745 = vmatprep.subr.bf16.mxu1 %v8620_v18  ;;  %v8662_v13 = vld [vmem:[#allocation2 + $0x12cc] ss:$16 sps:$4 sm:$0xff]   ;;  %v8657_v18 = vld [vmem:[#allocation2 + $0x10c8] ss:$16 sps:$4 sm:$0xff]  }
 0x2ce   :  { %5703 = vmatpush2.bf16.msra.mxu0 %v8615_v4  ;;  %v8660_v4 = vld [vmem:[#allocation2 + $0x12c8] ss:$16 sps:$4 sm:$0xff]  }
 0x2cf   :  { %5746 = vmatpush2.bf16.msra.mxu1 %v8618_v28  ;;  %5704 = vmatprep.subr.bf16.mxu0 %v8623_v25  ;;  %v8665_v28 = vld [vmem:[#allocation2 + $0x10ac] ss:$16 sps:$4 sm:$0xff]  }
 0x2d0   :  { %5747 = vmatprep.subr.bf16.mxu1 %v8626_v29  ;;  %v8668_v25 = vld [vmem:[#allocation2 + $0x12ac] ss:$16 sps:$4 sm:$0xff]   ;;  %v8663_v29 = vld [vmem:[#allocation2 + $0x10a8] ss:$16 sps:$4 sm:$0xff]  }
 0x2d2   :  { %5705 = vmatpush2.bf16.msra.mxu0 %v8621_v59  ;;  %v8666_v59 = vld [vmem:[#allocation2 + $0x12a8] ss:$16 sps:$4 sm:$0xff]  }
 0x2d3   :  { %5748 = vmatpush2.bf16.msra.mxu1 %v8624_v20  ;;  %5706 = vmatprep.subr.bf16.mxu0 %v8629_v21  ;;  %v8669_v20 = vld [vmem:[#allocation2 + $0x1088] ss:$16 sps:$4 sm:$0xff]  }
 0x2d4   :  { %5749 = vmatprep.subr.bf16.mxu1 %v8632_v56  ;;  %v8672_v21 = vld [vmem:[#allocation2 + $0x1288] ss:$16 sps:$4 sm:$0xff]   ;;  %v8677_v56 = vld [vmem:[#allocation2 + $0x106c] ss:$16 sps:$4 sm:$0xff]  }
 0x2d6   :  { %5707 = vmatpush2.bf16.msra.mxu0 %v8627_v16  ;;  %v8680_v16 = vld [vmem:[#allocation2 + $0x126c] ss:$16 sps:$4 sm:$0xff]  }
 0x2d7   :  { %5750 = vmatpush2.bf16.msra.mxu1 %v8630_v38  ;;  %5708 = vmatprep.subr.bf16.mxu0 %v8635_v42  ;;  %v8683_v38 = vld [vmem:[#allocation2 + $0x104c] ss:$16 sps:$4 sm:$0xff]  }
 0x2d8   :  { %5751 = vmatprep.subr.bf16.mxu1 %v8638_v33  ;;  %v8686_v42 = vld [vmem:[#allocation2 + $0x124c] ss:$16 sps:$4 sm:$0xff]   ;;  %v8681_v33 = vld [vmem:[#allocation2 + $0x1048] ss:$16 sps:$4 sm:$0xff]  }
 0x2da   :  { %5709 = vmatpush2.bf16.msra.mxu0 %v8633_v35  ;;  %v8684_v35 = vld [vmem:[#allocation2 + $0x1248] ss:$16 sps:$4 sm:$0xff]  }
 0x2db   :  { %5752 = vmatpush2.bf16.msra.mxu1 %v8636_v45  ;;  %5710 = vmatprep.subr.bf16.mxu0 %v8641_v2  ;;  %v8689_v45 = vld [vmem:[#allocation2 + $0x102c] ss:$16 sps:$4 sm:$0xff]  }
 0x2dc   :  { %5753 = vmatprep.subr.bf16.mxu1 %v8644_v31  ;;  %v8692_v2 = vld [vmem:[#allocation2 + $0x122c] ss:$16 sps:$4 sm:$0xff]   ;;  %v8687_v31 = vld [vmem:[#allocation2 + $0x1028] ss:$16 sps:$4 sm:$0xff]  }
 0x2de   :  { %5711 = vmatpush2.bf16.msra.mxu0 %v8639_v36  ;;  %v8690_v36 = vld [vmem:[#allocation2 + $0x1228] ss:$16 sps:$4 sm:$0xff]  }
 0x2df   :  { %5754 = vmatpush2.bf16.msra.mxu1 %v8642_v8  ;;  %5712 = vmatprep.subr.bf16.mxu0 %v8647_v9  ;;  %v8695_v8 = vld [vmem:[#allocation2 + $0x100c] ss:$16 sps:$4 sm:$0xff]  }
 0x2e0   :  { %5755 = vmatprep.subr.bf16.mxu1 %v8650_v6  ;;  %v8698_v9 = vld [vmem:[#allocation2 + $0x120c] ss:$16 sps:$4 sm:$0xff]   ;;  %v8693_v6 = vld [vmem:[#allocation2 + $0x1008] ss:$16 sps:$4 sm:$0xff]  }
 0x2e2   :  { %5713 = vmatpush2.bf16.msra.mxu0 %v8645_v48  ;;  %v8696_v48 = vld [vmem:[#allocation2 + $0x1208] ss:$16 sps:$4 sm:$0xff]  }
 0x2e3   :  { %5756 = vmatpush2.bf16.msra.mxu1 %v8648_v49  ;;  %5768 = vmatprep.subr.bf16.mxu0 %v8653_v32  ;;  %v8701_v49 = vld [vmem:[#allocation2 + $0x11ec] ss:$16 sps:$4 sm:$0xff]  }
 0x2e4   :  { %5811 = vmatprep.subr.bf16.mxu1 %v8656_v3  ;;  %v8704_v32 = vld [vmem:[#allocation2 + $0x13ec] ss:$16 sps:$4 sm:$0xff]   ;;  %v8699_v3 = vld [vmem:[#allocation2 + $0x11e8] ss:$16 sps:$4 sm:$0xff]  }
 0x2e5   :  { %5715 = vmatmul.mubr.bf16.vlgmr.msra.gmra.mxu0 %v9378_v14  ;;  %v8671_v14 = vld [vmem:[#allocation2 + $0x108c] ss:$16 sps:$4 sm:$0xff]  }
 0x2e6   :  { %5758 = vmatmul.mubr.bf16.vlgmr.msra.gmra.mxu1 %v9382_v15  ;;  %5769 = vmatpush1.bf16.msra.mxu0 %v8651_v7  ;;  %v8674_v15 = vld [vmem:[#allocation2 + $0x128c] ss:$16 sps:$4 sm:$0xff]   ;;  %v8702_v7 = vld [vmem:[#allocation2 + $0x13e8] ss:$16 sps:$4 sm:$0xff]  }
 0x2e7   :  { %5812 = vmatpush1.bf16.msra.mxu1 %v8654_v41  ;;  %5770 = vmatprep.subr.bf16.mxu0 %v8659_v43  ;;  %v8707_v41 = vld [vmem:[#allocation2 + $0x11cc] ss:$16 sps:$4 sm:$0xff]  }
 0x2e8   :  { %5813 = vmatprep.subr.bf16.mxu1 %v8662_v13  ;;  %5800 = vmatprep.mubr.bf16.mxu0 %v9393_v46  ;;  %v8675_v46 = vld [vmem:[#allocation2 + $0x1068] ss:$16 sps:$4 sm:$0xff]   ;;  %v8710_v43 = vld [vmem:[#allocation2 + $0x13cc] ss:$16 sps:$4 sm:$0xff]  }
 0x2e9   :  { %5843 = vmatprep.mubr.bf16.mxu1 %v9397_v47  ;;  %v8678_v47 = vld [vmem:[#allocation2 + $0x1268] ss:$16 sps:$4 sm:$0xff]  }
 0x2ea   :  { %5771 = vmatpush1.bf16.msra.mxu0 %v8657_v18  ;;  %v8705_v13 = vld [vmem:[#allocation2 + $0x11c8] ss:$16 sps:$4 sm:$0xff]  }
 0x2eb   :  { %5814 = vmatpush1.bf16.msra.mxu1 %v8660_v4  ;;  %5772 = vmatprep.subr.bf16.mxu0 %v8665_v28  ;;  %v8708_v18 = vld [vmem:[#allocation2 + $0x13c8] ss:$16 sps:$4 sm:$0xff]   ;;  %v8713_v4 = vld [vmem:[#allocation2 + $0x11ac] ss:$16 sps:$4 sm:$0xff]  }
 0x2ec   :  { %5815 = vmatprep.subr.bf16.mxu1 %v8668_v25  ;;  %v8716_v28 = vld [vmem:[#allocation2 + $0x13ac] ss:$16 sps:$4 sm:$0xff]   ;;  %v8711_v25 = vld [vmem:[#allocation2 + $0x11a8] ss:$16 sps:$4 sm:$0xff]  }
 0x2ee   :  { %5773 = vmatpush1.bf16.msra.mxu0 %v8663_v29  ;;  %v8714_v29 = vld [vmem:[#allocation2 + $0x13a8] ss:$16 sps:$4 sm:$0xff]  }
 0x2ef   :  { %5816 = vmatpush1.bf16.msra.mxu1 %v8666_v59  ;;  %5774 = vmatprep.subr.bf16.mxu0 %v8671_v14  ;;  %v8719_v59 = vld [vmem:[#allocation2 + $0x118c] ss:$16 sps:$4 sm:$0xff]  }
 0x2f0   :  { %5817 = vmatprep.subr.bf16.mxu1 %v8674_v15  ;;  %v8722_v14 = vld [vmem:[#allocation2 + $0x138c] ss:$16 sps:$4 sm:$0xff]   ;;  %v8717_v15 = vld [vmem:[#allocation2 + $0x1188] ss:$16 sps:$4 sm:$0xff]  }
 0x2f2   :  { %5775 = vmatpush1.bf16.msra.mxu0 %v8669_v20  ;;  %v8720_v20 = vld [vmem:[#allocation2 + $0x1388] ss:$16 sps:$4 sm:$0xff]  }
 0x2f3   :  { %5818 = vmatpush1.bf16.msra.mxu1 %v8672_v21  ;;  %5776 = vmatprep.subr.bf16.mxu0 %v8677_v56  ;;  %v8725_v21 = vld [vmem:[#allocation2 + $0x116c] ss:$16 sps:$4 sm:$0xff]  }
 0x2f4   :  { %5819 = vmatprep.subr.bf16.mxu1 %v8680_v16  ;;  %v8728_v56 = vld [vmem:[#allocation2 + $0x136c] ss:$16 sps:$4 sm:$0xff]   ;;  %v8723_v16 = vld [vmem:[#allocation2 + $0x1168] ss:$16 sps:$4 sm:$0xff]  }
 0x2f6   :  { %5777 = vmatpush1.bf16.msra.mxu0 %v8675_v46  ;;  %v8726_v46 = vld [vmem:[#allocation2 + $0x1368] ss:$16 sps:$4 sm:$0xff]  }
 0x2f7   :  { %5820 = vmatpush1.bf16.msra.mxu1 %v8678_v47  ;;  %5778 = vmatprep.subr.bf16.mxu0 %v8683_v38  ;;  %v8731_v47 = vld [vmem:[#allocation2 + $0x114c] ss:$16 sps:$4 sm:$0xff]  }
 0x2f8   :  { %5821 = vmatprep.subr.bf16.mxu1 %v8686_v42  ;;  %v8734_v38 = vld [vmem:[#allocation2 + $0x134c] ss:$16 sps:$4 sm:$0xff]   ;;  %v8729_v42 = vld [vmem:[#allocation2 + $0x1148] ss:$16 sps:$4 sm:$0xff]  }
 0x2fa   :  { %5779 = vmatpush1.bf16.msra.mxu0 %v8681_v33  ;;  %v8732_v33 = vld [vmem:[#allocation2 + $0x1348] ss:$16 sps:$4 sm:$0xff]  }
 0x2fb   :  { %5822 = vmatpush1.bf16.msra.mxu1 %v8684_v35  ;;  %5780 = vmatprep.subr.bf16.mxu0 %v8689_v45  ;;  %v8737_v35 = vld [vmem:[#allocation2 + $0x112c] ss:$16 sps:$4 sm:$0xff]  }
 0x2fc   :  { %5823 = vmatprep.subr.bf16.mxu1 %v8692_v2  ;;  %v8740_v45 = vld [vmem:[#allocation2 + $0x132c] ss:$16 sps:$4 sm:$0xff]   ;;  %v8735_v2 = vld [vmem:[#allocation2 + $0x1128] ss:$16 sps:$4 sm:$0xff]  }
 0x2fe   :  { %5781 = vmatpush1.bf16.msra.mxu0 %v8687_v31  ;;  %v8738_v31 = vld [vmem:[#allocation2 + $0x1328] ss:$16 sps:$4 sm:$0xff]  }
 0x2ff   :  { %5824 = vmatpush1.bf16.msra.mxu1 %v8690_v36  ;;  %5782 = vmatprep.subr.bf16.mxu0 %v8695_v8  ;;  %v8743_v36 = vld [vmem:[#allocation2 + $0x110c] ss:$16 sps:$4 sm:$0xff]  }
 0x300   :  { %5825 = vmatprep.subr.bf16.mxu1 %v8698_v9  ;;  %v8746_v8 = vld [vmem:[#allocation2 + $0x130c] ss:$16 sps:$4 sm:$0xff]   ;;  %v8741_v9 = vld [vmem:[#allocation2 + $0x1108] ss:$16 sps:$4 sm:$0xff]  }
 0x302   :  { %5783 = vmatpush1.bf16.msra.mxu0 %v8693_v6  ;;  %v8744_v6 = vld [vmem:[#allocation2 + $0x1308] ss:$16 sps:$4 sm:$0xff]  }
 0x303   :  { %5826 = vmatpush1.bf16.msra.mxu1 %v8696_v48  ;;  %5784 = vmatprep.subr.bf16.mxu0 %v8701_v49  ;;  %v8749_v48 = vld [vmem:[#allocation2 + $0x14ec] ss:$16 sps:$4 sm:$0xff]  }
 0x304   :  { %5827 = vmatprep.subr.bf16.mxu1 %v8704_v32  ;;  %v8752_v49 = vld [vmem:[#allocation2 + $0x16ec] ss:$16 sps:$4 sm:$0xff]   ;;  %v8747_v32 = vld [vmem:[#allocation2 + $0x14e8] ss:$16 sps:$4 sm:$0xff]  }
 0x306   :  { %5785 = vmatpush2.bf16.msra.mxu0 %v8699_v3  ;;  %v8750_v3 = vld [vmem:[#allocation2 + $0x16e8] ss:$16 sps:$4 sm:$0xff]  }
 0x307   :  { %5828 = vmatpush2.bf16.msra.mxu1 %v8702_v7  ;;  %5786 = vmatprep.subr.bf16.mxu0 %v8707_v41  ;;  %v8755_v7 = vld [vmem:[#allocation2 + $0x14cc] ss:$16 sps:$4 sm:$0xff]  }
 0x308   :  { %5829 = vmatprep.subr.bf16.mxu1 %v8710_v43  ;;  %v8758_v41 = vld [vmem:[#allocation2 + $0x16cc] ss:$16 sps:$4 sm:$0xff]   ;;  %v8753_v43 = vld [vmem:[#allocation2 + $0x14c8] ss:$16 sps:$4 sm:$0xff]  }
 0x30a   :  { %5787 = vmatpush2.bf16.msra.mxu0 %v8705_v13  ;;  %v8756_v13 = vld [vmem:[#allocation2 + $0x16c8] ss:$16 sps:$4 sm:$0xff]  }
 0x30b   :  { %5830 = vmatpush2.bf16.msra.mxu1 %v8708_v18  ;;  %5788 = vmatprep.subr.bf16.mxu0 %v8713_v4  ;;  %v8761_v18 = vld [vmem:[#allocation2 + $0x14ac] ss:$16 sps:$4 sm:$0xff]  }
 0x30c   :  { %5831 = vmatprep.subr.bf16.mxu1 %v8716_v28  ;;  %v8764_v4 = vld [vmem:[#allocation2 + $0x16ac] ss:$16 sps:$4 sm:$0xff]   ;;  %v8759_v28 = vld [vmem:[#allocation2 + $0x14a8] ss:$16 sps:$4 sm:$0xff]  }
 0x30e   :  { %5789 = vmatpush2.bf16.msra.mxu0 %v8711_v25  ;;  %v8762_v25 = vld [vmem:[#allocation2 + $0x16a8] ss:$16 sps:$4 sm:$0xff]  }
 0x30f   :  { %5832 = vmatpush2.bf16.msra.mxu1 %v8714_v29  ;;  %5790 = vmatprep.subr.bf16.mxu0 %v8719_v59  ;;  %v8765_v29 = vld [vmem:[#allocation2 + $0x1488] ss:$16 sps:$4 sm:$0xff]  }
 0x310   :  { %5833 = vmatprep.subr.bf16.mxu1 %v8722_v14  ;;  %v8768_v59 = vld [vmem:[#allocation2 + $0x1688] ss:$16 sps:$4 sm:$0xff]   ;;  %v8773_v14 = vld [vmem:[#allocation2 + $0x146c] ss:$16 sps:$4 sm:$0xff]  }
 0x312   :  { %5791 = vmatpush2.bf16.msra.mxu0 %v8717_v15  ;;  %v8776_v15 = vld [vmem:[#allocation2 + $0x166c] ss:$16 sps:$4 sm:$0xff]  }
 0x313   :  { %5834 = vmatpush2.bf16.msra.mxu1 %v8720_v20  ;;  %5792 = vmatprep.subr.bf16.mxu0 %v8725_v21  ;;  %v8779_v20 = vld [vmem:[#allocation2 + $0x144c] ss:$16 sps:$4 sm:$0xff]  }
 0x314   :  { %5835 = vmatprep.subr.bf16.mxu1 %v8728_v56  ;;  %v8782_v21 = vld [vmem:[#allocation2 + $0x164c] ss:$16 sps:$4 sm:$0xff]   ;;  %v934_v56 = vsub.s32 1, %v9358_v63 }
 0x316   :  { %5793 = vmatpush2.bf16.msra.mxu0 %v8723_v16  ;;  %v8777_v16 = vld [vmem:[#allocation2 + $0x1448] ss:$16 sps:$4 sm:$0xff]  }
 0x317   :  { %5836 = vmatpush2.bf16.msra.mxu1 %v8726_v46  ;;  %5794 = vmatprep.subr.bf16.mxu0 %v8731_v47  ;;  %v8780_v46 = vld [vmem:[#allocation2 + $0x1648] ss:$16 sps:$4 sm:$0xff]   ;;  %v8785_v47 = vld [vmem:[#allocation2 + $0x142c] ss:$16 sps:$4 sm:$0xff]  }
 0x318   :  { %5837 = vmatprep.subr.bf16.mxu1 %v8734_v38  ;;  %v8788_v38 = vld [vmem:[#allocation2 + $0x162c] ss:$16 sps:$4 sm:$0xff]  }
 0x31a   :  { %5795 = vmatpush2.bf16.msra.mxu0 %v8729_v42  ;;  %v9552_v42 = vld [vmem:[#allocation4] sm:$0xf] }
 0x31b   :  { %5838 = vmatpush2.bf16.msra.mxu1 %v8732_v33  ;;  %5796 = vmatprep.subr.bf16.mxu0 %v8737_v35  ;;  %v935_v33 = vrot.slane %v9552_v42, %v934_v56 }
 0x31c   :  { %5839 = vmatprep.subr.bf16.mxu1 %v8740_v45  ;;  %v8783_v45 = vld [vmem:[#allocation2 + $0x1428] ss:$16 sps:$4 sm:$0xff]  }
 0x31d   :  { %v4949_v35 = vadd.f32 %v9439_v23, %v935_v33  ;;  %v8800_v23 = vld [vmem:[#allocation2 + $0x17ec] ss:$16 sps:$4 sm:$0xff]  }
 0x31e   :  { %5797 = vmatpush2.bf16.msra.mxu0 %v8735_v2  ;;  %v8786_v2 = vld [vmem:[#allocation2 + $0x1628] ss:$16 sps:$4 sm:$0xff]  }
 0x31f   :  { %5840 = vmatpush2.bf16.msra.mxu1 %v8738_v31  ;;  %5798 = vmatprep.subr.bf16.mxu0 %v8743_v36  ;;  %v8791_v31 = vld [vmem:[#allocation2 + $0x140c] ss:$16 sps:$4 sm:$0xff]  }
 0x320   :  { %5841 = vmatprep.subr.bf16.mxu1 %v8746_v8  ;;  %v8794_v36 = vld [vmem:[#allocation2 + $0x160c] ss:$16 sps:$4 sm:$0xff]   ;;  %v4945_v8 = vadd.f32 %v9401_v26, %v935_v33  ;;  %v8798_v26 = vld [vmem:[#allocation2 + $0x17e8] ss:$16 sps:$4 sm:$0xff]  }
 0x321   :  { %v8828_v33 = vld [vmem:[#allocation2 + $0x1748] ss:$16 sps:$4 sm:$0xff]  }
 0x322   :  { %5799 = vmatpush2.bf16.msra.mxu0 %v8741_v9  ;;  %v4992_v9 = vadd.f32 %v9441_v24, %v4949_v35  ;;  %v8803_v24 = vld [vmem:[#allocation2 + $0x15cc] ss:$16 sps:$4 sm:$0xff]  }
 0x323   :  { %5842 = vmatpush2.bf16.msra.mxu1 %v8744_v6  ;;  %5854 = vmatprep.subr.bf16.mxu0 %v8749_v48  ;;  %v8789_v6 = vld [vmem:[#allocation2 + $0x1408] ss:$16 sps:$4 sm:$0xff]  }
 0x324   :  { %5897 = vmatprep.subr.bf16.mxu1 %v8752_v49  ;;  %v8792_v48 = vld [vmem:[#allocation2 + $0x1608] ss:$16 sps:$4 sm:$0xff]   ;;  %v8797_v49 = vld [vmem:[#allocation2 + $0x15ec] ss:$16 sps:$4 sm:$0xff]  }
 0x325   :  { %5801 = vmatmul.mubr.bf16.vlgmr.msra.gmra.mxu0 %v9433_v50  ;;  %v8767_v50 = vld [vmem:[#allocation2 + $0x148c] ss:$16 sps:$4 sm:$0xff]  }
 0x326   :  { %5844 = vmatmul.mubr.bf16.vlgmr.msra.gmra.mxu1 %v9437_v22  ;;  %5855 = vmatpush1.bf16.msra.mxu0 %v8747_v32  ;;  %v8770_v22 = vld [vmem:[#allocation2 + $0x168c] ss:$16 sps:$4 sm:$0xff]   ;;  %v4988_v32 = vadd.f32 %v9403_v27, %v4945_v8  ;;  %v8801_v27 = vld [vmem:[#allocation2 + $0x15c8] ss:$16 sps:$4 sm:$0xff]  }
 0x327   :  { %5898 = vmatpush1.bf16.msra.mxu1 %v8750_v3  ;;  %5856 = vmatprep.subr.bf16.mxu0 %v8755_v7  ;;  %v5035_v3 = vadd.f32 %v9473_v60, %v4992_v9  ;;  %v8804_v60 = vld [vmem:[#allocation2 + $0x17c8] ss:$16 sps:$4 sm:$0xff]   ;;  %v8842_v8 = vld [vmem:[#allocation2 + $0x170c] ss:$16 sps:$4 sm:$0xff]  }
 0x328   :  { %5899 = vmatprep.subr.bf16.mxu1 %v8758_v41  ;;  %5886 = vmatprep.mubr.bf16.mxu0 %v9445_v10  ;;  %v8771_v10 = vld [vmem:[#allocation2 + $0x1468] ss:$16 sps:$4 sm:$0xff]   ;;  %v5031_v7 = vadd.f32 %v9454_v39, %v4988_v32  ;;  %v8809_v39 = vld [vmem:[#allocation2 + $0x15ac] ss:$16 sps:$4 sm:$0xff]  }
 0x329   :  { %5929 = vmatprep.mubr.bf16.mxu1 %v9449_v12  ;;  %v8774_v12 = vld [vmem:[#allocation2 + $0x1668] ss:$16 sps:$4 sm:$0xff]   ;;  %v8843_v32 = vld [vmem:[#allocation6 + $0x70] ss:$8 sps:$4 sm:$0xff]  }
 0x32a   :  { %5857 = vmatpush1.bf16.msra.mxu0 %v8753_v43  ;;  %v8795_v41 = vld [vmem:[#allocation2 + $0x15e8] ss:$16 sps:$4 sm:$0xff]   ;;  %v8806_v43 = vld [vmem:[#allocation2 + $0x17cc] ss:$16 sps:$4 sm:$0xff]  }
 0x32b   :  { %5900 = vmatpush1.bf16.msra.mxu1 %v8756_v13  ;;  %5858 = vmatprep.subr.bf16.mxu0 %v8761_v18  ;;  %v5078_v13 = vadd.f32 %v9475_v61, %v5035_v3  ;;  %v5074_v18 = vadd.f32 %v9456_v40, %v5031_v7  ;;  %v8810_v61 = vld [vmem:[#allocation2 + $0x17a8] ss:$16 sps:$4 sm:$0xff]   ;;  %v8815_v40 = vld [vmem:[#allocation2 + $0x158c] ss:$16 sps:$4 sm:$0xff]  }
 0x32c   :  { %5901 = vmatprep.subr.bf16.mxu1 %v8764_v4  ;;  %v8848_v3 = vld [vmem:[#allocation6 + $0x64] ss:$8 sps:$4 sm:$0xff]  }
 0x32d   :  { %v5121_v4 = vadd.f32 %v9491_v34, %v5078_v13  ;;  %v8818_v34 = vld [vmem:[#allocation2 + $0x178c] ss:$16 sps:$4 sm:$0xff]  }
 0x32e   :  { %5859 = vmatpush1.bf16.msra.mxu0 %v8759_v28  ;;  %v8812_v28 = vld [vmem:[#allocation2 + $0x17ac] ss:$16 sps:$4 sm:$0xff]  }
 0x32f   :  { %5902 = vmatpush1.bf16.msra.mxu1 %v8762_v25  ;;  %5860 = vmatprep.subr.bf16.mxu0 %v8767_v50  ;;  %v5117_v25 = vadd.f32 %v9480_v11, %v5074_v18  ;;  %v5164_v50 = vadd.f32 %v9493_v37, %v5121_v4  ;;  %v8816_v11 = vld [vmem:[#allocation2 + $0x1788] ss:$16 sps:$4 sm:$0xff]   ;;  %v8821_v37 = vld [vmem:[#allocation2 + $0x156c] ss:$16 sps:$4 sm:$0xff]  }
 0x330   :  { %5903 = vmatprep.subr.bf16.mxu1 %v8770_v22  ;;  %v8807_v22 = vld [vmem:[#allocation2 + $0x15a8] ss:$16 sps:$4 sm:$0xff]   ;;  %v8891_v13 = vld [vmem:[#allocation6 + $0x170] ss:$8 sps:$4 sm:$0xff]  }
 0x331   :  { %v8893_v18 = vld [vmem:[#allocation6 + $0x174] ss:$8 sps:$4 sm:$0xff]  }
 0x332   :  { %5861 = vmatpush1.bf16.msra.mxu0 %v8765_v29  ;;  %v5160_v29 = vadd.f32 %v9482_v17, %v5117_v25  ;;  %v8819_v17 = vld [vmem:[#allocation2 + $0x1568] ss:$16 sps:$4 sm:$0xff]   ;;  %v8858_v25 = vld [vmem:[#allocation6 + $0x20] ss:$8 sps:$4 sm:$0xff]  }
 0x333   :  { %5904 = vmatpush1.bf16.msra.mxu1 %v8768_v59  ;;  %5862 = vmatprep.subr.bf16.mxu0 %v8773_v14  ;;  %v5207_v59 = vadd.f32 %v9509_v52, %v5164_v50  ;;  %v8822_v52 = vld [vmem:[#allocation2 + $0x1768] ss:$16 sps:$4 sm:$0xff]  }
 0x334   :  { %5905 = vmatprep.subr.bf16.mxu1 %v8776_v15  ;;  %v5203_v14 = vadd.f32 %v9498_v54, %v5160_v29  ;;  %v8813_v15 = vld [vmem:[#allocation2 + $0x1588] ss:$16 sps:$4 sm:$0xff]   ;;  %v8827_v54 = vld [vmem:[#allocation2 + $0x154c] ss:$16 sps:$4 sm:$0xff]  }
 0x335   :  { %v8857_v4 = vld [vmem:[#allocation6 + $0x34] ss:$8 sps:$4 sm:$0xff]   ;;  %v8902_v50 = vld [vmem:[#allocation6 + $0x144] ss:$8 sps:$4 sm:$0xff]  }
 0x336   :  { %5863 = vmatpush1.bf16.msra.mxu0 %v8771_v10  ;;  %v8824_v10 = vld [vmem:[#allocation2 + $0x176c] ss:$16 sps:$4 sm:$0xff]   ;;  %v8866_v29 = vld [vmem:[#allocation6 + $0x4] ss:$8 sps:$4 sm:$0xff]  }
 0x337   :  { %5906 = vmatpush1.bf16.msra.mxu1 %v8774_v12  ;;  %5864 = vmatprep.subr.bf16.mxu0 %v8779_v20  ;;  %v5250_v12 = vadd.f32 %v9511_v1, %v5207_v59  ;;  %v5246_v20 = vadd.f32 %v9500_v30, %v5203_v14  ;;  %v8825_v1 = vld [vmem:[#allocation2 + $0x1548] ss:$16 sps:$4 sm:$0xff]   ;;  %v8833_v30 = vld [vmem:[#allocation2 + $0x152c] ss:$16 sps:$4 sm:$0xff]  }
 0x338   :  { %5907 = vmatprep.subr.bf16.mxu1 %v8782_v21  ;;  %v8903_v59 = vld [vmem:[#allocation6 + $0x130] ss:$8 sps:$4 sm:$0xff]   ;;  %v8864_v14 = vld [vmem:[#allocation6] ss:$8 sps:$4 sm:$0xff]  }
 0x339   :  { %v5293_v21 = vadd.f32 %v9527_v53, %v5250_v12  ;;  %v8836_v53 = vld [vmem:[#allocation2 + $0x172c] ss:$16 sps:$4 sm:$0xff]   ;;  %v8911_v12 = vld [vmem:[#allocation6 + $0x114] ss:$8 sps:$4 sm:$0xff]  }
 0x33a   :  { %5865 = vmatpush1.bf16.msra.mxu0 %v8777_v16  ;;  %v8830_v16 = vld [vmem:[#allocation2 + $0x174c] ss:$16 sps:$4 sm:$0xff]  }
 0x33b   :  { %5908 = vmatpush1.bf16.msra.mxu1 %v8780_v46  ;;  %5866 = vmatprep.subr.bf16.mxu0 %v8785_v47  ;;  %v5289_v46 = vadd.f32 %v9516_v19, %v5246_v20  ;;  %v5378_v47 = vpop.f32.mrf.mxu0  ;;  %v8834_v19 = vld [vmem:[#allocation2 + $0x1728] ss:$16 sps:$4 sm:$0xff]  }
 0x33c   :  { %5909 = vmatprep.subr.bf16.mxu1 %v8788_v38  ;;  %v5336_v38 = vadd.f32 %v9529_v55, %v5293_v21  ;;  %v8839_v55 = vld [vmem:[#allocation2 + $0x150c] ss:$16 sps:$4 sm:$0xff]   ;;  %v8872_v20 = vld [vmem:[#allocation6 + $0xe4] ss:$8 sps:$4 sm:$0xff]  }
 0x33d   :  { %v5332_v35 = vadd.f32 %v9518_v44, %v5289_v46  ;;  %v8845_v44 = vld [vmem:[#allocation6 + $0x74] ss:$8 sps:$4 sm:$0xff]   ;;  %v8909_v21 = vld [vmem:[#allocation6 + $0x110] ss:$8 sps:$4 sm:$0xff]  }
 0x33e   :  { %5867 = vmatpush1.bf16.msra.mxu0 %v8783_v45  ;;  %v5379_v45 = vadd.f32 %v5378_v47, %v5336_v38  ;;  %v8873_v46 = vld [vmem:[#allocation6 + $0xd0] ss:$8 sps:$4 sm:$0xff]   ;;  %v8917_v47 = vld [vmem:[#allocation6 + $0x1f4] ss:$8 sps:$4 sm:$0xff]   ;;  %v8878_v38 = vld [vmem:[#allocation6 + $0xc4] ss:$8 sps:$4 sm:$0xff]  }
 0x33f   :  { %5910 = vmatpush1.bf16.msra.mxu1 %v8786_v2  ;;  %5868 = vmatprep.subr.bf16.mxu0 %v8791_v31  ;;  %v5375_v2 = vadd.f32 %v9534_v62, %v5332_v35  ;;  %v8831_v31 = vld [vmem:[#allocation2 + $0x1528] ss:$16 sps:$4 sm:$0xff]   ;;  %v8918_v35 = vld [vmem:[#allocation6 + $0x1e0] ss:$8 sps:$4 sm:$0xff]  }
 0x340   :  { %5911 = vmatprep.subr.bf16.mxu1 %v8794_v36  ;;  %v5421_v36 = vpop.f32.mrf.mxu1 }
 0x341   :  { %v5422_v9 = vadd.f32 %v5421_v36, %v5379_v45  ;;  %v8879_v45 = vld [vmem:[#allocation6 + $0xb0] ss:$8 sps:$4 sm:$0xff]   ;;  %v8882_v36 = vld [vmem:[#allocation6 + $0xa0] ss:$8 sps:$4 sm:$0xff]  }
 0x342   :  { %5869 = vmatpush1.bf16.msra.mxu0 %v8789_v6  ;;  %v5418_v6 = vadd.f32 %v9536_v0, %v5375_v2  ;;  %v8846_v0 = vld [vmem:[#allocation6 + $0x60] ss:$8 sps:$4 sm:$0xff]   ;;  %v8923_v2 = vld [vmem:[#allocation6 + $0x1d4] ss:$8 sps:$4 sm:$0xff]  }
 0x343   :  { %5912 = vmatpush1.bf16.msra.mxu1 %v8792_v48  ;;  %5870 = vmatprep.subr.bf16.mxu0 %v8797_v49  ;;  %v8837_v48 = vld [vmem:[#allocation2 + $0x1508] ss:$16 sps:$4 sm:$0xff]   ;;  %v5945_v62 = vmax.f32 %v5422_v9, 0.0  ;;  %v8924_v9 = vld [vmem:[#allocation6 + $0x1c0] ss:$8 sps:$4 sm:$0xff]  }
 0x344   :  { %5913 = vmatprep.subr.bf16.mxu1 %v8800_v23  ;;  %v8840_v49 = vld [vmem:[#allocation2 + $0x1708] ss:$16 sps:$4 sm:$0xff]   ;;  %v5941_v23 = vmax.f32 %v5418_v6, 0.0  ;;  %v8885_v6 = vld [vmem:[#allocation6 + $0x90] ss:$8 sps:$4 sm:$0xff]  }
 0x346   :  { %5871 = vmatpush2.bf16.msra.mxu0 %v8795_v41  ;;  %v5949_v7 = vpack.c.bf16 %v5945_v62, %v5941_v23  ;;  %v8851_v41 = vld [vmem:[#allocation6 + $0x54] ss:$8 sps:$4 sm:$0xff]   ;;  %v8927_v62 = vld [vmem:[#allocation6 + $0x1b0] ss:$8 sps:$4 sm:$0xff]   ;;  %v8932_v23 = vld [vmem:[#allocation6 + $0x1a4] ss:$8 sps:$4 sm:$0xff]  }
 0x347   :  { %5914 = vmatpush2.bf16.msra.mxu1 %v8798_v26  ;;  %5872 = vmatprep.subr.bf16.mxu0 %v8803_v24  ;;  %v8849_v26 = vld [vmem:[#allocation6 + $0x50] ss:$8 sps:$4 sm:$0xff]   ;;  %v8854_v24 = vld [vmem:[#allocation6 + $0x44] ss:$8 sps:$4 sm:$0xff]  }
 0x348   :  { %5915 = vmatprep.subr.bf16.mxu1 %v8806_v43  ;;  %v8852_v43 = vld [vmem:[#allocation6 + $0x40] ss:$8 sps:$4 sm:$0xff]  }
 0x34a   :  { %5873 = vmatpush2.bf16.msra.mxu0 %v8801_v27  ;;  %v8896_v27 = vld [vmem:[#allocation6 + $0x164] ss:$8 sps:$4 sm:$0xff]  }
 0x34b   :  { %5916 = vmatpush2.bf16.msra.mxu1 %v8804_v60  ;;  %5874 = vmatprep.subr.bf16.mxu0 %v8809_v39  ;;  %v8899_v60 = vld [vmem:[#allocation6 + $0x154] ss:$8 sps:$4 sm:$0xff]   ;;  %v8860_v39 = vld [vmem:[#allocation6 + $0x24] ss:$8 sps:$4 sm:$0xff]  }
 0x34c   :  { %5917 = vmatprep.subr.bf16.mxu1 %v8812_v28  ;;  %v8897_v28 = vld [vmem:[#allocation6 + $0x150] ss:$8 sps:$4 sm:$0xff]  }
 0x34e   :  { %5875 = vmatpush2.bf16.msra.mxu0 %v8807_v22  ;;  %v8863_v22 = vld [vmem:[#allocation6 + $0x14] ss:$8 sps:$4 sm:$0xff]  }
 0x34f   :  { %5918 = vmatpush2.bf16.msra.mxu1 %v8810_v61  ;;  %5876 = vmatprep.subr.bf16.mxu0 %v8815_v40  ;;  %v8900_v61 = vld [vmem:[#allocation6 + $0x140] ss:$8 sps:$4 sm:$0xff]   ;;  %v8861_v40 = vld [vmem:[#allocation6 + $0x10] ss:$8 sps:$4 sm:$0xff]  }
 0x350   :  { %5919 = vmatprep.subr.bf16.mxu1 %v8818_v34  ;;  %v8905_v34 = vld [vmem:[#allocation6 + $0x134] ss:$8 sps:$4 sm:$0xff]  }
 0x352   :  { %5877 = vmatpush2.bf16.msra.mxu0 %v8813_v15  ;;  %v8908_v15 = vld [vmem:[#allocation6 + $0x124] ss:$8 sps:$4 sm:$0xff]  }
 0x353   :  { %5920 = vmatpush2.bf16.msra.mxu1 %v8816_v11  ;;  %5878 = vmatprep.subr.bf16.mxu0 %v8821_v37  ;;  %v8869_v11 = vld [vmem:[#allocation6 + $0xf4] ss:$8 sps:$4 sm:$0xff]   ;;  %v8906_v37 = vld [vmem:[#allocation6 + $0x120] ss:$8 sps:$4 sm:$0xff]  }
 0x354   :  { %5921 = vmatprep.subr.bf16.mxu1 %v8824_v10  ;;  %v8867_v10 = vld [vmem:[#allocation6 + $0xf0] ss:$8 sps:$4 sm:$0xff]  }
 0x356   :  { %5879 = vmatpush2.bf16.msra.mxu0 %v8819_v17  ;;  %v8870_v17 = vld [vmem:[#allocation6 + $0xe0] ss:$8 sps:$4 sm:$0xff]  }
 0x357   :  { %5922 = vmatpush2.bf16.msra.mxu1 %v8822_v52  ;;  %5880 = vmatprep.subr.bf16.mxu0 %v8827_v54  ;;  %v8914_v52 = vld [vmem:[#allocation6 + $0x104] ss:$8 sps:$4 sm:$0xff]   ;;  %v8875_v54 = vld [vmem:[#allocation6 + $0xd4] ss:$8 sps:$4 sm:$0xff]  }
 0x358   :  { %5923 = vmatprep.subr.bf16.mxu1 %v8830_v16  ;;  %v8912_v16 = vld [vmem:[#allocation6 + $0x100] ss:$8 sps:$4 sm:$0xff]  }
 0x35a   :  { %5881 = vmatpush2.bf16.msra.mxu0 %v8825_v1  ;;  %v8915_v1 = vld [vmem:[#allocation6 + $0x1f0] ss:$8 sps:$4 sm:$0xff]  }
 0x35b   :  { %5924 = vmatpush2.bf16.msra.mxu1 %v8828_v33  ;;  %5882 = vmatprep.subr.bf16.mxu0 %v8833_v30  ;;  %v8876_v33 = vld [vmem:[#allocation6 + $0xc0] ss:$8 sps:$4 sm:$0xff]   ;;  %v8920_v30 = vld [vmem:[#allocation6 + $0x1e4] ss:$8 sps:$4 sm:$0xff]  }
 0x35c   :  { %5925 = vmatprep.subr.bf16.mxu1 %v8836_v53  ;;  %v8881_v53 = vld [vmem:[#allocation6 + $0xb4] ss:$8 sps:$4 sm:$0xff]  }
 0x35e   :  { %5883 = vmatpush2.bf16.msra.mxu0 %v8831_v31  ;;  %v8884_v31 = vld [vmem:[#allocation6 + $0xa4] ss:$8 sps:$4 sm:$0xff]  }
 0x35f   :  { %5926 = vmatpush2.bf16.msra.mxu1 %v8834_v19  ;;  %5884 = vmatprep.subr.bf16.mxu0 %v8839_v55  ;;  %v8921_v19 = vld [vmem:[#allocation6 + $0x1d0] ss:$8 sps:$4 sm:$0xff]   ;;  %v8926_v55 = vld [vmem:[#allocation6 + $0x1c4] ss:$8 sps:$4 sm:$0xff]  }
 0x360   :  { %5927 = vmatprep.subr.bf16.mxu1 %v8842_v8  ;;  %v8887_v8 = vld [vmem:[#allocation6 + $0x94] ss:$8 sps:$4 sm:$0xff]  }
 0x362   :  { %5885 = vmatpush2.bf16.msra.mxu0 %v8837_v48  ;;  %v8890_v48 = vld [vmem:[#allocation6 + $0x84] ss:$8 sps:$4 sm:$0xff]  }
 0x363   :  { %5928 = vmatpush2.bf16.msra.mxu1 %v8840_v49  ;;  %6348 = vmatprep.subr.bf16.mxu0 %v8845_v44  ;;  %v8888_v49 = vld [vmem:[#allocation6 + $0x80] ss:$8 sps:$4 sm:$0xff]   ;;  %v8929_v44 = vld [vmem:[#allocation6 + $0x1b4] ss:$8 sps:$4 sm:$0xff]  }
 0x364   :  { %6391 = vmatprep.subr.bf16.mxu1 %v8893_v18 }
 0x365   :  { %5887 = vmatmul.mubr.bf16.vlgmr.msra.gmra.mxu0 %v9467_v57  ;;  %v8894_v57 = vld [vmem:[#allocation6 + $0x160] ss:$8 sps:$4 sm:$0xff]  }
 0x366   :  { %5930 = vmatmul.mubr.bf16.vlgmr.msra.gmra.mxu1 %v9471_v58  ;;  %6349 = vmatpush1.bf16.msra.mxu0 %v8843_v32  ;;  %v8855_v58 = vld [vmem:[#allocation6 + $0x30] ss:$8 sps:$4 sm:$0xff]   ;;  %v8930_v32 = vld [vmem:[#allocation6 + $0x1a0] ss:$8 sps:$4 sm:$0xff]  }
 0x367   :  { %6380 = vmatprep.mubr.bf16.mxu0 %v5949_v7  ;;  %6350 = vmatprep.subr.bf16.mxu0 %v8848_v3  ;;  %v8935_v3 = vld [vmem:[#allocation6 + $0x194] ss:$8 sps:$4 sm:$0xff]   ;;  %v8933_v7 = vld [vmem:[#allocation6 + $0x190] ss:$8 sps:$4 sm:$0xff]  }
 0x368   :  { %6392 = vmatpush1.bf16.msra.mxu1 %v8891_v13 }
 0x369   :  { %6393 = vmatprep.subr.bf16.mxu1 %v8896_v27 }
 0x36a   :  { %6351 = vmatpush1.bf16.msra.mxu0 %v8846_v0  ;;  %v8938_v0 = vld [vmem:[#allocation6 + $0x184] ss:$8 sps:$4 sm:$0xff]  }
 0x36b   :  { %6352 = vmatprep.subr.bf16.mxu0 %v8851_v41  ;;  %v8936_v41 = vld [vmem:[#allocation6 + $0x180] ss:$8 sps:$4 sm:$0xff]  }
 0x36c   :  { %6394 = vmatpush1.bf16.msra.mxu1 %v8894_v57  ;;  %v8939_v57 = vld [vmem:[#allocation9 + $0x78] sm:$0xff]  }
 0x36d   :  { %6395 = vmatprep.subr.bf16.mxu1 %v8899_v60  ;;  %v8941_v60 = vld [vmem:[#allocation9 + $0x70] sm:$0xff]  }
 0x36e   :  { %6353 = vmatpush1.bf16.msra.mxu0 %v8849_v26  ;;  %v5458_v26 = vpop.f32.mrf.mxu0 }
 0x36f   :  { %6354 = vmatprep.subr.bf16.mxu0 %v8854_v24  ;;  %v5501_v24 = vpop.f32.mrf.mxu1 }
 0x370   :  { %6396 = vmatpush1.bf16.msra.mxu1 %v8897_v28 }
 0x371   :  { %6397 = vmatprep.subr.bf16.mxu1 %v8902_v50  ;;  %v5503_v13 = vpop.f32.mrf.mxu1  ;;  %v8943_v50 = vld [vmem:[#allocation9 + $0x68] sm:$0xff]  }
 0x372   :  { %6355 = vmatpush1.bf16.msra.mxu0 %v8852_v43  ;;  %v5460_v43 = vpop.f32.mrf.mxu0 }
 0x373   :  { %6356 = vmatprep.subr.bf16.mxu0 %v8857_v4 }
 0x374   :  { %6398 = vmatpush1.bf16.msra.mxu1 %v8900_v61  ;;  %v5462_v18 = vpop.f32.mrf.mxu0 }
 0x375   :  { %6399 = vmatprep.subr.bf16.mxu1 %v8905_v34  ;;  %v8945_v34 = vld [vmem:[#allocation9 + $0x60] sm:$0xff]  }
 0x376   :  { %6357 = vmatpush1.bf16.msra.mxu0 %v8855_v58  ;;  %v5464_v4 = vpop.f32.mrf.mxu0  ;;  %v8940_v58 = vld [vmem:[#allocation9 + $0x38] sm:$0xff]  }
 0x377   :  { %6358 = vmatprep.subr.bf16.mxu0 %v8860_v39 }
 0x378   :  { %6400 = vmatpush1.bf16.msra.mxu1 %v8903_v59  ;;  %v5544_v39 = vpop.f32.mrf.mxu0 }
 0x379   :  { %6401 = vmatprep.subr.bf16.mxu1 %v8908_v15  ;;  %v8947_v15 = vld [vmem:[#allocation9 + $0x58] sm:$0xff]  }
 0x37a   :  { %6359 = vmatpush1.bf16.msra.mxu0 %v8858_v25  ;;  %v8942_v25 = vld [vmem:[#allocation9 + $0x30] sm:$0xff]  }
 0x37b   :  { %6360 = vmatprep.subr.bf16.mxu0 %v8863_v22  ;;  %v5546_v22 = vpop.f32.mrf.mxu0 }
 0x37c   :  { %6402 = vmatpush1.bf16.msra.mxu1 %v8906_v37 }
 0x37d   :  { %6403 = vmatprep.subr.bf16.mxu1 %v8911_v12 }
 0x37e   :  { %6361 = vmatpush1.bf16.msra.mxu0 %v8861_v40  ;;  %v8944_v40 = vld [vmem:[#allocation9 + $0x28] sm:$0xff]  }
 0x37f   :  { %6362 = vmatprep.subr.bf16.mxu0 %v8866_v29  ;;  %v5548_v29 = vpop.f32.mrf.mxu0 }
 0x380   :  { %6404 = vmatpush1.bf16.msra.mxu1 %v8909_v21 }
 0x381   :  { %6405 = vmatprep.subr.bf16.mxu1 %v8914_v52  ;;  %v942_v52 = vsub.s32 3, %v9358_v63 }
 0x382   :  { %6363 = vmatpush1.bf16.msra.mxu0 %v8864_v14  ;;  %v8946_v14 = vld [vmem:[#allocation9 + $0x20] sm:$0xff]  }
 0x383   :  { %6364 = vmatprep.subr.bf16.mxu0 %v8869_v11  ;;  %v5550_v11 = vpop.f32.mrf.mxu0 }
 0x384   :  { %6406 = vmatpush1.bf16.msra.mxu1 %v8912_v16 }
 0x385   :  { %6407 = vmatprep.subr.bf16.mxu1 %v8917_v47  ;;  %v943_v47 = vrot.slane %v9552_v42, %v942_v52 }
 0x386   :  { %6365 = vmatpush2.bf16.msra.mxu0 %v8867_v10  ;;  %v5630_v10 = vpop.f32.mrf.mxu0 }
 0x387   :  { %6366 = vmatprep.subr.bf16.mxu0 %v8872_v20  ;;  %v8948_v20 = vld [vmem:[#allocation9 + $0x18] sm:$0xff]  }
 0x388   :  { %6408 = vmatpush2.bf16.msra.mxu1 %v8915_v1  ;;  %v5632_v21 = vpop.f32.mrf.mxu0 }
 0x389   :  { %6409 = vmatprep.subr.bf16.mxu1 %v8920_v30 }
 0x38a   :  { %6367 = vmatpush2.bf16.msra.mxu0 %v8870_v17  ;;  %v5634_v16 = vpop.f32.mrf.mxu0 }
 0x38b   :  { %6368 = vmatprep.subr.bf16.mxu0 %v8875_v54  ;;  %v938_v54 = vsub.s32 2, %v9358_v63 }
 0x38c   :  { %6410 = vmatpush2.bf16.msra.mxu1 %v8918_v35  ;;  %v5636_v1 = vpop.f32.mrf.mxu0  ;;  %v5461_v35 = vadd.f32 %v5460_v43, %v943_v47 }
 0x38d   :  { %6411 = vmatprep.subr.bf16.mxu1 %v8923_v2 }
 0x38e   :  { %6369 = vmatpush2.bf16.msra.mxu0 %v8873_v46 }
 0x38f   :  { %6370 = vmatprep.subr.bf16.mxu0 %v8878_v38  ;;  %v939_v38 = vrot.slane %v9552_v42, %v938_v54 }
 0x390   :  { %6412 = vmatpush2.bf16.msra.mxu1 %v8921_v19 }
 0x391   :  { %6413 = vmatprep.subr.bf16.mxu1 %v8926_v55  ;;  %v5463_v2 = vadd.f32 %v5462_v18, %v939_v38  ;;  %v5465_v55 = vadd.f32 %v5464_v4, %v943_v47 }
 0x392   :  { %6371 = vmatpush2.bf16.msra.mxu0 %v8876_v33 }
 0x393   :  { %6372 = vmatprep.subr.bf16.mxu0 %v8881_v53 }
 0x394   :  { %6414 = vmatpush2.bf16.msra.mxu1 %v8924_v9 }
 0x395   :  { %6415 = vmatprep.subr.bf16.mxu1 %v8929_v44 }
 0x396   :  { %6373 = vmatpush2.bf16.msra.mxu0 %v8879_v45  ;;  %v5459_v45 = vadd.f32 %v5458_v26, %v939_v38 }
 0x397   :  { %6374 = vmatprep.subr.bf16.mxu0 %v8884_v31 }
 0x398   :  { %6416 = vmatpush2.bf16.msra.mxu1 %v8927_v62 }
 0x399   :  { %6417 = vmatprep.subr.bf16.mxu1 %v8932_v23 }
 0x39a   :  { %6375 = vmatpush2.bf16.msra.mxu0 %v8882_v36  ;;  %v5504_v36 = vadd.f32 %v5503_v13, %v5461_v35 }
 0x39b   :  { %6376 = vmatprep.subr.bf16.mxu0 %v8887_v8  ;;  %v5502_v8 = vadd.f32 %v5501_v24, %v5459_v45 }
 0x39c   :  { %6418 = vmatpush2.bf16.msra.mxu1 %v8930_v32 }
 0x39d   :  { %6419 = vmatprep.subr.bf16.mxu1 %v8935_v3 }
 0x39e   :  { %6377 = vmatpush2.bf16.msra.mxu0 %v8885_v6  ;;  %v5547_v6 = vadd.f32 %v5546_v22, %v5504_v36 }
 0x39f   :  { %6378 = vmatprep.subr.bf16.mxu0 %v8890_v48  ;;  %v5545_v48 = vadd.f32 %v5544_v39, %v5502_v8 }
 0x3a0   :  { %6420 = vmatpush2.bf16.msra.mxu1 %v8933_v7 }
 0x3a1   :  { %6421 = vmatprep.subr.bf16.mxu1 %v8938_v0 }
 0x3a2   :  { %6379 = vmatpush2.bf16.msra.mxu0 %v8888_v49 }
 0x3a3   :  { %7624 = vmatprep.subr.bf16.mxu0 %v8939_v57 }
 0x3a4   :  { %6422 = vmatpush2.bf16.msra.mxu1 %v8936_v41 }
 0x3a5   :  { %6381 = vmatmul.mubr.bf16.vlgmr.msra.gmra.mxu0 %v9541_v51  ;;  %v5505_v51 = vpop.f32.mrf.mxu1  ;;  %v5716_v30 = vpop.f32.mrf.mxu0 }
 0x3a6   :  { %7625 = vmatpush3.bf16.msra.mxu0 %v8940_v58  ;;  %v5506_v9 = vadd.f32 %v5505_v51, %v5463_v2 }
 0x3a7   :  { %v5507_v27 = vpop.f32.mrf.mxu1  ;;  %7626 = vmatprep.subr.bf16.mxu0 %v8941_v60  ;;  %v5718_v31 = vpop.f32.mrf.mxu0 }
 0x3a8   :  { %v5508_v62 = vadd.f32 %v5507_v27, %v5465_v55  ;;  %v5549_v23 = vadd.f32 %v5548_v29, %v5506_v9 }
 0x3a9   :  { %v5587_v28 = vpop.f32.mrf.mxu1  ;;  %v5720_v49 = vpop.f32.mrf.mxu0 }
 0x3aa   :  { %7627 = vmatpush3.bf16.msra.mxu0 %v8942_v25  ;;  %v5551_v32 = vadd.f32 %v5550_v11, %v5508_v62  ;;  %v5588_v3 = vadd.f32 %v5587_v28, %v5545_v48 }
 0x3ab   :  { %v5589_v61 = vpop.f32.mrf.mxu1  ;;  %7628 = vmatprep.subr.bf16.mxu0 %v8943_v50  ;;  %v5722_v7 = vpop.f32.mrf.mxu0 }
 0x3ac   :  { %v5590_v42 = vadd.f32 %v5589_v61, %v5547_v6  ;;  %v5631_v43 = vadd.f32 %v5630_v10, %v5588_v3  ;;  %v8951_v3 = vld [vmem:[#allocation9 + $0x48] sm:$0xff]  }
 0x3ad   :  { %v5591_v59 = vpop.f32.mrf.mxu1 }
 0x3ae   :  { %7629 = vmatpush3.bf16.msra.mxu0 %v8944_v40  ;;  %v5592_v41 = vadd.f32 %v5591_v59, %v5549_v23  ;;  %v5633_v26 = vadd.f32 %v5632_v21, %v5590_v42  ;;  %v8949_v42 = vld [vmem:[#allocation9 + $0x50] sm:$0xff]  }
 0x3af   :  { %7630 = vmatprep.subr.bf16.mxu0 %v8945_v34  ;;  %v5593_v37 = vpop.f32.mrf.mxu1 }
 0x3b0   :  { %v5594_v13 = vadd.f32 %v5593_v37, %v5551_v32  ;;  %v5635_v4 = vadd.f32 %v5634_v16, %v5592_v41  ;;  %v8950_v32 = vld [vmem:[#allocation9 + $0x10] sm:$0xff]   ;;  %v8954_v41 = vld [vmem:[#allocation9] sm:$0xff]  }
 0x3b1   :  { %v5673_v12 = vpop.f32.mrf.mxu1 }
 0x3b2   :  { %7631 = vmatpush3.bf16.msra.mxu0 %v8946_v14  ;;  %v5637_v51 = vadd.f32 %v5636_v1, %v5594_v13  ;;  %v5674_v58 = vadd.f32 %v5673_v12, %v5631_v43  ;;  %v9148_v43 = vmov 0.0   ;;  %v8958_v13 = vld [vmem:[#allocation12 + $0x20] sm:$0xff]  }
 0x3b3   :  { %7632 = vmatprep.subr.bf16.mxu0 %v8947_v15  ;;  %v5675_v17 = vpop.f32.mrf.mxu1  ;;  %7655 = vmatprep.subr.bf16.mxu1 %v9148_v43 }
 0x3b4   :  { %v5676_v24 = vadd.f32 %v5675_v17, %v5633_v26  ;;  %v5717_v50 = vadd.f32 %v5716_v30, %v5674_v58  ;;  %v8955_v26 = vld [vmem:[#allocation12 + $0x38] sm:$0xff]  }
 0x3b5   :  { %v5677_v46 = vpop.f32.mrf.mxu1 }
 0x3b6   :  { %7633 = vmatpush3.bf16.msra.mxu0 %v8948_v20  ;;  %v5678_v25 = vadd.f32 %v5677_v46, %v5635_v4  ;;  %v5719_v27 = vadd.f32 %v5718_v31, %v5676_v24 }
 0x3b7   :  { %v5679_v33 = vpop.f32.mrf.mxu1  ;;  %7634 = vmatprep.subr.bf16.mxu0 %v8949_v42 }
 0x3b8   :  { %v5680_v22 = vadd.f32 %v5679_v33, %v5637_v51  ;;  %v5721_v61 = vadd.f32 %v5720_v49, %v5678_v25  ;;  %v6016_v51 = vld [vmem:[#allocation7] sm:$0x3] }
 0x3b9   :  { %v5759_v53 = vpop.f32.mrf.mxu1 }
 0x3ba   :  { %v5723_v29 = vadd.f32 %v5722_v7, %v5680_v22  ;;  %v5760_v59 = vadd.f32 %v5759_v53, %v5717_v50  ;;  %7635 = vmatpush3.bf16.msra.mxu0 %v8950_v32  ;;  %v8952_v7 = vld [vmem:[#allocation9 + $0x8] sm:$0xff]  }
 0x3bb   :  { %v5761_v19 = vpop.f32.mrf.mxu1  ;;  %7636 = vmatprep.subr.bf16.mxu0 %v8951_v3 }
 0x3bc   :  { %v5762_v34 = vadd.f32 %v5761_v19, %v5719_v27 }
 0x3bd   :  { %v5763_v44 = vpop.f32.mrf.mxu1 }
 0x3be   :  { %v5764_v14 = vadd.f32 %v5763_v44, %v5721_v61  ;;  %7637 = vmatpush3.bf16.msra.mxu0 %v8952_v7 }
 0x3bf   :  { %v5765_v0 = vpop.f32.mrf.mxu1 }
 0x3c0   :  { %v5766_v20 = vadd.f32 %v5765_v0, %v5723_v29  ;;  %v8953_v0 = vld [vmem:[#allocation9 + $0x40] sm:$0xff]  }
 0x3c1   :  { %7638 = vmatprep.subr.bf16.mxu0 %v8953_v0 }
 0x3c2   :  { %7639 = vmatpush3.bf16.msra.mxu0 %v8954_v41 }
 0x3e5   :  { %v5802_v18 = vpop.f32.mrf.mxu0 }
 0x3e6   :  { %v5845_v57 = vpop.f32.mrf.mxu1  ;;  %v5803_v11 = vadd.f32 %v5802_v18, %v5760_v59  ;;  %v8956_v18 = vld [vmem:[#allocation12 + $0x30] sm:$0xff]  }
 0x3e7   :  { %v5804_v60 = vpop.f32.mrf.mxu0 }
 0x3e8   :  { %v5847_v39 = vpop.f32.mrf.mxu1  ;;  %v5805_v15 = vadd.f32 %v5804_v60, %v5762_v34  ;;  %v5846_v16 = vadd.f32 %v5845_v57, %v5803_v11  ;;  %v8957_v57 = vld [vmem:[#allocation12 + $0x28] sm:$0xff]   ;;  %v6025_v60 = vrot.slane %v6016_v51, %v934_v56 }
 0x3e9   :  { %v5806_v28 = vpop.f32.mrf.mxu0 }
 0x3ea   :  { %v5849_v40 = vpop.f32.mrf.mxu1  ;;  %v5807_v21 = vadd.f32 %v5806_v28, %v5764_v14  ;;  %v5848_v52 = vadd.f32 %v5847_v39, %v5805_v15  ;;  %v6021_v39 = vrot.slane %v6016_v51, %v930_v5  ;;  %v8959_v5 = vld [vmem:[#allocation12 + $0x18] sm:$0xff]  }
 0x3eb   :  { %v5808_v37 = vpop.f32.mrf.mxu0 }
 0x3ec   :  { %v5851_v10 = vpop.f32.mrf.mxu1  ;;  %v5809_v54 = vadd.f32 %v5808_v37, %v5766_v20  ;;  %v5850_v38 = vadd.f32 %v5849_v40, %v5807_v21 }
 0x3ee   :  { %v5852_v53 = vadd.f32 %v5851_v10, %v5809_v54 }
 0x425   :  { %v5888_v12 = vpop.f32.mrf.mxu0 }
 0x426   :  { %v5931_v17 = vpop.f32.mrf.mxu1  ;;  %v5889_v33 = vadd.f32 %v5888_v12, %v5846_v16  ;;  %v8960_v12 = vld [vmem:[#allocation12 + $0x10] sm:$0xff]  }
 0x427   :  { %v5890_v46 = vpop.f32.mrf.mxu0 }
 0x428   :  { %v5933_v47 = vpop.f32.mrf.mxu1  ;;  %v5891_v1 = vadd.f32 %v5890_v46, %v5848_v52  ;;  %v5932_v55 = vadd.f32 %v5931_v17, %v5889_v33  ;;  %v8961_v17 = vld [vmem:[#allocation12 + $0x8] sm:$0xff]   ;;  %v8962_v52 = vld [vmem:[#allocation12] sm:$0xff]  }
 0x429   :  { %v5892_v30 = vpop.f32.mrf.mxu0 }
 0x42a   :  { %v5935_v35 = vpop.f32.mrf.mxu1  ;;  %v5893_v45 = vadd.f32 %v5892_v30, %v5850_v38  ;;  %v5934_v31 = vadd.f32 %v5933_v47, %v5891_v1  ;;  %v5942_v44 = vmax.f32 %v5932_v55, 0.0  ;;  %v7598_v47 = vld [vmem:[#allocation10] ss:$0 sm:$0xff] }
 0x42b   :  { %v5894_v2 = vpop.f32.mrf.mxu0 }
 0x42c   :  { %v5936_v19 = vadd.f32 %v5935_v35, %v5893_v45  ;;  %v5895_v36 = vadd.f32 %v5894_v2, %v5852_v53  ;;  %v5937_v8 = vpop.f32.mrf.mxu1  ;;  %v5943_v48 = vmax.f32 %v5934_v31, 0.0  ;;  %v7615_v31 = vld [vmem:[#allocation13] ss:$0 sm:$0xff] }
 0x42e   :  { %v5938_v9 = vadd.f32 %v5937_v8, %v5895_v36  ;;  %v5946_v6 = vmax.f32 %v5936_v19, 0.0 }
 0x430   :  { %v5947_v49 = vmax.f32 %v5938_v9, 0.0  ;;  %v5950_v23 = vpack.c.bf16 %v5946_v6, %v5942_v44 }
 0x432   :  { %v5951_v62 = vpack.c.bf16 %v5947_v49, %v5943_v48 }
 0x434   :  { %6423 = vmatprep.mubr.bf16.mxu1 %v5951_v62 }
 0x435   :  { %6424 = vmatmul.mubr.bf16.vlgmr.msra.gmra.mxu1 %v5950_v23 }
 0x436   :  { %7656 = vmatpush3.bf16.msra.mxu1 %v8955_v26  ;;  %7671 = vmatprep.mubr.msk.bf16.mxu1 %vm9149_vm0, %v9148_v43 }
 0x437   :  { %7657 = vmatprep.subr.bf16.mxu1 %v9148_v43 }
 0x43a   :  { %7658 = vmatpush3.bf16.msra.mxu1 %v8956_v18 }
 0x43b   :  { %7659 = vmatprep.subr.bf16.mxu1 %v9148_v43 }
 0x43e   :  { %7660 = vmatpush3.bf16.msra.mxu1 %v8957_v57 }
 0x43f   :  { %7661 = vmatprep.subr.bf16.mxu1 %v9148_v43 }
 0x442   :  { %7662 = vmatpush3.bf16.msra.mxu1 %v8958_v13 }
 0x443   :  { %7663 = vmatprep.subr.bf16.mxu1 %v9148_v43 }
 0x446   :  { %7664 = vmatpush3.bf16.msra.mxu1 %v8959_v5 }
 0x447   :  { %7665 = vmatprep.subr.bf16.mxu1 %v9148_v43 }
 0x44a   :  { %7666 = vmatpush3.bf16.msra.mxu1 %v8960_v12 }
 0x44b   :  { %7667 = vmatprep.subr.bf16.mxu1 %v9148_v43 }
 0x44e   :  { %7668 = vmatpush3.bf16.msra.mxu1 %v8961_v17 }
 0x44f   :  { %7669 = vmatprep.subr.bf16.mxu1 %v9148_v43 }
 0x452   :  { %7670 = vmatpush3.bf16.msra.mxu1 %v8962_v52 }
 0x465   :  { %v6382_v4 = vpop.f32.mrf.mxu0 }
 0x466   :  { %v6383_v28 = vadd.f32 %v6382_v4, %v6021_v39 }
 0x467   :  { %v6384_v24 = vpop.f32.mrf.mxu0 }
 0x468   :  { %v6385_v22 = vadd.f32 %v6384_v24, %v6025_v60 }
 0x469   :  { %v6386_v58 = vpop.f32.mrf.mxu0 }
 0x46a   :  { %v6387_v61 = vadd.f32 %v6386_v58, %v6021_v39 }
 0x46b   :  { %v6388_v27 = vpop.f32.mrf.mxu0 }
 0x46c   :  { %v6389_v34 = vadd.f32 %v6388_v27, %v6025_v60 }
 0x4f5   :  { %v6425_v25 = vpop.f32.mrf.mxu1 }
 0x4f6   :  { %v6426_v14 = vadd.f32 %v6425_v25, %v6383_v28 }
 0x4f7   :  { %v6427_v50 = vpop.f32.mrf.mxu1 }
 0x4f8   :  { %v6428_v29 = vadd.f32 %v6427_v50, %v6385_v22  ;;  %v6434_v56 = vmax.f32 %v6426_v14, 0.0 }
 0x4f9   :  { %v6429_v40 = vpop.f32.mrf.mxu1 }
 0x4fa   :  { %v6430_v59 = vadd.f32 %v6429_v40, %v6387_v61  ;;  %v6435_v10 = vmax.f32 %v6428_v29, 0.0 }
 0x4fb   :  { %v6431_v15 = vpop.f32.mrf.mxu1 }
 0x4fc   :  { %v6432_v11 = vadd.f32 %v6431_v15, %v6389_v34  ;;  %v6436_v37 = vmax.f32 %v6430_v59, 0.0 }
 0x4fe   :  { %v6437_v20 = vmax.f32 %v6432_v11, 0.0  ;;  %v6438_v63 = vpack.c.bf16 %v6436_v37, %v6434_v56 }
 0x500   :  { %v6439_v21 = vpack.c.bf16 %v6437_v20, %v6435_v10 }
 0x502   :  { %6607 = vmatprep.mubr.bf16.mxu0 %v6439_v21 }
 0x503   :  { %6608 = vmatmul.mubr.bf16.vlgmr.msra.gmra.mxu0 %v6438_v63 }
 0x5c3   :  { %v7640_v54 = vpop.f32.mrf.mxu0 }
 0x5c5   :  { %v7641_v16 = vpop.f32.mrf.mxu0 }
 0x5c6   :  { %v7642_v46 = vadd.f32 %v7641_v16, %v7640_v54 }
 0x5c7   :  { %v7643_v38 = vpop.f32.mrf.mxu0 }
 0x5c8   :  { %v6610_v33 = vadd.f32 %v7642_v46, %v7598_v47 }
 0x5c9   :  { %v7644_v1 = vpop.f32.mrf.mxu0 }
 0x5ca   :  { %v7645_v30 = vadd.f32 %v7644_v1, %v7643_v38  ;;  %v6616_v53 = vmax.f32 %v6610_v33, 0.0 }
 0x5cc   :  { %v6613_v35 = vadd.f32 %v7645_v30, %v7598_v47 }
 0x5ce   :  { %v6617_v45 = vmax.f32 %v6613_v35, 0.0 }
 0x5d0   :  { %v6618_v2 = vpack.c.bf16 %v6617_v45, %v6616_v53 }
 0x5d2   :  { %7672 = vmatmul.mubr.bf16.vlgmr.msra.gmra.mxu1 %v6618_v2 }
 0x692   :  { %v6724_v19 = vpop.f32.mrf.mxu1 }
 0x693   :  { %v6725_v36 = vadd.f32 %v7615_v31, %v6724_v19 }
 0x694   :  { %v7673_v55 = vpop.f32.mrf.mxu1 }
 0x695   :  { %6731 = vst [vmem:[%s9605_s9] sm:$0xff] %v6725_v36 }
 0x696   :  { %v6727_v8 = vpop.f32.mrf.mxu1 }
 0x697   :  { %v6728_v9 = vadd.f32 %v7615_v31, %v6727_v8 }
 0x698   :  { %v7674_v6 = vpop.f32.mrf.mxu1 }
 0x699   :  { %6732 = vst [vmem:[%s9605_s9 + $0x8] sm:$0xff] %v6728_v9 }
 0x69a   :  { %6737 = vsyncpa [#allocation3], 1 }
 0x69b   :  { %6738 = vsyncpa [#allocation5], 1 }
 0x69c   :  { %6739 = vsyncpa [#allocation8], 1 }
 0x69d   :  { %6740 = vsyncpa [#allocation11], 1 }
 0x69e   :  { %6741 = vsyncpa [#allocation14], 1 }

</bundles_post_ra>
